<compile_context>
chip_gen: v7x
topology: tpu7x:2x2x1
jax: 0.10.0
libtpu: 0.0.40
codegen_flags: <defaults>
</compile_context>

<pallas_src>
import functools

import jax
import jax.numpy as jnp
from jax.experimental import pallas as pl
from jax.experimental.pallas import tpu as pltpu

EPS = 1e-5
_PREC_CONV = jax.lax.Precision.HIGHEST
_PREC_FOLD = jax.lax.Precision.DEFAULT


def _residual_block_kernel(x_ref, w1_ref, w2_ref, p_ref,
                           g1_ref, b1_ref, g2_ref, b2_ref, o_ref, *, H):
  """All activations are lane-dense (N*H, W*C) slabs.

  x_ref      : (NH, WC) input (also used directly as the identity residual).
  w1/w2_ref  : (3*WC, WC) K-concatenated banded conv weights (one WCxWC slab
               per kernel row ky, horizontal taps + channel mixing folded in).
  p_ref      : (WC, WC) channel-fold matrix, entries 1/(N*H*W) on matching
               channel lanes: maps lane sums -> per-channel means broadcast
               back over the lane axis.
  g*/b*_ref  : (1, WC) BN affine params tiled over the lane axis.
  o_ref      : (NH, WC) lane-dense output (full-width unmasked vst).
  """
  # Hoist all constant loads once (JAX does not CSE repeated ref[...] vlds).
  x = x_ref[...]
  w1 = w1_ref[...]
  w2 = w2_ref[...]
  p = p_ref[...]
  g1 = g1_ref[...]
  b1 = b1_ref[...]
  g2 = g2_ref[...]
  b2 = b2_ref[...]

  NH = x.shape[0]
  # Per-row boundary masks: zero rows whose vertical tap would cross an image
  # boundary (h==0 for the up tap, h==H-1 for the down tap). This also zeroes
  # the circular wrap of the rolls, so batch images never bleed into each
  # other.
  h = jax.lax.broadcasted_iota(jnp.int32, (NH, 1), 0) % H
  mask_up = jnp.where(h != 0, 1.0, 0.0).astype(x.dtype)
  mask_dn = jnp.where(h != H - 1, 1.0, 0.0).astype(x.dtype)

  def conv3x3(y, w_cat):
    # Vertical taps via XLU sublane rolls (non-negative shifts only).
    y_up = pltpu.roll(y, 1, axis=0) * mask_up         # row h-1, zero at h==0
    y_dn = pltpu.roll(y, NH - 1, axis=0) * mask_dn    # row h+1, zero at h==H-1
    # One K-concatenated MXU matmul for all three kernel rows.
    y_cat = jnp.concatenate([y_up, y, y_dn], axis=1)  # (NH, 3*WC)
    return jnp.dot(y_cat, w_cat, preferred_element_type=jnp.float32,
                   precision=_PREC_CONV)

  def batchnorm(y, g, b):
    # Single-pass batch statistics (training-mode BN, biased variance):
    # sublane-reduce first (XLU), then a tiny (1,WC)x(WC,WC) fold matmul that
    # sums the W lane groups per channel and broadcasts the result back over
    # the lane axis (the 1/(N*H*W) factor is folded into p).
    s = jnp.sum(y, axis=0, keepdims=True)             # (1, WC)
    s2 = jnp.sum(y * y, axis=0, keepdims=True)        # (1, WC)
    mean = jnp.dot(s, p, preferred_element_type=jnp.float32,
                   precision=_PREC_FOLD)
    ex2 = jnp.dot(s2, p, preferred_element_type=jnp.float32,
                  precision=_PREC_FOLD)
    # TODO(synk): E[x^2]-mean^2 cancellation is fine at the 1e-3 bar / these
    # reduction sizes; switch to a two-pass centered variance if that tightens.
    var = jnp.maximum(ex2 - mean * mean, 0.0)
    return (y - mean) * (jax.lax.rsqrt(var + EPS) * g) + b

  # left branch: conv1 -> BN1 -> ReLU
  y1 = jnp.maximum(batchnorm(conv3x3(x, w1), g1, b1), 0.0)
  # conv2 -> BN2
  z = batchnorm(conv3x3(y1, w2), g2, b2)
  # identity residual (stride=1, inchannel == outchannel, shortcut=None) + ReLU
  o_ref[...] = jnp.maximum(z + x, 0.0)


def _banded_conv_weights(w_oihw, Wd, C):
  """OIHW (Co, Ci, 3, 3) -> (3*Wd*C, Wd*C) K-concatenated banded weights.

  Slab[ky][wi*C + ci, w*C + co] = w[co, ci, ky, kx] with wi = w + kx - 1
  (entries absent when the horizontal tap falls outside the image), so the
  ky-row contribution of the conv is `row_shifted_x @ Slab[ky]` in the
  (N*H, W*C) layout; the three slabs are concatenated along K.
  """
  taps = jnp.transpose(w_oihw, (2, 3, 1, 0)).astype(jnp.float32)  # (ky,kx,Ci,Co)
  slabs = []
  for ky in range(3):
    m = jnp.zeros((Wd, C, Wd, C), jnp.float32)
    for kx in range(3):
      sel = jnp.eye(Wd, k=1 - kx, dtype=jnp.float32)  # 1 at (wi = w+kx-1, w)
      m = m + jnp.einsum('vw,io->viwo', sel, taps[ky, kx])
    slabs.append(m.reshape(Wd * C, Wd * C))
  return jnp.concatenate(slabs, axis=0)               # (3*Wd*C, Wd*C)


def residual_block_pallas(x_nchw, w1, g1, b1, w2, g2, b2):
  """x_nchw: (N, C, H, W) float32. w1/w2: (Cout, Cin, 3, 3) PyTorch OIHW.
  Returns (N, C, H, W) float32 matching ResidualBlock.forward (training BN)."""
  N, C, H, W = x_nchw.shape
  NH, WC = N * H, W * C

  # ---- layout plumbing / constant folding (JAX glue, outside the kernel) ----
  x2d = jnp.transpose(x_nchw, (0, 2, 3, 1)).astype(jnp.float32).reshape(NH, WC)
  w1k = _banded_conv_weights(w1, W, C)
  w2k = _banded_conv_weights(w2, W, C)
  # channel-fold matrix: (s @ P)[w*C+c] = (1/(N*H*W)) * sum_w' s[w'*C+c]
  p = jnp.tile(jnp.eye(C, dtype=jnp.float32), (W, W)) / float(N * H * W)
  g1k = jnp.tile(g1.astype(jnp.float32), W).reshape(1, WC)
  b1k = jnp.tile(b1.astype(jnp.float32), W).reshape(1, WC)
  g2k = jnp.tile(g2.astype(jnp.float32), W).reshape(1, WC)
  b2k = jnp.tile(b2.astype(jnp.float32), W).reshape(1, WC)

  full = lambda shp: pl.BlockSpec(shp, lambda i, n=len(shp): (0,) * n)

  out2d = pl.pallas_call(
      functools.partial(_residual_block_kernel, H=H),
      out_shape=jax.ShapeDtypeStruct((NH, WC), jnp.float32),
      grid_spec=pltpu.PrefetchScalarGridSpec(
          num_scalar_prefetch=0,
          grid=(1,),
          in_specs=[
              full((NH, WC)),
              full(w1k.shape), full(w2k.shape), full(p.shape),
              full(g1k.shape), full(b1k.shape),
              full(g2k.shape), full(b2k.shape),
          ],
          out_specs=full((NH, WC)),
      ),
      compiler_params=pltpu.CompilerParams(
          dimension_semantics=("arbitrary",),
          vmem_limit_bytes=32 * 1024 * 1024),
  )(x2d, w1k, w2k, p, g1k, b1k, g2k, b2k)

  # lane-dense slab -> NCHW (only needed because this test is NCHW in/out)
  return jnp.transpose(out2d.reshape(N, H, W, C), (0, 3, 1, 2))


def residual_block_ref(x, w1, g1, b1, w2, g2, b2):
  """Pure-JAX reference (NCHW, same semantics as the PyTorch module)."""
  def conv(x, w):
    return jax.lax.conv_general_dilated(
        x, w, window_strides=(1, 1), padding=((1, 1), (1, 1)),
        dimension_numbers=("NCHW", "OIHW", "NCHW"),
        precision=jax.lax.Precision.HIGHEST)

  def bn(y, g, b):
    mean = jnp.mean(y, axis=(0, 2, 3), keepdims=True)
    var = jnp.mean((y - mean) ** 2, axis=(0, 2, 3), keepdims=True)
    return (y - mean) * jax.lax.rsqrt(var + EPS) * g.reshape(1, -1, 1, 1) \
        + b.reshape(1, -1, 1, 1)

  out = jnp.maximum(bn(conv(x, w1), g1, b1), 0.0)
  out = bn(conv(out, w2), g2, b2)
  return jnp.maximum(out + x, 0.0)


if __name__ == "__main__":
  N, C, H, W = 2, 8, 16, 16   # W*C = 128 -> lane-dense slabs; identity shortcut
  key = jax.random.PRNGKey(0)
  kx, kw1, kw2 = jax.random.split(key, 3)

  x = jax.random.normal(kx, (N, C, H, W), jnp.float32)
  # PyTorch conv: OIHW, bias=False; BN init: gamma=1, beta=0
  w1 = jax.random.normal(kw1, (C, C, 3, 3), jnp.float32) * 0.1
  w2 = jax.random.normal(kw2, (C, C, 3, 3), jnp.float32) * 0.1
  g1 = jnp.ones((C,), jnp.float32)
  b1 = jnp.zeros((C,), jnp.float32)
  g2 = jnp.ones((C,), jnp.float32)
  b2 = jnp.zeros((C,), jnp.float32)

  out = residual_block_pallas(x, w1, g1, b1, w2, g2, b2)
  out = jax.block_until_ready(out)

  ref = residual_block_ref(x, w1, g1, b1, w2, g2, b2)
  assert out.shape == (N, C, H, W)
  assert jnp.allclose(out, ref, atol=1e-3, rtol=1e-3), \
      float(jnp.max(jnp.abs(out - ref)))
  print("KERNEL_OK")
</pallas_src>

<mosaic_0001>
module attributes {stable_mosaic.version = 11 : i64} {
  func.func @_residual_block_kernel(%arg0: i32, %arg1: memref<32x128xf32, #tpu.memory_space<vmem>>, %arg2: memref<384x128xf32, #tpu.memory_space<vmem>>, %arg3: memref<384x128xf32, #tpu.memory_space<vmem>>, %arg4: memref<128x128xf32, #tpu.memory_space<vmem>>, %arg5: memref<1x128xf32, #tpu.memory_space<vmem>>, %arg6: memref<1x128xf32, #tpu.memory_space<vmem>>, %arg7: memref<1x128xf32, #tpu.memory_space<vmem>>, %arg8: memref<1x128xf32, #tpu.memory_space<vmem>>, %arg9: memref<32x128xf32, #tpu.memory_space<vmem>>) attributes {dimension_semantics = [#tpu.dimension_semantics<arbitrary>], iteration_bounds = array<i64: 1>, scalar_prefetch = 0 : i64, scratch_operands = 0 : i64, tpu.core_type = #tpu.core_type<tc>, window_params = [{pipeline_mode = #tpu.pipeline_mode<synchronous>, transform_indices = @transform_0, window_bounds = array<i64: 32, 128>}, {pipeline_mode = #tpu.pipeline_mode<synchronous>, transform_indices = @transform_1, window_bounds = array<i64: 384, 128>}, {pipeline_mode = #tpu.pipeline_mode<synchronous>, transform_indices = @transform_2, window_bounds = array<i64: 384, 128>}, {pipeline_mode = #tpu.pipeline_mode<synchronous>, transform_indices = @transform_3, window_bounds = array<i64: 128, 128>}, {pipeline_mode = #tpu.pipeline_mode<synchronous>, transform_indices = @transform_4, window_bounds = array<i64: 1, 128>}, {pipeline_mode = #tpu.pipeline_mode<synchronous>, transform_indices = @transform_5, window_bounds = array<i64: 1, 128>}, {pipeline_mode = #tpu.pipeline_mode<synchronous>, transform_indices = @transform_6, window_bounds = array<i64: 1, 128>}, {pipeline_mode = #tpu.pipeline_mode<synchronous>, transform_indices = @transform_7, window_bounds = array<i64: 1, 128>}, {pipeline_mode = #tpu.pipeline_mode<synchronous>, transform_indices = @transform_8, window_bounds = array<i64: 32, 128>}]} {
    %c0 = arith.constant 0 : index
    %c0_0 = arith.constant 0 : index
    %0 = vector.load %arg1[%c0, %c0_0] : memref<32x128xf32, #tpu.memory_space<vmem>>, vector<32x128xf32>
    %c0_1 = arith.constant 0 : index
    %c0_2 = arith.constant 0 : index
    %1 = vector.load %arg2[%c0_1, %c0_2] : memref<384x128xf32, #tpu.memory_space<vmem>>, vector<384x128xf32>
    %c0_3 = arith.constant 0 : index
    %c0_4 = arith.constant 0 : index
    %2 = vector.load %arg3[%c0_3, %c0_4] : memref<384x128xf32, #tpu.memory_space<vmem>>, vector<384x128xf32>
    %c0_5 = arith.constant 0 : index
    %c0_6 = arith.constant 0 : index
    %3 = vector.load %arg4[%c0_5, %c0_6] : memref<128x128xf32, #tpu.memory_space<vmem>>, vector<128x128xf32>
    %c0_7 = arith.constant 0 : index
    %c0_8 = arith.constant 0 : index
    %4 = vector.load %arg5[%c0_7, %c0_8] : memref<1x128xf32, #tpu.memory_space<vmem>>, vector<1x128xf32>
    %c0_9 = arith.constant 0 : index
    %c0_10 = arith.constant 0 : index
    %5 = vector.load %arg6[%c0_9, %c0_10] : memref<1x128xf32, #tpu.memory_space<vmem>>, vector<1x128xf32>
    %c0_11 = arith.constant 0 : index
    %c0_12 = arith.constant 0 : index
    %6 = vector.load %arg7[%c0_11, %c0_12] : memref<1x128xf32, #tpu.memory_space<vmem>>, vector<1x128xf32>
    %c0_13 = arith.constant 0 : index
    %c0_14 = arith.constant 0 : index
    %7 = vector.load %arg8[%c0_13, %c0_14] : memref<1x128xf32, #tpu.memory_space<vmem>>, vector<1x128xf32>
    %8 = tpu.iota {dimensions = array<i32: 0>} : vector<32x1xi32>
    %c16_i32 = arith.constant 16 : i32
    %c0_i32 = arith.constant 0 : i32
    %9 = arith.cmpi eq, %c16_i32, %c0_i32 : i32
    %c1_i32 = arith.constant 1 : i32
    %10 = arith.select %9, %c1_i32, %c16_i32 : i32
    %11 = vector.broadcast %10 : i32 to vector<32x1xi32>
    %12 = arith.remsi %8, %11 : vector<32x1xi32>
    %c0_i32_15 = arith.constant 0 : i32
    %13 = vector.broadcast %c0_i32_15 : i32 to vector<32x1xi32>
    %14 = arith.cmpi ne, %12, %13 : vector<32x1xi32>
    %c0_i32_16 = arith.constant 0 : i32
    %15 = vector.broadcast %c0_i32_16 : i32 to vector<32x1xi32>
    %16 = arith.cmpi slt, %12, %15 : vector<32x1xi32>
    %c0_i32_17 = arith.constant 0 : i32
    %17 = arith.cmpi slt, %10, %c0_i32_17 : i32
    %18 = vector.broadcast %17 : i1 to vector<32x1xi1>
    %19 = vector.broadcast %18 : vector<32x1xi1> to vector<32x1xi1>
    %20 = arith.xori %16, %19 : vector<32x1xi1>
    %21 = arith.andi %20, %14 : vector<32x1xi1>
    %22 = vector.broadcast %10 : i32 to vector<32x1xi32>
    %23 = arith.addi %12, %22 : vector<32x1xi32>
    %24 = arith.select %21, %23, %12 : vector<32x1xi1>, vector<32x1xi32>
    %c0_i32_18 = arith.constant 0 : i32
    %25 = vector.broadcast %c0_i32_18 : i32 to vector<32x1xi32>
    %26 = arith.cmpi ne, %24, %25 : vector<32x1xi32>
    %cst = arith.constant 1.000000e+00 : f32
    %cst_19 = arith.constant 0.000000e+00 : f32
    %27 = vector.broadcast %cst : f32 to vector<32x1xf32>
    %28 = vector.broadcast %cst_19 : f32 to vector<32x1xf32>
    %29 = arith.select %26, %27, %28 : vector<32x1xi1>, vector<32x1xf32>
    %c15_i32 = arith.constant 15 : i32
    %30 = vector.broadcast %c15_i32 : i32 to vector<32x1xi32>
    %31 = arith.cmpi ne, %24, %30 : vector<32x1xi32>
    %cst_20 = arith.constant 1.000000e+00 : f32
    %cst_21 = arith.constant 0.000000e+00 : f32
    %32 = vector.broadcast %cst_20 : f32 to vector<32x1xf32>
    %33 = vector.broadcast %cst_21 : f32 to vector<32x1xf32>
    %34 = arith.select %31, %32, %33 : vector<32x1xi1>, vector<32x1xf32>
    %c1_i32_22 = arith.constant 1 : i32
    %35 = tpu.dynamic_rotate %0 by %c1_i32_22 dim 0 : vector<32x128xf32>, i32 -> vector<32x128xf32>
    %36 = vector.broadcast %29 : vector<32x1xf32> to vector<32x128xf32>
    %37 = arith.mulf %35, %36 : vector<32x128xf32>
    %c31_i32 = arith.constant 31 : i32
    %38 = tpu.dynamic_rotate %0 by %c31_i32 dim 0 : vector<32x128xf32>, i32 -> vector<32x128xf32>
    %39 = vector.broadcast %34 : vector<32x1xf32> to vector<32x128xf32>
    %40 = arith.mulf %38, %39 : vector<32x128xf32>
    %41 = tpu.concatenate %37, %0, %40 in 1 : vector<32x128xf32>, vector<32x128xf32>, vector<32x128xf32> -> vector<32x384xf32>
    %cst_23 = arith.constant dense<0.000000e+00> : vector<32x128xf32>
    %42 = tpu.matmul %41, %1, %cst_23 {dimension_numbers = #tpu.dot_dimension_numbers<[1], [0], [0], [1], [0, 0, 1, 1], [], []>, precision = #tpu.contract_precision<fp32>} : vector<32x384xf32>, vector<384x128xf32>, vector<32x128xf32> -> vector<32x128xf32>
    %cst_24 = arith.constant dense<0.000000e+00> : vector<128xf32>
    %43 = vector.multi_reduction <add>, %42, %cst_24 [0] : vector<32x128xf32> to vector<128xf32>
    %44 = vector.shape_cast %43 : vector<128xf32> to vector<1x128xf32>
    %45 = arith.mulf %42, %42 : vector<32x128xf32>
    %cst_25 = arith.constant dense<0.000000e+00> : vector<128xf32>
    %46 = vector.multi_reduction <add>, %45, %cst_25 [0] : vector<32x128xf32> to vector<128xf32>
    %47 = vector.shape_cast %46 : vector<128xf32> to vector<1x128xf32>
    %cst_26 = arith.constant dense<0.000000e+00> : vector<1x128xf32>
    %48 = tpu.matmul %44, %3, %cst_26 {dimension_numbers = #tpu.dot_dimension_numbers<[1], [0], [0], [1], [0, 0, 1, 1], [], []>} : vector<1x128xf32>, vector<128x128xf32>, vector<1x128xf32> -> vector<1x128xf32>
    %cst_27 = arith.constant dense<0.000000e+00> : vector<1x128xf32>
    %49 = tpu.matmul %47, %3, %cst_27 {dimension_numbers = #tpu.dot_dimension_numbers<[1], [0], [0], [1], [0, 0, 1, 1], [], []>} : vector<1x128xf32>, vector<128x128xf32>, vector<1x128xf32> -> vector<1x128xf32>
    %50 = arith.mulf %48, %48 : vector<1x128xf32>
    %51 = arith.subf %49, %50 : vector<1x128xf32>
    %cst_28 = arith.constant 0.000000e+00 : f32
    %52 = vector.broadcast %cst_28 : f32 to vector<1x128xf32>
    %53 = arith.maximumf %51, %52 : vector<1x128xf32>
    %54 = vector.broadcast %48 : vector<1x128xf32> to vector<32x128xf32>
    %55 = arith.subf %42, %54 : vector<32x128xf32>
    %cst_29 = arith.constant 9.99999974E-6 : f32
    %56 = vector.broadcast %cst_29 : f32 to vector<1x128xf32>
    %57 = arith.addf %53, %56 : vector<1x128xf32>
    %58 = math.rsqrt %57 : vector<1x128xf32>
    %59 = arith.mulf %58, %4 : vector<1x128xf32>
    %60 = vector.broadcast %59 : vector<1x128xf32> to vector<32x128xf32>
    %61 = arith.mulf %55, %60 : vector<32x128xf32>
    %62 = vector.broadcast %5 : vector<1x128xf32> to vector<32x128xf32>
    %63 = arith.addf %61, %62 : vector<32x128xf32>
    %cst_30 = arith.constant 0.000000e+00 : f32
    %64 = vector.broadcast %cst_30 : f32 to vector<32x128xf32>
    %65 = arith.maximumf %63, %64 : vector<32x128xf32>
    %c1_i32_31 = arith.constant 1 : i32
    %66 = tpu.dynamic_rotate %65 by %c1_i32_31 dim 0 : vector<32x128xf32>, i32 -> vector<32x128xf32>
    %67 = vector.broadcast %29 : vector<32x1xf32> to vector<32x128xf32>
    %68 = arith.mulf %66, %67 : vector<32x128xf32>
    %c31_i32_32 = arith.constant 31 : i32
    %69 = tpu.dynamic_rotate %65 by %c31_i32_32 dim 0 : vector<32x128xf32>, i32 -> vector<32x128xf32>
    %70 = vector.broadcast %34 : vector<32x1xf32> to vector<32x128xf32>
    %71 = arith.mulf %69, %70 : vector<32x128xf32>
    %72 = tpu.concatenate %68, %65, %71 in 1 : vector<32x128xf32>, vector<32x128xf32>, vector<32x128xf32> -> vector<32x384xf32>
    %cst_33 = arith.constant dense<0.000000e+00> : vector<32x128xf32>
    %73 = tpu.matmul %72, %2, %cst_33 {dimension_numbers = #tpu.dot_dimension_numbers<[1], [0], [0], [1], [0, 0, 1, 1], [], []>, precision = #tpu.contract_precision<fp32>} : vector<32x384xf32>, vector<384x128xf32>, vector<32x128xf32> -> vector<32x128xf32>
    %cst_34 = arith.constant dense<0.000000e+00> : vector<128xf32>
    %74 = vector.multi_reduction <add>, %73, %cst_34 [0] : vector<32x128xf32> to vector<128xf32>
    %75 = vector.shape_cast %74 : vector<128xf32> to vector<1x128xf32>
    %76 = arith.mulf %73, %73 : vector<32x128xf32>
    %cst_35 = arith.constant dense<0.000000e+00> : vector<128xf32>
    %77 = vector.multi_reduction <add>, %76, %cst_35 [0] : vector<32x128xf32> to vector<128xf32>
    %78 = vector.shape_cast %77 : vector<128xf32> to vector<1x128xf32>
    %cst_36 = arith.constant dense<0.000000e+00> : vector<1x128xf32>
    %79 = tpu.matmul %75, %3, %cst_36 {dimension_numbers = #tpu.dot_dimension_numbers<[1], [0], [0], [1], [0, 0, 1, 1], [], []>} : vector<1x128xf32>, vector<128x128xf32>, vector<1x128xf32> -> vector<1x128xf32>
    %cst_37 = arith.constant dense<0.000000e+00> : vector<1x128xf32>
    %80 = tpu.matmul %78, %3, %cst_37 {dimension_numbers = #tpu.dot_dimension_numbers<[1], [0], [0], [1], [0, 0, 1, 1], [], []>} : vector<1x128xf32>, vector<128x128xf32>, vector<1x128xf32> -> vector<1x128xf32>
    %81 = arith.mulf %79, %79 : vector<1x128xf32>
    %82 = arith.subf %80, %81 : vector<1x128xf32>
    %cst_38 = arith.constant 0.000000e+00 : f32
    %83 = vector.broadcast %cst_38 : f32 to vector<1x128xf32>
    %84 = arith.maximumf %82, %83 : vector<1x128xf32>
    %85 = vector.broadcast %79 : vector<1x128xf32> to vector<32x128xf32>
    %86 = arith.subf %73, %85 : vector<32x128xf32>
    %cst_39 = arith.constant 9.99999974E-6 : f32
    %87 = vector.broadcast %cst_39 : f32 to vector<1x128xf32>
    %88 = arith.addf %84, %87 : vector<1x128xf32>
    %89 = math.rsqrt %88 : vector<1x128xf32>
    %90 = arith.mulf %89, %6 : vector<1x128xf32>
    %91 = vector.broadcast %90 : vector<1x128xf32> to vector<32x128xf32>
    %92 = arith.mulf %86, %91 : vector<32x128xf32>
    %93 = vector.broadcast %7 : vector<1x128xf32> to vector<32x128xf32>
    %94 = arith.addf %92, %93 : vector<32x128xf32>
    %95 = arith.addf %94, %0 : vector<32x128xf32>
    %cst_40 = arith.constant 0.000000e+00 : f32
    %96 = vector.broadcast %cst_40 : f32 to vector<32x128xf32>
    %97 = arith.maximumf %95, %96 : vector<32x128xf32>
    %c0_41 = arith.constant 0 : index
    %c0_42 = arith.constant 0 : index
    %98 = vector.load %arg9[%c0_41, %c0_42] : memref<32x128xf32, #tpu.memory_space<vmem>>, vector<32x128xf32>
    tpu.vector_store %arg9[%c0_41, %c0_42], %97 {strides = array<i32>} : memref<32x128xf32, #tpu.memory_space<vmem>>, vector<32x128xf32>,
    return
  }
  func.func @transform_0(%arg0: i32) -> (i32, i32) {
    %c0_i32 = arith.constant 0 : i32
    %c0_i32_0 = arith.constant 0 : i32
    %c0_i32_1 = arith.constant 0 : i32
    return %c0_i32, %c0_i32_0 : i32, i32
  }
  func.func @transform_1(%arg0: i32) -> (i32, i32) {
    %c0_i32 = arith.constant 0 : i32
    %c0_i32_0 = arith.constant 0 : i32
    %c0_i32_1 = arith.constant 0 : i32
    return %c0_i32, %c0_i32_0 : i32, i32
  }
  func.func @transform_2(%arg0: i32) -> (i32, i32) {
    %c0_i32 = arith.constant 0 : i32
    %c0_i32_0 = arith.constant 0 : i32
    %c0_i32_1 = arith.constant 0 : i32
    return %c0_i32, %c0_i32_0 : i32, i32
  }
  func.func @transform_3(%arg0: i32) -> (i32, i32) {
    %c0_i32 = arith.constant 0 : i32
    %c0_i32_0 = arith.constant 0 : i32
    %c0_i32_1 = arith.constant 0 : i32
    return %c0_i32, %c0_i32_0 : i32, i32
  }
  func.func @transform_4(%arg0: i32) -> (i32, i32) {
    %c0_i32 = arith.constant 0 : i32
    %c0_i32_0 = arith.constant 0 : i32
    %c0_i32_1 = arith.constant 0 : i32
    return %c0_i32, %c0_i32_0 : i32, i32
  }
  func.func @transform_5(%arg0: i32) -> (i32, i32) {
    %c0_i32 = arith.constant 0 : i32
    %c0_i32_0 = arith.constant 0 : i32
    %c0_i32_1 = arith.constant 0 : i32
    return %c0_i32, %c0_i32_0 : i32, i32
  }
  func.func @transform_6(%arg0: i32) -> (i32, i32) {
    %c0_i32 = arith.constant 0 : i32
    %c0_i32_0 = arith.constant 0 : i32
    %c0_i32_1 = arith.constant 0 : i32
    return %c0_i32, %c0_i32_0 : i32, i32
  }
  func.func @transform_7(%arg0: i32) -> (i32, i32) {
    %c0_i32 = arith.constant 0 : i32
    %c0_i32_0 = arith.constant 0 : i32
    %c0_i32_1 = arith.constant 0 : i32
    return %c0_i32, %c0_i32_0 : i32, i32
  }
  func.func @transform_8(%arg0: i32) -> (i32, i32) {
    %c0_i32 = arith.constant 0 : i32
    %c0_i32_0 = arith.constant 0 : i32
    %c0_i32_1 = arith.constant 0 : i32
    return %c0_i32, %c0_i32_0 : i32, i32
  }
}

</mosaic_0001>

<bundles_post_ra>
// kernel: tpu_custom_call.1
= control target key start
LH: loop header
LB: loop body
LE: loop exit
PB: predicated region body
PF: predicated region fallthrough
CT: control target
= control target key end

     0   :  { %13 = vsyncpa [#allocation3], 0  ;;  %s9369_s0 = inlined_call_operand.hbm [shape: f32[32,128], index: 0, kind: input, shape index: {}]   ;;  %s9370_s1 = inlined_call_operand.hbm [shape: f32[384,128], index: 1, kind: input, shape index: {}]   ;;  %s9371_s2 = inlined_call_operand.hbm [shape: f32[384,128], index: 2, kind: input, shape index: {}]   ;;  %s9372_s3 = inlined_call_operand.hbm [shape: f32[128,128], index: 3, kind: input, shape index: {}]   ;;  %s9373_s4 = inlined_call_operand.vmem [shape: f32[1,128], index: 4, kind: input, shape index: {}]   ;;  %s9374_s5 = inlined_call_operand.vmem [shape: f32[1,128], index: 5, kind: input, shape index: {}]   ;;  %s9375_s6 = inlined_call_operand.vmem [shape: f32[1,128], index: 6, kind: input, shape index: {}]   ;;  %s9376_s7 = inlined_call_operand.vmem [shape: f32[1,128], index: 7, kind: input, shape index: {}]   ;;  %s9377_s8 = inlined_call_operand.hbm [shape: f32[32,128], index: 8, kind: output, shape index: {}]  }
   0x1   :  { %14 = vsyncpa [#allocation6], 0 }
   0x2   :  { %15 = vsyncpa [#allocation9], 0 }
   0x3   :  { %16 = vsyncpa [#allocation4], 0  ;;  %s6829_s27 = smov [#allocation5]   ;;  %s6830_s29 = smov [#allocation2]  }
   0x4   :  { %s34_s28 = sshll.u32 %s6829_s27, 4  ;;  %s22_s30 = sshll.u32 %s6830_s29, 4  ;;  %s35_s28 = int_to_ptr.vmem [resolvable:$true] %s34_s28  ;;  %s6884_s30 = int_to_ptr.vmem [resolvable:$true] %s22_s30 }
   0x5   :  { %s6711_s11 = scalar_lea.hbm %s9370_s1, 6144 }
   0x6   :  { %p6712_p0 = scmp.ne.s32.totalorder %s9370_s1, %s6711_s11  ;;  %p6715_p1 = scmp.lt.u32.totalorder %s6711_s11, %s9370_s1 }
   0x8   :  { %p6717_p2 = pnand %p6715_p1, %p6712_p0 }
   0xa   :  { %6720 = shalt.err (!%p6717_p2)
}
   0xb   :  { %s6721_s16 = scalar_lea.vmem %s35_s28, 6144  ;;  %p6726_p4 = scmp.lt.s32.totalorder %s35_s28, %s35_s28 }
   0xc   :  { %p6722_p3 = scmp.ne.s32.totalorder %s35_s28, %s6721_s16  ;;  %p6727_p5 = scmp.lt.s32.totalorder %s6721_s16, %s6721_s16 }
   0xe   :  { %p6728_p6 = por %p6727_p5, %p6726_p4 }
  0x10   :  { %p6729_p7 = pnand %p6728_p6, %p6722_p3 }
  0x12   :  { %6732 = shalt.err (!%p6729_p7)
}
  0x13   :  { %s6831_s17 = smov 128   ;;  %s6832_s18 = smov 8  }
  0x14   :  { %40 = dma.hbm_to_vmem [thread:$0]  %s9370_s1, 6144, %s35_s28, [#allocation6], %s6831_s17, %s6831_s17, %s6832_s18  }
  0x15   :  { %s6733_s23 = scalar_lea.hbm %s9369_s0, 512 }
  0x16   :  { %p6734_p8 = scmp.ne.s32.totalorder %s9369_s0, %s6733_s23  ;;  %p6737_p9 = scmp.lt.u32.totalorder %s6733_s23, %s9369_s0 }
  0x18   :  { %p6739_p10 = pnand %p6737_p9, %p6734_p8 }
  0x1a   :  { %6742 = shalt.err (!%p6739_p10)
}
  0x1b   :  { %s6743_s29 = scalar_lea.vmem %s6884_s30, 512  ;;  %p6748_p12 = scmp.lt.s32.totalorder %s6884_s30, %s6884_s30 }
  0x1c   :  { %p6744_p11 = scmp.ne.s32.totalorder %s6884_s30, %s6743_s29  ;;  %p6749_p13 = scmp.lt.s32.totalorder %s6743_s29, %s6743_s29 }
  0x1e   :  { %p6750_p0 = por %p6749_p13, %p6748_p12 }
  0x20   :  { %p6751_p1 = pnand %p6750_p0, %p6744_p11 }
  0x22   :  { %6754 = shalt.err (!%p6751_p1)
}
  0x23   :  { %28 = dma.hbm_to_vmem [thread:$0]  %s9369_s0, 512, %s6884_s30, [#allocation3], %s6831_s17, %s6831_s17, %s6832_s18  }
  0x24   :  { %s6833_s9 = smov [#allocation7]   ;;  %s6834_s11 = smov [#allocation8]  }
  0x25   :  { %s46_s10 = sshll.u32 %s6833_s9, 4  ;;  %s58_s12 = sshll.u32 %s6834_s11, 4  ;;  %s47_s10 = int_to_ptr.vmem [resolvable:$true] %s46_s10  ;;  %s6921_s12 = int_to_ptr.vmem [resolvable:$true] %s58_s12 }
  0x26   :  { %s6755_s15 = scalar_lea.hbm %s9371_s2, 6144 }
  0x27   :  { %p6756_p2 = scmp.ne.s32.totalorder %s9371_s2, %s6755_s15  ;;  %p6759_p3 = scmp.lt.u32.totalorder %s6755_s15, %s9371_s2 }
  0x29   :  { %p6761_p4 = pnand %p6759_p3, %p6756_p2 }
  0x2b   :  { %6764 = shalt.err (!%p6761_p4)
}
  0x2c   :  { %s6765_s0 = scalar_lea.vmem %s47_s10, 6144  ;;  %p6770_p6 = scmp.lt.s32.totalorder %s47_s10, %s47_s10 }
  0x2d   :  { %p6766_p5 = scmp.ne.s32.totalorder %s47_s10, %s6765_s0  ;;  %p6771_p7 = scmp.lt.s32.totalorder %s6765_s0, %s6765_s0 }
  0x2f   :  { %p6772_p8 = por %p6771_p7, %p6770_p6 }
  0x31   :  { %p6773_p9 = pnand %p6772_p8, %p6766_p5 }
  0x33   :  { %6776 = shalt.err (!%p6773_p9)
}
  0x34   :  { %52 = dma.hbm_to_vmem [thread:$0]  %s9371_s2, 6144, %s47_s10, [#allocation6], %s6831_s17, %s6831_s17, %s6832_s18  }
  0x35   :  { %s6777_s25 = scalar_lea.hbm %s9372_s3, 2048 }
  0x36   :  { %p6778_p10 = scmp.ne.s32.totalorder %s9372_s3, %s6777_s25  ;;  %p6781_p11 = scmp.lt.u32.totalorder %s6777_s25, %s9372_s3 }
  0x38   :  { %p6783_p12 = pnand %p6781_p11, %p6778_p10 }
  0x3a   :  { %6786 = shalt.err (!%p6783_p12)
}
  0x3b   :  { %s6787_s28 = scalar_lea.vmem %s6921_s12, 2048  ;;  %p6792_p0 = scmp.lt.s32.totalorder %s6921_s12, %s6921_s12 }
  0x3c   :  { %p6788_p13 = scmp.ne.s32.totalorder %s6921_s12, %s6787_s28  ;;  %p6793_p1 = scmp.lt.s32.totalorder %s6787_s28, %s6787_s28 }
  0x3e   :  { %p6794_p2 = por %p6793_p1, %p6792_p0 }
  0x40   :  { %p6795_p3 = pnand %p6794_p2, %p6788_p13 }
  0x42   :  { %6798 = shalt.err (!%p6795_p3)
}
  0x43   :  { %64 = dma.hbm_to_vmem [thread:$0]  %s9372_s3, 2048, %s6921_s12, [#allocation9], %s6831_s17, %s6831_s17, %s6832_s18  }
  0x44   :  { %6821 = dma.done.wait [#allocation3], 512  }
  0x45   :  { %6822 = vsyncadd [#allocation3], 4294966784 }
  0x46   :  { %6823 = dma.done.wait [#allocation6], 12288  }
  0x47   :  { %6824 = vsyncadd [#allocation6], 4294955008 }
  0x48   :  { %6825 = dma.done.wait [#allocation9], 2048  }
  0x49   :  { %6826 = vsyncadd [#allocation9], 4294965248  ;;  %v205_v0 = vlaneseq  ;;  %v105_v5 = vld [vmem:[#allocation5 + $0x80] sm:$0xff]  ;;  %v106_v6 = vld [vmem:[#allocation5 + $0x88] sm:$0xff]  ;;  %v9378_v8 = vmov 0.0   ;;  %vm6837_vm6 = vmmov 0  }
  0x4a   :  { %v89_v7 = vld [vmem:[#allocation5] sm:$0xff]  ;;  %v349_v12 = vand.u32 4294901760, %v105_v5  ;;  %v352_v13 = vand.u32 4294901760, %v106_v6  ;;  %v90_v14 = vld [vmem:[#allocation5 + $0x8] sm:$0xff]  ;;  %v107_v16 = vld [vmem:[#allocation5 + $0x90] sm:$0xff] }
  0x4b   :  { %v6958_v1 = vshrl.u32 %v205_v0, 7  ;;  %v301_v15 = vand.u32 4294901760, %v89_v7  ;;  %v108_v17 = vld [vmem:[#allocation5 + $0x98] sm:$0xff]  ;;  %v304_v18 = vand.u32 4294901760, %v90_v14  ;;  %v355_v19 = vand.u32 4294901760, %v107_v16  ;;  %v91_v21 = vld [vmem:[#allocation5 + $0x10] sm:$0xff] }
  0x4c   :  { %v358_v20 = vand.u32 4294901760, %v108_v17  ;;  %v92_v22 = vld [vmem:[#allocation5 + $0x18] sm:$0xff]  ;;  %v6975_v24 = vpack.c.bf16 %v352_v13, %v349_v12  ;;  %v6977_v25 = vsub.f32 %v105_v5, %v349_v12  ;;  %v6979_v26 = vsub.f32 %v106_v6, %v352_v13  ;;  %v109_v28 = vld [vmem:[#allocation5 + $0xa0] sm:$0xff]  ;;  %v110_v29 = vld [vmem:[#allocation5 + $0xa8] sm:$0xff] }
  0x4d   :  { %v214_v2 = vand.u32 15, %v6958_v1  ;;  %v6962_v3 = vadd.s32 16, %v6958_v1  ;;  %v6965_v4 = vadd.s32 8, %v6958_v1  ;;  %v6972_v11 = vadd.s32 24, %v6958_v1  ;;  %v93_v50 = vld [vmem:[#allocation5 + $0x20] sm:$0xff]  ;;  %v94_v51 = vld [vmem:[#allocation5 + $0x28] sm:$0xff] }
  0x4e   :  { %9695 = vst [vmem:[#allocation17_spill] sm:$0xff] %v6975_v24  ;;  %v307_v27 = vand.u32 4294901760, %v91_v21  ;;  %v6981_v30 = vpack.c.bf16 %v304_v18, %v301_v15  ;;  %v6983_v31 = vpack.c.bf16 %v358_v20, %v355_v19  ;;  %v6985_v32 = vsub.f32 %v107_v16, %v355_v19  ;;  %5782 = vmatprep.subr.bf16.mxu1 %v6975_v24  ;;  %v111_v56 = vld [vmem:[#allocation5 + $0xb0] sm:$0xff]  ;;  %v118_v53 = vld [vmem:[#allocation5 + $0xe8] sm:$0xff]  ;;  %v104_v24 = vld [vmem:[#allocation5 + $0x78] sm:$0xff] }
  0x4f   :  { %vm258_vm0 = vcmp.ne.s32.totalorder %v214_v2, 0  ;;  %9694 = vst [vmem:[#allocation16_spill] sm:$0xff] %v6972_v11  ;;  %v6987_v33 = vsub.f32 %v108_v17, %v358_v20  ;;  %v572_v34 = vand.u32 4294901760, %v6977_v25  ;;  %v579_v35 = vand.u32 4294901760, %v6979_v26  ;;  %v112_v2 = vld [vmem:[#allocation5 + $0xb8] sm:$0xff]  ;;  %v95_v13 = vld [vmem:[#allocation5 + $0x30] sm:$0xff] }
  0x50   :  { %v6968_v9 = vsel %vm258_vm0, 1.0, %v9378_v8  ;;  %9696 = vst [vmem:[#allocation18_spill] sm:$0xff] %v6981_v30  ;;  %9697 = vst [vmem:[#allocation19_spill] sm:$0xff] %v6983_v31  ;;  %v310_v36 = vand.u32 4294901760, %v92_v22  ;;  %v6992_v37 = vsub.f32 %v91_v21, %v307_v27  ;;  %5784 = vmatpush3.bf16.msra.mxu1 %v6981_v30  ;;  %v6995_v38 = vsub.f32 %v89_v7, %v301_v15 }
  0x51   :  { %9693 = vst [vmem:[#allocation15_spill] sm:$0xff] %v6968_v9  ;;  %v6997_v39 = vsub.f32 %v90_v14, %v304_v18  ;;  %v361_v40 = vand.u32 4294901760, %v109_v28  ;;  %v364_v41 = vand.u32 4294901760, %v110_v29  ;;  %5786 = vmatprep.subr.bf16.mxu1 %v6983_v31  ;;  %v7001_v42 = vsub.f32 %v6977_v25, %v572_v34 }
  0x52   :  { %v7004_v43 = vsub.f32 %v6979_v26, %v579_v35  ;;  %v5909_v44 = vpack.c.bf16 %v579_v35, %v572_v34  ;;  %v7006_v45 = vpack.c.bf16 %v310_v36, %v307_v27  ;;  %v7008_v46 = vsub.f32 %v92_v22, %v310_v36  ;;  %v96_v22 = vld [vmem:[#allocation5 + $0x38] sm:$0xff]  ;;  %v113_v35 = vld [vmem:[#allocation5 + $0xc0] sm:$0xff]  ;;  %v114_v36 = vld [vmem:[#allocation5 + $0xc8] sm:$0xff] }
  0x53   :  { %v460_v47 = vand.u32 4294901760, %v6995_v38  ;;  %v467_v48 = vand.u32 4294901760, %v6997_v39  ;;  %v7012_v49 = vpack.c.bf16 %v364_v41, %v361_v40  ;;  %v7016_v54 = vsub.f32 %v109_v28, %v361_v40  ;;  %v99_v40 = vld [vmem:[#allocation5 + $0x50] sm:$0xff] }
  0x54   :  { %9698 = vst [vmem:[#allocation20_spill] sm:$0xff] %v7006_v45  ;;  %5910 = vmatprep.subr.bf16.mxu0 %v5909_v44  ;;  %v7018_v55 = vsub.f32 %v110_v29, %v364_v41  ;;  %5788 = vmatpush3.bf16.msra.mxu1 %v7006_v45  ;;  %v9385_v60 = vand.u32 4294901760, %v6985_v32  ;;  %v9384_v61 = vand.u32 4294901760, %v6987_v33  ;;  %v313_v62 = vand.u32 4294901760, %v93_v50 }
  0x55   :  { %9699 = vst [vmem:[#allocation21_spill] sm:$0xff] %v7012_v49  ;;  %v7022_v57 = vsub.f32 %v6995_v38, %v460_v47  ;;  %v7025_v58 = vsub.f32 %v6997_v39, %v467_v48  ;;  %v5911_v59 = vpack.c.bf16 %v467_v48, %v460_v47  ;;  %5790 = vmatprep.subr.bf16.mxu1 %v7012_v49  ;;  %v316_v63 = vand.u32 4294901760, %v94_v51 }
  0x56   :  { %v474_v0 = vand.u32 4294901760, %v6992_v37  ;;  %v481_v7 = vand.u32 4294901760, %v7008_v46  ;;  %v367_v12 = vand.u32 4294901760, %v111_v56  ;;  %v5913_v14 = vpack.c.bf16 %v9384_v61, %v9385_v60  ;;  %v100_v61 = vld [vmem:[#allocation5 + $0x58] sm:$0xff]  ;;  %v117_v60 = vld [vmem:[#allocation5 + $0xe0] sm:$0xff] }
  0x57   :  { %5912 = vmatpush3.bf16.msra.mxu0 %v5911_v59  ;;  %v7038_v15 = vpack.c.bf16 %v316_v63, %v313_v62  ;;  %v7040_v16 = vsub.f32 %v93_v50, %v313_v62  ;;  %v7042_v17 = vsub.f32 %v94_v51, %v316_v63  ;;  %v370_v21 = vand.u32 4294901760, %v112_v2 }
  0x58   :  { %v7045_v18 = vsub.f32 %v6992_v37, %v474_v0  ;;  %v7048_v19 = vsub.f32 %v7008_v46, %v481_v7  ;;  %v5915_v20 = vpack.c.bf16 %v481_v7, %v474_v0  ;;  %5914 = vmatprep.subr.bf16.mxu0 %v5913_v14  ;;  %v7051_v27 = vsub.f32 %v111_v56, %v367_v12 }
  0x59   :  { %9700 = vst [vmem:[#allocation22_spill] sm:$0xff] %v7038_v15  ;;  %5792 = vmatpush3.bf16.msra.mxu1 %v7038_v15  ;;  %v9381_v28 = vand.u32 4294901760, %v7016_v54  ;;  %v9380_v29 = vand.u32 4294901760, %v7018_v55  ;;  %v319_v34 = vand.u32 4294901760, %v95_v13  ;;  %v7057_v44 = vpack.c.bf16 %v370_v21, %v367_v12  ;;  %v119_v15 = vld [vmem:[#allocation5 + $0xf0] sm:$0xff] }
  0x5a   :  { %9701 = vst [vmem:[#allocation23_spill] sm:$0xff] %v7051_v27  ;;  %v7059_v47 = vsub.f32 %v112_v2, %v370_v21  ;;  %v322_v50 = vand.u32 4294901760, %v96_v22  ;;  %v488_v56 = vand.u32 4294901760, %v7040_v16  ;;  %v495_v59 = vand.u32 4294901760, %v7042_v17  ;;  %v97_v2 = vld [vmem:[#allocation5 + $0x40] sm:$0xff] }
  0x5b   :  { %5916 = vmatpush3.bf16.msra.mxu0 %v5915_v20  ;;  %9702 = vst [vmem:[#allocation24_spill] sm:$0xff] %v7057_v44  ;;  %v5917_v48 = vpack.c.bf16 %v9380_v29, %v9381_v28  ;;  %v7065_v51 = vsub.f32 %v95_v13, %v319_v34  ;;  %5794 = vmatprep.subr.bf16.mxu1 %v7057_v44  ;;  %v373_v62 = vand.u32 4294901760, %v113_v35  ;;  %v376_v63 = vand.u32 4294901760, %v114_v36  ;;  %v98_v20 = vld [vmem:[#allocation5 + $0x48] sm:$0xff]  ;;  %v115_v29 = vld [vmem:[#allocation5 + $0xd0] sm:$0xff] }
  0x5c   :  { %9703 = vst [vmem:[#allocation25_spill] sm:$0xff] %v7059_v47  ;;  %v9383_v0 = vand.u32 4294901760, %v7051_v27  ;;  %v7071_v7 = vpack.c.bf16 %v322_v50, %v319_v34  ;;  %v7073_v12 = vsub.f32 %v96_v22, %v322_v50  ;;  %v7076_v14 = vsub.f32 %v7040_v16, %v488_v56  ;;  %v102_v44 = vld [vmem:[#allocation5 + $0x68] sm:$0xff] }
  0x5d   :  { %9704 = vst [vmem:[#allocation26_spill] sm:$0xff] %v7065_v51  ;;  %5918 = vmatprep.subr.bf16.mxu0 %v5917_v48  ;;  %v9382_v13 = vand.u32 4294901760, %v7059_v47  ;;  %v7080_v21 = vsub.f32 %v7042_v17, %v495_v59  ;;  %v5919_v23 = vpack.c.bf16 %v495_v59, %v488_v56  ;;  %v7082_v8 = vpack.c.bf16 %v376_v63, %v373_v62  ;;  %v116_v48 = vld [vmem:[#allocation5 + $0xd8] sm:$0xff] }
  0x5e   :  { %9705 = vst [vmem:[#allocation27_spill] sm:$0xff] %v7071_v7  ;;  %9706 = vst [vmem:[#allocation28_spill] sm:$0xff] %v7073_v12  ;;  %v7084_v10 = vsub.f32 %v113_v35, %v373_v62  ;;  %5796 = vmatpush3.bf16.msra.mxu1 %v7071_v7  ;;  %v7088_v34 = vsub.f32 %v114_v36, %v376_v63  ;;  %v325_v28 = vand.u32 4294901760, %v97_v2  ;;  %v328_v35 = vand.u32 4294901760, %v98_v20 }
  0x5f   :  { %9707 = vst [vmem:[#allocation29_spill] sm:$0xff] %v7082_v8  ;;  %v5921_v50 = vpack.c.bf16 %v9382_v13, %v9383_v0  ;;  %5920 = vmatpush3.bf16.msra.mxu0 %v5919_v23  ;;  %5798 = vmatprep.subr.bf16.mxu1 %v7082_v8  ;;  %v502_v59 = vand.u32 4294901760, %v7065_v51  ;;  %v509_v62 = vand.u32 4294901760, %v7073_v12  ;;  %v379_v36 = vand.u32 4294901760, %v115_v29 }
  0x60   :  { %9708 = vst [vmem:[#allocation30_spill] sm:$0xff] %v7084_v10  ;;  %9709 = vst [vmem:[#allocation31_spill] sm:$0xff] %v7088_v34  ;;  %v7098_v22 = vsub.f32 %v97_v2, %v325_v28  ;;  %v382_v63 = vand.u32 4294901760, %v116_v48  ;;  %v9399_v41 = vand.u32 4294901760, %v7084_v10  ;;  %v7101_v13 = vpack.c.bf16 %v328_v35, %v325_v28 }
  0x61   :  { %5922 = vmatprep.subr.bf16.mxu0 %v5921_v50  ;;  %v7103_v0 = vsub.f32 %v98_v20, %v328_v35  ;;  %v7106_v23 = vsub.f32 %v7065_v51, %v502_v59  ;;  %v7109_v56 = vsub.f32 %v7073_v12, %v509_v62  ;;  %v5923_v50 = vpack.c.bf16 %v509_v62, %v502_v59  ;;  %v7265_v12 = vld [vmem:[#allocation5 + $0x110] sm:$0xff] }
  0x62   :  { %9710 = vst [vmem:[#allocation32_spill] sm:$0xff] %v7098_v22  ;;  %9711 = vst [vmem:[#allocation33_spill] sm:$0xff] %v7101_v13  ;;  %v7111_v2 = vpack.c.bf16 %v382_v63, %v379_v36  ;;  %v7113_v6 = vsub.f32 %v115_v29, %v379_v36  ;;  %v7115_v5 = vsub.f32 %v116_v48, %v382_v63  ;;  %5800 = vmatpush3.bf16.msra.mxu1 %v7101_v13  ;;  %v101_v13 = vld [vmem:[#allocation5 + $0x60] sm:$0xff] }
  0x63   :  { %9712 = vst [vmem:[#allocation34_spill] sm:$0xff] %v7103_v0  ;;  %v9398_v35 = vand.u32 4294901760, %v7088_v34  ;;  %v331_v52 = vand.u32 4294901760, %v99_v40  ;;  %5924 = vmatpush3.bf16.msra.mxu0 %v5923_v50  ;;  %v334_v59 = vand.u32 4294901760, %v100_v61  ;;  %v516_v62 = vand.u32 4294901760, %v7098_v22 }
  0x64   :  { %9713 = vst [vmem:[#allocation35_spill] sm:$0xff] %v7111_v2  ;;  %9714 = vst [vmem:[#allocation36_spill] sm:$0xff] %v7115_v5  ;;  %5802 = vmatprep.subr.bf16.mxu1 %v7111_v2  ;;  %v523_v29 = vand.u32 4294901760, %v7103_v0  ;;  %v385_v48 = vand.u32 4294901760, %v117_v60  ;;  %v388_v20 = vand.u32 4294901760, %v118_v53  ;;  %v9414_v49 = vand.u32 4294901760, %v7115_v5 }
  0x65   :  { %v5925_v36 = vpack.c.bf16 %v9398_v35, %v9399_v41  ;;  %v7128_v63 = vsub.f32 %v99_v40, %v331_v52  ;;  %v7131_v50 = vpack.c.bf16 %v334_v59, %v331_v52  ;;  %v7133_v2 = vsub.f32 %v100_v61, %v334_v59  ;;  %v120_v52 = vld [vmem:[#allocation5 + $0xf8] sm:$0xff]  ;;  %v103_v61 = vld [vmem:[#allocation5 + $0x70] sm:$0xff] }
  0x66   :  { %v7136_v8 = vsub.f32 %v7098_v22, %v516_v62  ;;  %v7139_v7 = vsub.f32 %v7103_v0, %v523_v29  ;;  %v5927_v35 = vpack.c.bf16 %v523_v29, %v516_v62  ;;  %v7141_v40 = vpack.c.bf16 %v388_v20, %v385_v48 }
  0x67   :  { %9715 = vst [vmem:[#allocation37_spill] sm:$0xff] %v7128_v63  ;;  %9716 = vst [vmem:[#allocation38_spill] sm:$0xff] %v7131_v50  ;;  %5926 = vmatprep.subr.bf16.mxu0 %v5925_v36  ;;  %v7143_v41 = vsub.f32 %v117_v60, %v385_v48  ;;  %v7145_v28 = vsub.f32 %v118_v53, %v388_v20  ;;  %5804 = vmatpush3.bf16.msra.mxu1 %v7131_v50  ;;  %v337_v45 = vand.u32 4294901760, %v101_v13 }
  0x68   :  { %9717 = vst [vmem:[#allocation39_spill] sm:$0xff] %v7133_v2  ;;  %9718 = vst [vmem:[#allocation40_spill] sm:$0xff] %v7141_v40  ;;  %5928 = vmatpush3.bf16.msra.mxu0 %v5927_v35  ;;  %5806 = vmatprep.subr.bf16.mxu1 %v7141_v40  ;;  %v340_v62 = vand.u32 4294901760, %v102_v44  ;;  %v530_v29 = vand.u32 4294901760, %v7128_v63  ;;  %v537_v60 = vand.u32 4294901760, %v7133_v2  ;;  %v391_v53 = vand.u32 4294901760, %v119_v15 }
  0x69   :  { %9719 = vst [vmem:[#allocation41_spill] sm:$0xff] %v7143_v41  ;;  %9720 = vst [vmem:[#allocation42_spill] sm:$0xff] %v7145_v28  ;;  %vm278_vm1 = vcmp.lt.s32.totalorder %v6958_v1, 1  ;;  %v9721_v20 = vand.u32 4294901760, %v7113_v6  ;;  %v7159_v36 = vsub.f32 %v101_v13, %v337_v45  ;;  %v394_v59 = vand.u32 4294901760, %v120_v52 }
  0x6a   :  { %v7162_v40 = vpack.c.bf16 %v340_v62, %v337_v45  ;;  %v7164_v50 = vsub.f32 %v102_v44, %v340_v62  ;;  %v7167_v31 = vsub.f32 %v7128_v63, %v530_v29  ;;  %v7170_v30 = vsub.f32 %v7133_v2, %v537_v60  ;;  %v7182_v2 = vld [vmem:[#allocation2] sm:$0xff] }
  0x6b   :  { %v5929_v48 = vpack.c.bf16 %v9414_v49, %v9721_v20  ;;  %9722 = vst [vmem:[#allocation43_spill] sm:$0xff] %v7159_v36  ;;  %v5931_v11 = vpack.c.bf16 %v537_v60, %v530_v29  ;;  %v7172_v20 = vpack.c.bf16 %v394_v59, %v391_v53  ;;  %v7174_v13 = vsub.f32 %v119_v15, %v391_v53 }
  0x6c   :  { %9723 = vst [vmem:[#allocation44_spill] sm:$0xff] %v7162_v40  ;;  %9724 = vst [vmem:[#allocation45_spill] sm:$0xff] %v7164_v50  ;;  %v7176_v49 = vsub.f32 %v120_v52, %v394_v59  ;;  %5808 = vmatpush3.bf16.msra.mxu1 %v7162_v40  ;;  %v9427_v62 = vand.u32 4294901760, %v7145_v28  ;;  %v343_v35 = vand.u32 4294901760, %v103_v61  ;;  %v346_v29 = vand.u32 4294901760, %v104_v24  ;;  %v7201_v40 = vld [vmem:[#allocation2 + $0x18] sm:$0xff] }
  0x6d   :  { %5930 = vmatprep.subr.bf16.mxu0 %v5929_v48  ;;  %9725 = vst [vmem:[#allocation46_spill] sm:$0xff] %v7172_v20  ;;  %9726 = vst [vmem:[#allocation47_spill] sm:$0xff] %v7174_v13  ;;  %5810 = vmatprep.subr.bf16.mxu1 %v7172_v20  ;;  %v544_v15 = vand.u32 4294901760, %v7159_v36  ;;  %v551_v52 = vand.u32 4294901760, %v7164_v50  ;;  %v7188_v59 = vand.u32 4294901760, %v7182_v2  ;;  %v9729_v60 = vand.u32 4294901760, %v7143_v41 }
  0x6e   :  { %9727 = vst [vmem:[#allocation48_spill] sm:$0xff] %v7176_v49  ;;  %5932 = vmatpush3.bf16.msra.mxu0 %v5931_v11  ;;  %v7194_v48 = vsub.f32 %v103_v61, %v343_v35  ;;  %v9731_v44 = vand.u32 4294901760, %v7001_v42  ;;  %v9732_v11 = vand.u32 4294901760, %v7004_v43  ;;  %v9429_v20 = vand.u32 4294901760, %v7174_v13 }
  0x6f   :  { %9728 = vst [vmem:[#allocation49_spill] sm:$0xff] %v7188_v59  ;;  %v5933_v53 = vpack.c.bf16 %v9427_v62, %v9729_v60  ;;  %v7203_v63 = vpack.c.bf16 %v346_v29, %v343_v35  ;;  %v7205_v0 = vsub.f32 %v104_v24, %v346_v29  ;;  %v7208_v22 = vsub.f32 %v7159_v36, %v544_v15  ;;  %v7220_v24 = vld [vmem:[#allocation5 + $0x100] sm:$0xff] }
  0x70   :  { %9730 = vst [vmem:[#allocation50_spill] sm:$0xff] %v7194_v48  ;;  %v5813_v45 = vpack.c.bf16 %v9732_v11, %v9731_v44  ;;  %v7211_v60 = vsub.f32 %v7164_v50, %v551_v52  ;;  %1177 = vmatprep.mubr.f32.mxu0 %v7188_v59  ;;  %v5935_v42 = vpack.c.bf16 %v551_v52, %v544_v15  ;;  %v9428_v61 = vand.u32 4294901760, %v7176_v49  ;;  %v7239_v11 = vld [vmem:[#allocation5 + $0x108] sm:$0xff] }
  0x71   :  { %9733 = vst [vmem:[#allocation51_spill] sm:$0xff] %v7203_v63  ;;  %9734 = vst [vmem:[#allocation52_spill] sm:$0xff] %v7205_v0  ;;  %5934 = vmatprep.subr.bf16.mxu0 %v5933_v53  ;;  %v7216_v43 = vsub.f32 %v7182_v2, %v7188_v59  ;;  %5812 = vmatpush3.bf16.msra.mxu1 %v7203_v63  ;;  %v9736_v15 = vand.u32 4294901760, %v7022_v57  ;;  %v9737_v52 = vand.u32 4294901760, %v7025_v58  ;;  %v558_v44 = vand.u32 4294901760, %v7194_v48 }
  0x72   :  { %5936 = vmatpush3.bf16.msra.mxu0 %v5935_v42  ;;  %5814 = vmatprep.subr.bf16.mxu1 %v5813_v45  ;;  %v5937_v35 = vpack.c.bf16 %v9428_v61, %v9429_v20  ;;  %v565_v29 = vand.u32 4294901760, %v7205_v0  ;;  %v9738_v57 = vrot.slane %v7182_v2, 7  ;;  %v9739_v58 = vrot.slane %v7201_v40, 7  ;;  %v7267_v20 = vld [vmem:[#allocation5 + $0x118] sm:$0xff] }
  0x73   :  { %9735 = vst [vmem:[#allocation53_spill] sm:$0xff] %v7216_v43  ;;  %v7230_v53 = vpack.c.bf16 %v9737_v52, %v9736_v15  ;;  %v9442_v62 = vand.u32 4294901760, %v7216_v43  ;;  %v9740_v45 = vand.u32 4294901760, %v6985_v32  ;;  %v9741_v52 = vand.u32 4294901760, %v6987_v33 }
  0x74   :  { %v282_v42 = vsel %vm278_vm1, %v9739_v58, %v9738_v57  ;;  %5938 = vmatprep.subr.bf16.mxu0 %v5937_v35  ;;  %v7259_v36 = vsub.f32 %v7194_v48, %v558_v44  ;;  %v7262_v57 = vsub.f32 %v7205_v0, %v565_v29  ;;  %v5939_v58 = vpack.c.bf16 %v565_v29, %v558_v44 }
  0x75   :  { %v587_v15 = vsub.f32 %v6985_v32, %v9740_v45  ;;  %v594_v61 = vsub.f32 %v6987_v33, %v9741_v52  ;;  %v399_v63 = vsub.f32 %v7216_v43, %v9442_v62  ;;  %v283_v50 = vmul.f32 %v282_v42, %v6968_v9  ;;  %v7290_v42 = vld [vmem:[#allocation5 + $0x120] sm:$0xff] }
  0x76   :  { %v9446_v52 = vand.u32 4294901760, %v7239_v11  ;;  %5940 = vmatpush3.bf16.msra.mxu0 %v5939_v58  ;;  %v9743_v44 = vand.u32 4294901760, %v7220_v24  ;;  %v9745_v29 = vand.u32 4294901760, %v7045_v18  ;;  %v9747_v43 = vand.u32 4294901760, %v7016_v54 }
  0x77   :  { %v588_v45 = vand.u32 4294901760, %v587_v15  ;;  %v595_v59 = vand.u32 4294901760, %v594_v61  ;;  %v400_v51 = vand.u32 4294901760, %v399_v63  ;;  %v7269_v62 = vand.u32 4294901760, %v283_v50 }
  0x78   :  { %v7279_v61 = vpack.c.bf16 %v9446_v52, %v9743_v44  ;;  %v9746_v15 = vand.u32 4294901760, %v7048_v19  ;;  %v601_v35 = vsub.f32 %v7016_v54, %v9747_v43  ;;  %v9749_v58 = vand.u32 4294901760, %v7018_v55  ;;  %v7300_v44 = vld [vmem:[#allocation5 + $0x128] sm:$0xff] }
  0x79   :  { %9742 = vst [vmem:[#allocation54_spill] sm:$0xff] %v7269_v62  ;;  %v7273_v9 = vpack.c.bf16 %v595_v59, %v588_v45  ;;  %401 = vmatprep.mubr.f32.mxu1 %v400_v51  ;;  %v7293_v59 = vsub.f32 %v283_v50, %v7269_v62  ;;  %v9750_v43 = vand.u32 4294901760, %v7076_v14  ;;  %v9751_v51 = vand.u32 4294901760, %v7080_v21  ;;  %1179 = vmatmul.mubr.f32.vlgmr.msra.gmra.mrb[0].mxu0 %v7269_v62 }
  0x7a   :  { %9744 = vst [vmem:[#allocation55_spill] sm:$0xff] %v7279_v61  ;;  %v7285_v63 = vpack.c.bf16 %v9746_v15, %v9745_v29  ;;  %v608_v45 = vsub.f32 %v7018_v55, %v9749_v58  ;;  %5974 = vmatprep.subr.bf16.mxu0 %v7279_v61  ;;  %v602_v29 = vand.u32 4294901760, %v601_v35  ;;  %v9752_v50 = vand.u32 4294901760, %v7051_v27 }
  0x7b   :  { %9748 = vst [vmem:[#allocation56_spill] sm:$0xff] %v7293_v59  ;;  %v7307_v15 = vpack.c.bf16 %v9751_v51, %v9750_v43  ;;  %v9753_v58 = vand.u32 4294901760, %v7059_v47  ;;  %v9754_v35 = vand.u32 4294901760, %v7265_v12  ;;  %v9755_v14 = vand.u32 4294901760, %v7267_v20  ;;  %v7324_v51 = vld [vmem:[#allocation5 + $0x130] sm:$0xff]  ;;  %5976 = vmatpush3.bf16.msra.mxu0 %v7279_v61  ;;  %v7358_v61 = vld [vmem:[#allocation5 + $0x140] sm:$0xff] }
  0x7c   :  { %v615_v52 = vsub.f32 %v7051_v27, %v9752_v50  ;;  %v609_v0 = vand.u32 4294901760, %v608_v45  ;;  %v7326_v50 = vld [vmem:[#allocation5 + $0x138] sm:$0xff]  ;;  %v9757_v45 = vand.u32 4294901760, %v7106_v23  ;;  %v9758_v62 = vand.u32 4294901760, %v7109_v56  ;;  %9765 = vst [vmem:[#allocation59_spill] sm:$0xff] %v7358_v61 }
  0x7d   :  { %v622_v18 = vsub.f32 %v7059_v47, %v9753_v58  ;;  %v7321_v21 = vpack.c.bf16 %v9755_v14, %v9754_v35  ;;  %v9759_v35 = vand.u32 4294901760, %v7293_v59  ;;  %v9760_v27 = vand.u32 4294901760, %v7084_v10 }
  0x7e   :  { %v616_v58 = vand.u32 4294901760, %v615_v52  ;;  %v7334_v47 = vpack.c.bf16 %v9758_v62, %v9757_v45  ;;  %v5821_v43 = vpack.c.bf16 %v609_v0, %v602_v29  ;;  %v9762_v56 = vand.u32 4294901760, %v7290_v42 }
  0x7f   :  { %9756 = vst [vmem:[#allocation57_spill] sm:$0xff] %v7321_v21  ;;  %v623_v48 = vand.u32 4294901760, %v622_v18  ;;  %v405_v14 = vsub.f32 %v7293_v59, %v9759_v35  ;;  %5978 = vmatprep.subr.bf16.mxu0 %v7321_v21  ;;  %v629_v52 = vsub.f32 %v7084_v10, %v9760_v27  ;;  %v9761_v18 = vand.u32 4294901760, %v7088_v34  ;;  %v7356_v35 = vld [vmem:[#allocation2 + $0x8] sm:$0xff] }
  0x80   :  { %v9763_v62 = vand.u32 4294901760, %v7300_v44  ;;  %v9466_v0 = vand.u32 4294901760, %v7324_v51  ;;  %v9465_v29 = vand.u32 4294901760, %v7326_v50  ;;  %v7360_v27 = vld [vmem:[#allocation5 + $0x148] sm:$0xff]  ;;  %5980 = vmatpush3.bf16.msra.mxu0 %v7321_v21  ;;  %vm291_vm3 = vcmp.lt.s32.totalorder %v6958_v1, 7 }
  0x81   :  { %v636_v19 = vsub.f32 %v7088_v34, %v9761_v18  ;;  %v7346_v23 = vpack.c.bf16 %v623_v48, %v616_v58  ;;  %9766 = vst [vmem:[#allocation60_spill] sm:$0xff] %v7360_v27  ;;  %v406_v59 = vand.u32 4294901760, %v405_v14  ;;  %v630_v18 = vand.u32 4294901760, %v629_v52  ;;  %v7406_v52 = vld [vmem:[#allocation5 + $0x158] sm:$0xff] }
  0x82   :  { %v7352_v45 = vpack.c.bf16 %v9763_v62, %v9762_v56  ;;  %v9767_v58 = vand.u32 4294901760, %v7136_v8  ;;  %v9768_v34 = vand.u32 4294901760, %v7139_v7  ;;  %v7373_v56 = vpack.c.bf16 %v9465_v29, %v9466_v0 }
  0x83   :  { %v637_v48 = vand.u32 4294901760, %v636_v19  ;;  %v7376_v62 = vand.u32 4294901760, %v7356_v35  ;;  %v9771_v14 = vand.u32 4294901760, %v7113_v6  ;;  %v9772_v8 = vand.u32 4294901760, %v7115_v5  ;;  %407 = vmatmul.mubr.f32.vlgmr.msra.gmra.mrb[0].mxu1 %v406_v59 }
  0x84   :  { %9764 = vst [vmem:[#allocation58_spill] sm:$0xff] %v7352_v45  ;;  %v7366_v10 = vpack.c.bf16 %v9768_v34, %v9767_v58  ;;  %9769 = vst [vmem:[#allocation61_spill] sm:$0xff] %v7373_v56  ;;  %5982 = vmatprep.subr.bf16.mxu0 %v7352_v45  ;;  %v275_v29 = vrot.slane %v7356_v35, 7  ;;  %5816 = vmatpush3.bf16.msra.mxu1 %v7230_v53  ;;  %v9774_v59 = vand.u32 4294901760, %v7167_v31  ;;  %v7404_v58 = vld [vmem:[#allocation5 + $0x150] sm:$0xff]  ;;  %v9776_v53 = vand.u32 4294901760, %v7358_v61 }
  0x85   :  { %9770 = vst [vmem:[#allocation62_spill] sm:$0xff] %v7376_v62  ;;  %v643_v19 = vsub.f32 %v7113_v6, %v9771_v14  ;;  %v650_v7 = vsub.f32 %v7115_v5, %v9772_v8  ;;  %v7385_v34 = vpack.c.bf16 %v637_v48, %v630_v18  ;;  %v7393_v14 = vsub.f32 %v7356_v35, %v7376_v62  ;;  %v7402_v48 = vld [vmem:[#allocation2 + $0x10] sm:$0xff] }
  0x86   :  { %v9775_v8 = vand.u32 4294901760, %v7170_v30  ;;  %1184 = vmatprep.mubr.f32.mxu0 %v7376_v62  ;;  %5818 = vmatprep.subr.bf16.mxu1 %v7273_v9  ;;  %v9779_v30 = vrot.slane %v7182_v2, 7  ;;  %v9787_v5 = vand.u32 15, %v6962_v3 }
  0x87   :  { %9773 = vst [vmem:[#allocation63_spill] sm:$0xff] %v7393_v14  ;;  %v644_v0 = vand.u32 4294901760, %v643_v19  ;;  %v651_v21 = vand.u32 4294901760, %v650_v7  ;;  %v9777_v19 = vand.u32 4294901760, %v7360_v27  ;;  %5984 = vmatpush3.bf16.msra.mxu0 %v7352_v45 }
  0x88   :  { %v7399_v18 = vpack.c.bf16 %v9775_v8, %v9774_v59  ;;  %v281_v31 = vsel %vm278_vm1, %v9779_v30, %v275_v29  ;;  %v7421_v8 = vand.u32 4294901760, %v7402_v48  ;;  %5986 = vmatprep.subr.bf16.mxu0 %v7373_v56  ;;  %v9784_v59 = vand.u32 4294901760, %v7145_v28  ;;  %5820 = vmatpush3.bf16.msra.mxu1 %v7285_v63 }
  0x89   :  { %v7413_v7 = vpack.c.bf16 %v9777_v19, %v9776_v53  ;;  %v7425_v62 = vpack.c.bf16 %v651_v21, %v644_v0  ;;  %v7427_v61 = vand.u32 4294901760, %v281_v31  ;;  %v9782_v53 = vand.u32 4294901760, %v7143_v41  ;;  %5822 = vmatprep.subr.bf16.mxu1 %v5821_v43 }
  0x8a   :  { %9780 = vst [vmem:[#allocation65_spill] sm:$0xff] %v7421_v8  ;;  %v7435_v30 = vsub.f32 %v7402_v48, %v7421_v8  ;;  %v664_v45 = vsub.f32 %v7145_v28, %v9784_v59  ;;  %v9785_v0 = vand.u32 4294901760, %v7393_v14  ;;  %vm260_vm2 = vcmp.ne.s32.totalorder %v9787_v5, 0 }
  0x8b   :  { %9778 = vst [vmem:[#allocation64_spill] sm:$0xff] %v7413_v7  ;;  %9781 = vst [vmem:[#allocation66_spill] sm:$0xff] %v7427_v61  ;;  %v657_v19 = vsub.f32 %v7143_v41, %v9782_v53  ;;  %v7447_v41 = vsub.f32 %v281_v31, %v7427_v61  ;;  %1186 = vmatmul.mubr.f32.gmra.mrb[2].mxu0 %v7427_v61  ;;  %v9788_v21 = vand.u32 4294901760, %v7404_v58  ;;  %v9789_v63 = vand.u32 4294901760, %v7406_v52  ;;  %v7463_v31 = vld [vmem:[#allocation5 + $0x160] sm:$0xff] }
  0x8c   :  { %9783 = vst [vmem:[#allocation67_spill] sm:$0xff] %v7435_v30  ;;  %v414_v53 = vsub.f32 %v7393_v14, %v9785_v0  ;;  %v9489_v59 = vand.u32 4294901760, %v7435_v30  ;;  %v665_v9 = vand.u32 4294901760, %v664_v45  ;;  %v9791_v0 = vmov 0.0   ;;  %1191 = vmatprep.mubr.f32.mxu0 %v7421_v8  ;;  %5988 = vmatpush3.bf16.msra.mxu0 %v7373_v56 }
  0x8d   :  { %9786 = vst [vmem:[#allocation68_spill] sm:$0xff] %v7447_v41  ;;  %v658_v27 = vand.u32 4294901760, %v657_v19  ;;  %v7457_v28 = vpack.c.bf16 %v9789_v63, %v9788_v21  ;;  %v7460_v14 = vsel %vm260_vm2, 1.0, %v9791_v0  ;;  %v276_v43 = vrot.slane %v7402_v48, 7  ;;  %5990 = vmatprep.subr.bf16.mxu0 %v7413_v7  ;;  %5824 = vmatpush3.bf16.msra.mxu1 %v7307_v15 }
  0x8e   :  { %9792 = vst [vmem:[#allocation70_spill] sm:$0xff] %v7460_v14  ;;  %v415_v3 = vand.u32 4294901760, %v414_v53  ;;  %v9793_v45 = vand.u32 4294901760, %v7208_v22  ;;  %v9794_v19 = vand.u32 4294901760, %v7211_v60  ;;  %v429_v63 = vsub.f32 %v7435_v30, %v9489_v59  ;;  %v7487_v22 = vld [vmem:[#allocation5 + $0x168] sm:$0xff]  ;;  %5826 = vmatprep.subr.bf16.mxu1 %v7346_v23 }
  0x8f   :  { %9790 = vst [vmem:[#allocation69_spill] sm:$0xff] %v7457_v28  ;;  %v7479_v8 = vpack.c.bf16 %v665_v9, %v658_v27  ;;  %v7482_v53 = vand.u32 4294901760, %v7201_v40  ;;  %v9795_v5 = vand.u32 4294901760, %v7174_v13  ;;  %v9796_v60 = vand.u32 4294901760, %v7447_v41 }
  0x90   :  { %v7473_v21 = vpack.c.bf16 %v9794_v19, %v9793_v45  ;;  %416 = vmatprep.mubr.f32.mxu1 %v415_v3  ;;  %v280_v27 = vsel %vm278_vm1, %v275_v29, %v276_v43  ;;  %v9797_v9 = vand.u32 4294901760, %v7176_v49  ;;  %5992 = vmatpush3.bf16.msra.mxu0 %v7413_v7  ;;  %v9799_v59 = vrot.slane %v7201_v40, 7 }
  0x91   :  { %v671_v56 = vsub.f32 %v7174_v13, %v9795_v5  ;;  %v420_v45 = vsub.f32 %v7447_v41, %v9796_v60  ;;  %v430_v5 = vand.u32 4294901760, %v429_v63  ;;  %v285_v30 = vmul.f32 %v280_v27, %v7460_v14  ;;  %v7505_v60 = vld [vmem:[#allocation5 + $0x170] sm:$0xff]  ;;  %v7513_v63 = vld [vmem:[#allocation5 + $0x178] sm:$0xff]  ;;  %5994 = vmatprep.subr.bf16.mxu0 %v7457_v28  ;;  %5828 = vmatpush3.bf16.msra.mxu1 %v7334_v47 }
  0x92   :  { %v678_v19 = vsub.f32 %v7176_v49, %v9797_v9  ;;  %v7503_v15 = vsub.f32 %v7201_v40, %v7482_v53  ;;  %v279_v23 = vsel %vm278_vm1, %v276_v43, %v9799_v59  ;;  %v9802_v59 = vand.u32 4294901760, %v7463_v31  ;;  %5830 = vmatprep.subr.bf16.mxu1 %v7385_v34 }
  0x93   :  { %v672_v3 = vand.u32 4294901760, %v671_v56  ;;  %v421_v41 = vand.u32 4294901760, %v420_v45  ;;  %v7516_v27 = vand.u32 4294901760, %v285_v30  ;;  %v7519_v14 = vand.u32 4294901760, %v279_v23 }
  0x94   :  { %9798 = vst [vmem:[#allocation71_spill] sm:$0xff] %v7503_v15  ;;  %v679_v29 = vand.u32 4294901760, %v678_v19  ;;  %v9800_v45 = vand.u32 4294901760, %v7259_v36  ;;  %v9801_v19 = vand.u32 4294901760, %v7262_v57  ;;  %v9803_v43 = vand.u32 4294901760, %v7487_v22  ;;  %5996 = vmatpush3.bf16.msra.mxu0 %v7457_v28 }
  0x95   :  { %v9502_v49 = vand.u32 4294901760, %v7505_v60  ;;  %422 = vmatmul.mubr.f32.gmra.mrb[2].mxu1 %v421_v41  ;;  %v7541_v36 = vsub.f32 %v285_v30, %v7516_v27  ;;  %v9806_v47 = vand.u32 4294901760, %v7503_v15  ;;  %v9505_v34 = vrot.slane %v7182_v2, 1  ;;  %1193 = vmatmul.mubr.f32.gmra.mrb[4].mxu0 %v7516_v27 }
  0x96   :  { %v7525_v9 = vpack.c.bf16 %v9801_v19, %v9800_v45  ;;  %v7528_v7 = vpack.c.bf16 %v679_v29, %v672_v3  ;;  %v7534_v61 = vpack.c.bf16 %v9803_v43, %v9802_v59  ;;  %v7547_v3 = vsub.f32 %v279_v23, %v7519_v14  ;;  %431 = vmatprep.mubr.f32.mxu1 %v430_v5  ;;  %v9818_v45 = vld [vmem:[#allocation23_spill] sm:$0xff] }
  0x97   :  { %9805 = vst [vmem:[#allocation73_spill] sm:$0xff] %v7541_v36  ;;  %v444_v57 = vsub.f32 %v7503_v15, %v9806_v47  ;;  %v9501_v29 = vand.u32 4294901760, %v7513_v63  ;;  %v288_v30 = vrot.slane %v7356_v35, 1  ;;  %v9504_v19 = vand.u32 4294901760, %v7541_v36  ;;  %5832 = vmatpush3.bf16.msra.mxu1 %v7366_v10  ;;  %1198 = vmatprep.mubr.f32.mxu0 %v7482_v53  ;;  %v9827_v15 = vld [vmem:[#allocation30_spill] sm:$0xff] }
  0x98   :  { %9804 = vst [vmem:[#allocation72_spill] sm:$0xff] %v7534_v61  ;;  %9807 = vst [vmem:[#allocation74_spill] sm:$0xff] %v7547_v3  ;;  %5998 = vmatprep.subr.bf16.mxu0 %v7534_v61  ;;  %v9503_v5 = vand.u32 4294901760, %v7547_v3  ;;  %v9809_v35 = vrot.slane %v7402_v48, 1  ;;  %5834 = vmatprep.subr.bf16.mxu1 %v7425_v62 }
  0x99   :  { %v445_v59 = vand.u32 4294901760, %v444_v57  ;;  %v7565_v23 = vpack.c.bf16 %v9501_v29, %v9502_v49  ;;  %v294_v47 = vsel %vm291_vm3, %v9505_v34, %v288_v30  ;;  %v9810_v57 = vand.u32 4294901760, %v7220_v24  ;;  %6000 = vmatpush3.bf16.msra.mxu0 %v7534_v61  ;;  %v9826_v61 = vld [vmem:[#allocation49_spill] sm:$0xff] }
  0x9a   :  { %v293_v43 = vsel %vm291_vm3, %v288_v30, %v9809_v35  ;;  %v9811_v29 = vand.u32 15, %v6965_v4  ;;  %v435_v10 = vsub.f32 %v7541_v36, %v9504_v19  ;;  %v450_v35 = vsub.f32 %v7547_v3, %v9503_v5  ;;  %1200 = vmatmul.mubr.f32.gmra.mrb[6].mxu0 %v7519_v14 }
  0x9b   :  { %9808 = vst [vmem:[#allocation75_spill] sm:$0xff] %v7565_v23  ;;  %v7580_v41 = vsub.f32 %v7220_v24, %v9810_v57  ;;  %v7591_v49 = vand.u32 4294901760, %v294_v47  ;;  %v9813_v30 = vand.u32 4294901760, %v7239_v11  ;;  %6002 = vmatprep.subr.bf16.mxu0 %v7565_v23  ;;  %5836 = vmatpush3.bf16.msra.mxu1 %v7399_v18  ;;  %v9817_v57 = vand.u32 4294901760, %v7267_v20 }
  0x9c   :  { %vm267_vm4 = vcmp.ne.s32.totalorder %v9811_v29, 15  ;;  %v436_v5 = vand.u32 4294901760, %v435_v10  ;;  %v451_v19 = vand.u32 4294901760, %v450_v35  ;;  %v9816_v10 = vand.u32 4294901760, %v7265_v12  ;;  %5838 = vmatprep.subr.bf16.mxu1 %v7479_v8 }
  0x9d   :  { %9812 = vst [vmem:[#allocation76_spill] sm:$0xff] %v7591_v49  ;;  %v7596_v24 = vsub.f32 %v7239_v11, %v9813_v30  ;;  %v9506_v4 = vand.u32 4294901760, %v7580_v41  ;;  %v7603_v29 = vsel %vm267_vm4, 1.0, %v9791_v0  ;;  %v7610_v11 = vsub.f32 %v294_v47, %v7591_v49  ;;  %6004 = vmatpush3.bf16.msra.mxu0 %v7565_v23  ;;  %v9837_v23 = vld [vmem:[#allocation60_spill] sm:$0xff] }
  0x9e   :  { %9814 = vst [vmem:[#allocation77_spill] sm:$0xff] %v7603_v29  ;;  %v297_v62 = vmul.f32 %v293_v43, %v7603_v29  ;;  %v7621_v35 = vsub.f32 %v7265_v12, %v9816_v10  ;;  %v7626_v47 = vsub.f32 %v7267_v20, %v9817_v57  ;;  %437 = vmatmul.mubr.f32.gmra.mrb[4].mxu1 %v436_v5  ;;  %v9819_v12 = vld [vmem:[#allocation25_spill] sm:$0xff]  ;;  %v9821_v43 = vand.u32 4294901760, %v7290_v42 }
  0x9f   :  { %9815 = vst [vmem:[#allocation78_spill] sm:$0xff] %v7610_v11  ;;  %v9507_v30 = vand.u32 4294901760, %v7596_v24  ;;  %v1455_v34 = vsub.f32 %v7580_v41, %v9506_v4  ;;  %v9509_v18 = vand.u32 4294901760, %v7610_v11  ;;  %446 = vmatprep.mubr.f32.mxu1 %v445_v59  ;;  %v9822_v59 = vand.u32 4294901760, %v7300_v44  ;;  %5840 = vmatpush3.bf16.msra.mxu1 %v7473_v21 }
  0xa0   :  { %v7638_v57 = vand.u32 4294901760, %v297_v62  ;;  %v9514_v8 = vand.u32 4294901760, %v7621_v35  ;;  %v9521_v5 = vand.u32 4294901760, %v7626_v47  ;;  %v7648_v29 = vsub.f32 %v7290_v42, %v9821_v43  ;;  %v9824_v42 = vld [vmem:[#allocation26_spill] sm:$0xff]  ;;  %v9825_v43 = vld [vmem:[#allocation28_spill] sm:$0xff]  ;;  %5842 = vmatprep.subr.bf16.mxu1 %v7528_v7 }
  0xa1   :  { %v1462_v4 = vsub.f32 %v7596_v24, %v9507_v30  ;;  %v1456_v20 = vand.u32 4294901760, %v1455_v34  ;;  %v1414_v30 = vsub.f32 %v7610_v11, %v9509_v18  ;;  %v7653_v34 = vsub.f32 %v7300_v44, %v9822_v59  ;;  %v9832_v11 = vld [vmem:[#allocation34_spill] sm:$0xff] }
  0xa2   :  { %9820 = vst [vmem:[#allocation23_spill] sm:$0xff] %v7638_v57  ;;  %v7657_v10 = vsub.f32 %v297_v62, %v7638_v57  ;;  %v1469_v18 = vsub.f32 %v7621_v35, %v9514_v8  ;;  %452 = vmatmul.mubr.f32.gmra.mrb[6].mxu1 %v451_v19  ;;  %v9524_v21 = vand.u32 4294901760, %v7648_v29  ;;  %v9829_v19 = vand.u32 4294901760, %v7324_v51  ;;  %v9843_v57 = vld [vmem:[#allocation42_spill] sm:$0xff] }
  0xa3   :  { %v1463_v56 = vand.u32 4294901760, %v1462_v4  ;;  %v1476_v4 = vsub.f32 %v7626_v47, %v9521_v5  ;;  %v1415_v44 = vand.u32 4294901760, %v1414_v30  ;;  %v9525_v62 = vand.u32 4294901760, %v7653_v34  ;;  %682 = vmatprep.mubr.f32.mxu1 %v9826_v61  ;;  %v9828_v5 = vld [vmem:[#allocation31_spill] sm:$0xff]  ;;  %5844 = vmatpush3.bf16.msra.mxu1 %v7525_v9  ;;  %v9834_v61 = vld [vmem:[#allocation36_spill] sm:$0xff] }
  0xa4   :  { %9823 = vst [vmem:[#allocation25_spill] sm:$0xff] %v7657_v10  ;;  %v9526_v8 = vand.u32 4294901760, %v7657_v10  ;;  %v1470_v28 = vand.u32 4294901760, %v1469_v18  ;;  %v1483_v7 = vsub.f32 %v7648_v29, %v9524_v21  ;;  %v7683_v30 = vsub.f32 %v7324_v51, %v9829_v19 }
  0xa5   :  { %v6005_v59 = vpack.c.bf16 %v1463_v56, %v1456_v20  ;;  %v1477_v3 = vand.u32 4294901760, %v1476_v4  ;;  %5217 = vmatprep.mubr.f32.mxu0 %v1415_v44  ;;  %v1490_v56 = vsub.f32 %v7653_v34, %v9525_v62  ;;  %v9830_v44 = vand.u32 4294901760, %v7326_v50  ;;  %v9831_v62 = vld [vmem:[#allocation32_spill] sm:$0xff] }
  0xa6   :  { %v1424_v20 = vsub.f32 %v7657_v10, %v9526_v8  ;;  %v9833_v51 = vpack.c.bf16 %v6979_v26, %v6977_v25  ;;  %v1484_v19 = vand.u32 4294901760, %v1483_v7  ;;  %v9535_v9 = vand.u32 4294901760, %v7683_v30  ;;  %v9835_v10 = vld [vmem:[#allocation59_spill] sm:$0xff]  ;;  %v9839_v26 = vld [vmem:[#allocation54_spill] sm:$0xff] }
  0xa7   :  { %6006 = vmatprep.subr.bf16.mxu0 %v6005_v59  ;;  %v6009_v4 = vpack.c.bf16 %v1477_v3, %v1470_v28  ;;  %v7693_v21 = vsub.f32 %v7326_v50, %v9830_v44  ;;  %v1491_v18 = vand.u32 4294901760, %v1490_v56  ;;  %v9836_v50 = vand.u32 4294901760, %v9835_v10  ;;  %684 = vmatmul.mubr.f32.vlgmr.msra.gmra.mrb[8].mxu1 %v9839_v26  ;;  %v9842_v3 = vld [vmem:[#allocation41_spill] sm:$0xff]  ;;  %v9859_v26 = vld [vmem:[#allocation52_spill] sm:$0xff] }
  0xa8   :  { %5846 = vmatprep.subr.bf16.mxu1 %v9833_v51  ;;  %v1425_v28 = vand.u32 4294901760, %v1424_v20  ;;  %v9838_v36 = vand.u32 4294901760, %v9837_v23  ;;  %v1497_v56 = vsub.f32 %v7683_v30, %v9535_v9  ;;  %v9840_v20 = vld [vmem:[#allocation37_spill] sm:$0xff]  ;;  %v9841_v51 = vld [vmem:[#allocation39_spill] sm:$0xff]  ;;  %v9847_v49 = vpack.c.bf16 %v6987_v33, %v6985_v32 }
  0xa9   :  { %v7707_v44 = vsub.f32 %v9835_v10, %v9836_v50  ;;  %v6013_v7 = vpack.c.bf16 %v1491_v18, %v1484_v19  ;;  %v9844_v10 = vpack.c.bf16 %v6997_v39, %v6995_v38  ;;  %v9846_v50 = vand.u32 4294901760, %v7404_v58  ;;  %v9861_v19 = vld [vmem:[#allocation65_spill] sm:$0xff] }
  0xaa   :  { %v7712_v25 = vsub.f32 %v9837_v23, %v9838_v36  ;;  %5218 = vmatmul.mubr.f32.vlgmr.msra.gmra.mrb[8].mxu0 %v1425_v28  ;;  %v9845_v36 = vand.u32 4294901760, %v7693_v21  ;;  %v1498_v38 = vand.u32 4294901760, %v1497_v56  ;;  %v9848_v39 = vand.u32 4294901760, %v7406_v52  ;;  %v9855_v56 = vld [vmem:[#allocation66_spill] sm:$0xff] }
  0xab   :  { %5848 = vmatpush3.bf16.msra.mxu1 %v9844_v10  ;;  %v7733_v8 = vsub.f32 %v7404_v58, %v9846_v50  ;;  %6008 = vmatpush3.bf16.msra.mxu0 %v6005_v59  ;;  %v9852_v50 = vld [vmem:[#allocation62_spill] sm:$0xff]  ;;  %v9853_v32 = vand.u32 4294901760, %v7707_v44  ;;  %v9856_v18 = vand.u32 4294901760, %v7463_v31  ;;  %v9857_v9 = vand.u32 4294901760, %v7487_v22 }
  0xac   :  { %v1504_v23 = vsub.f32 %v7693_v21, %v9845_v36  ;;  %5850 = vmatprep.subr.bf16.mxu1 %v9847_v49  ;;  %v7741_v28 = vsub.f32 %v7406_v52, %v9848_v39  ;;  %6010 = vmatprep.subr.bf16.mxu0 %v6009_v4  ;;  %v9854_v49 = vand.u32 4294901760, %v7712_v25 }
  0xad   :  { %689 = vmatprep.mubr.f32.mxu1 %v9852_v50  ;;  %v1511_v33 = vsub.f32 %v7707_v44, %v9853_v32  ;;  %v7765_v50 = vsub.f32 %v7487_v22, %v9857_v9  ;;  %v9858_v32 = vld [vmem:[#allocation50_spill] sm:$0xff]  ;;  %v9862_v10 = vand.u32 4294901760, %v7733_v8  ;;  %v9864_v22 = vpack.c.bf16 %v7018_v55, %v7016_v54 }
  0xae   :  { %v1505_v58 = vand.u32 4294901760, %v1504_v23  ;;  %v1518_v59 = vsub.f32 %v7712_v25, %v9854_v49  ;;  %691 = vmatmul.mubr.f32.gmra.mrb[10].mxu1 %v9855_v56  ;;  %v1531_v39 = vand.u32 4294901760, %v7741_v28  ;;  %v7760_v23 = vsub.f32 %v7463_v31, %v9856_v18  ;;  %v9863_v18 = vld [vmem:[#allocation16_spill] sm:$0xff] }
  0xaf   :  { %v5875_v13 = vpack.c.bf16 %v9859_v26, %v9858_v32  ;;  %v9860_v49 = vpack.c.bf16 %v7008_v46, %v6992_v37  ;;  %v1512_v52 = vand.u32 4294901760, %v1511_v33  ;;  %696 = vmatprep.mubr.f32.mxu1 %v9861_v19  ;;  %v1525_v31 = vsub.f32 %v7733_v8, %v9862_v10  ;;  %6012 = vmatpush3.bf16.msra.mxu0 %v6009_v4  ;;  %v9907_v26 = vld [vmem:[#allocation21_spill] sm:$0xff] }
  0xb0   :  { %v1519_v56 = vand.u32 4294901760, %v1518_v59  ;;  %v235_v36 = vand.u32 15, %v9863_v18  ;;  %v1532_v9 = vsub.f32 %v7741_v28, %v1531_v39  ;;  %v1538_v37 = vand.u32 4294901760, %v7760_v23  ;;  %6014 = vmatprep.subr.bf16.mxu0 %v6013_v7 }
  0xb1   :  { %5852 = vmatpush3.bf16.msra.mxu1 %v9860_v49  ;;  %v1545_v46 = vand.u32 4294901760, %v7765_v50  ;;  %v9865_v33 = vrot.slane %v7201_v40, 1  ;;  %v9866_v59 = vrot.slane %v7402_v48, 1  ;;  %v6017_v49 = vpack.c.bf16 %v1505_v58, %v1498_v38 }
  0xb2   :  { %5854 = vmatprep.subr.bf16.mxu1 %v9864_v22  ;;  %v9867_v54 = vand.u32 4294901760, %v7505_v60  ;;  %698 = vmatmul.mubr.f32.gmra.mrb[12].mxu1 %v7516_v27  ;;  %v9868_v4 = vand.u32 4294901760, %v7513_v63  ;;  %v9869_v48 = vpack.c.bf16 %v7042_v17, %v7040_v16  ;;  %vm269_vm5 = vcmp.ne.s32.totalorder %v235_v36, 15 }
  0xb3   :  { %v292_v10 = vsel %vm291_vm3, %v9866_v59, %v9865_v33  ;;  %v6021_v33 = vpack.c.bf16 %v1519_v56, %v1512_v52  ;;  %703 = vmatprep.mubr.f32.mxu1 %v7482_v53  ;;  %v9871_v58 = vrot.slane %v7201_v40, 1  ;;  %6016 = vmatpush3.bf16.msra.mxu0 %v6013_v7  ;;  %v1526_v16 = vand.u32 4294901760, %v1525_v31  ;;  %v9874_v7 = vld [vmem:[#allocation53_spill] sm:$0xff] }
  0xb4   :  { %v7789_v18 = vand.u32 4294901760, %v292_v10  ;;  %v7794_v55 = vsub.f32 %v7505_v60, %v9867_v54  ;;  %v7800_v22 = vsub.f32 %v7513_v63, %v9868_v4  ;;  %v9870_v60 = vrot.slane %v7182_v2, 1  ;;  %6018 = vmatprep.subr.bf16.mxu0 %v6017_v49 }
  0xb5   :  { %5856 = vmatpush3.bf16.msra.mxu1 %v9869_v48  ;;  %v9872_v63 = vpack.c.bf16 %v9819_v12, %v9818_v45  ;;  %v1533_v17 = vand.u32 4294901760, %v1532_v9  ;;  %v1539_v52 = vsub.f32 %v7760_v23, %v1538_v37  ;;  %v1546_v56 = vsub.f32 %v7765_v50, %v1545_v46 }
  0xb6   :  { %v7807_v38 = vsub.f32 %v292_v10, %v7789_v18  ;;  %v295_v59 = vsel %vm291_vm3, %v9871_v58, %v9870_v60  ;;  %v1552_v2 = vand.u32 4294901760, %v7794_v55  ;;  %v1559_v40 = vand.u32 4294901760, %v7800_v22  ;;  %705 = vmatmul.mubr.f32.gmra.mrb[14].mxu1 %v7519_v14 }
  0xb7   :  { %5858 = vmatprep.subr.bf16.mxu1 %v9872_v63  ;;  %v7824_v10 = vsel %vm269_vm5, 1.0, %v9791_v0  ;;  %v9873_v12 = vpack.c.bf16 %v9825_v43, %v9824_v42  ;;  %840 = vmatprep.mubr.f32.mxu1 %v9874_v7  ;;  %v9875_v9 = vpack.c.bf16 %v9828_v5, %v9827_v15  ;;  %v6025_v54 = vpack.c.bf16 %v1533_v17, %v1526_v16 }
  0xb8   :  { %v1433_v36 = vand.u32 4294901760, %v7807_v38  ;;  %v299_v45 = vmul.f32 %v295_v59, %v7824_v10  ;;  %6020 = vmatpush3.bf16.msra.mxu0 %v6017_v49  ;;  %v1540_v4 = vand.u32 4294901760, %v1539_v52  ;;  %v1547_v48 = vand.u32 4294901760, %v1546_v56 }
  0xb9   :  { %5860 = vmatpush3.bf16.msra.mxu1 %v9873_v12  ;;  %6022 = vmatprep.subr.bf16.mxu0 %v6021_v33  ;;  %v1553_v42 = vsub.f32 %v7794_v55, %v1552_v2  ;;  %v1560_v43 = vsub.f32 %v7800_v22, %v1559_v40  ;;  %v9876_v59 = vand.u32 4294901760, %v7580_v41  ;;  %v9877_v63 = vand.u32 4294901760, %v7596_v24 }
  0xba   :  { %v1434_v31 = vsub.f32 %v7807_v38, %v1433_v36  ;;  %5862 = vmatprep.subr.bf16.mxu1 %v9875_v9  ;;  %v7838_v60 = vand.u32 4294901760, %v299_v45  ;;  %v9878_v5 = vand.u32 4294901760, %v7621_v35  ;;  %v9879_v49 = vand.u32 4294901760, %v7626_v47 }
  0xbb   :  { %v7846_v12 = vpack.c.bf16 %v9877_v63, %v9876_v59  ;;  %v9880_v17 = vand.u32 4294901760, %v7648_v29  ;;  %v9881_v52 = vand.u32 4294901760, %v7653_v34  ;;  %v9884_v9 = vand.u32 4294901760, %v7693_v21 }
  0xbc   :  { %v1435_v58 = vand.u32 4294901760, %v1434_v31  ;;  %v7849_v15 = vsub.f32 %v299_v45, %v7838_v60  ;;  %v7855_v16 = vpack.c.bf16 %v9879_v49, %v9878_v5  ;;  %v9882_v31 = vpack.c.bf16 %v9832_v11, %v9831_v62  ;;  %6024 = vmatpush3.bf16.msra.mxu0 %v6021_v33  ;;  %v9892_v33 = vld [vmem:[#allocation43_spill] sm:$0xff] }
  0xbd   :  { %v7861_v56 = vpack.c.bf16 %v9881_v52, %v9880_v17  ;;  %v9883_v45 = vand.u32 4294901760, %v7683_v30  ;;  %v9885_v63 = vand.u32 4294901760, %v7707_v44  ;;  %v9886_v5 = vand.u32 4294901760, %v7712_v25  ;;  %6026 = vmatprep.subr.bf16.mxu0 %v6025_v54 }
  0xbe   :  { %5864 = vmatpush3.bf16.msra.mxu1 %v9882_v31  ;;  %5220 = vmatprep.mubr.f32.mxu0 %v1435_v58  ;;  %v9887_v17 = vand.u32 4294901760, %v7733_v8  ;;  %v9888_v11 = vpack.c.bf16 %v9834_v61, %v7113_v6  ;;  %v1443_v62 = vand.u32 4294901760, %v7849_v15  ;;  %v7886_v58 = vpack.c.bf16 %v1545_v46, %v1538_v37  ;;  %v9891_v46 = vld [vmem:[#allocation45_spill] sm:$0xff] }
  0xbf   :  { %v7870_v59 = vpack.c.bf16 %v9884_v9, %v9883_v45  ;;  %v7876_v49 = vpack.c.bf16 %v9886_v5, %v9885_v63  ;;  %v7888_v31 = vpack.c.bf16 %v1559_v40, %v1552_v2  ;;  %v6029_v45 = vpack.c.bf16 %v1547_v48, %v1540_v4  ;;  %v9894_v40 = vld [vmem:[#allocation76_spill] sm:$0xff]  ;;  %v9896_v48 = vld [vmem:[#allocation47_spill] sm:$0xff] }
  0xc0   :  { %v7880_v52 = vpack.c.bf16 %v1531_v39, %v9887_v17  ;;  %5866 = vmatprep.subr.bf16.mxu1 %v9888_v11  ;;  %v1554_v9 = vand.u32 4294901760, %v1553_v42  ;;  %v1561_v63 = vand.u32 4294901760, %v1560_v43  ;;  %v1444_v39 = vsub.f32 %v7849_v15, %v1443_v62  ;;  %6028 = vmatpush3.bf16.msra.mxu0 %v6025_v54  ;;  %v9895_v4 = vld [vmem:[#allocation48_spill] sm:$0xff]  ;;  %v9900_v54 = vld [vmem:[#allocation18_spill] sm:$0xff]  ;;  %v9901_v43 = vld [vmem:[#allocation23_spill] sm:$0xff] }
  0xc1   :  { %v9889_v5 = vpack.c.bf16 %v9841_v51, %v9840_v20  ;;  %v9890_v6 = vpack.c.bf16 %v9843_v57, %v9842_v3  ;;  %6030 = vmatprep.subr.bf16.mxu0 %v6029_v45  ;;  %v9893_v2 = vpack.c.bf16 %v9891_v46, %v9892_v33  ;;  %v9897_v42 = vpack.c.bf16 %v9895_v4, %v9896_v48  ;;  %v9898_v3 = vld [vmem:[#allocation17_spill] sm:$0xff]  ;;  %v9899_v51 = vld [vmem:[#allocation56_spill] sm:$0xff]  ;;  %v9902_v17 = vld [vmem:[#allocation19_spill] sm:$0xff] }
  0xc2   :  { %v1445_v61 = vand.u32 4294901760, %v1444_v39  ;;  %v6033_v37 = vpack.c.bf16 %v1561_v63, %v1554_v9  ;;  %v6037_v57 = vpack.c.bf16 %v7596_v24, %v7580_v41  ;;  %v6041_v20 = vpack.c.bf16 %v7626_v47, %v7621_v35  ;;  %v9903_v41 = vld [vmem:[#allocation63_spill] sm:$0xff]  ;;  %v9904_v24 = vld [vmem:[#allocation68_spill] sm:$0xff]  ;;  %v9910_v11 = vld [vmem:[#allocation22_spill] sm:$0xff] }
  0xc3   :  { %5868 = vmatpush3.bf16.msra.mxu1 %v9889_v5  ;;  %v9905_v35 = vld [vmem:[#allocation20_spill] sm:$0xff]  ;;  %v9906_v47 = vld [vmem:[#allocation67_spill] sm:$0xff]  ;;  %v6049_v32 = vpack.c.bf16 %v7693_v21, %v7683_v30  ;;  %v6053_v63 = vpack.c.bf16 %v7712_v25, %v7707_v44  ;;  %v9913_v39 = vld [vmem:[#allocation74_spill] sm:$0xff]  ;;  %v9915_v30 = vand.u32 4294901760, %v9874_v7  ;;  %v6061_v44 = vpack.c.bf16 %v7765_v50, %v7760_v23 }
  0xc4   :  { %5870 = vmatprep.subr.bf16.mxu1 %v9890_v6  ;;  %5221 = vmatmul.mubr.f32.gmra.mrb[10].mxu0 %v1445_v61  ;;  %v9912_v9 = vld [vmem:[#allocation24_spill] sm:$0xff]  ;;  %v9914_v21 = vld [vmem:[#allocation27_spill] sm:$0xff]  ;;  %v9916_v5 = vld [vmem:[#allocation29_spill] sm:$0xff]  ;;  %v6057_v6 = vpack.c.bf16 %v7741_v28, %v7733_v8  ;;  %v6065_v46 = vpack.c.bf16 %v7800_v22, %v7794_v55  ;;  %v9925_v23 = vand.u32 4294901760, %v9899_v51  ;;  %v9926_v55 = vand.u32 4294901760, %v9903_v41 }
  0xc5   :  { %5255 = vmatprep.mubr.f32.mxu0 %v9894_v40  ;;  %6032 = vmatpush3.bf16.msra.mxu0 %v6029_v45  ;;  %v9911_v45 = vld [vmem:[#allocation71_spill] sm:$0xff]  ;;  %v9917_v61 = vld [vmem:[#allocation33_spill] sm:$0xff]  ;;  %v9919_v25 = vld [vmem:[#allocation38_spill] sm:$0xff]  ;;  %v9930_v48 = vand.u32 4294901760, %v9906_v47 }
  0xc6   :  { %6034 = vmatprep.subr.bf16.mxu0 %v6033_v37  ;;  %v9920_v7 = vld [vmem:[#allocation40_spill] sm:$0xff]  ;;  %v9922_v8 = vld [vmem:[#allocation46_spill] sm:$0xff]  ;;  %v9923_v28 = vld [vmem:[#allocation51_spill] sm:$0xff] }
  0xc7   :  { %5872 = vmatpush3.bf16.msra.mxu1 %v9893_v2  ;;  %v9921_v33 = vld [vmem:[#allocation44_spill] sm:$0xff]  ;;  %v9924_v50 = vld [vmem:[#allocation55_spill] sm:$0xff]  ;;  %v9927_v22 = vld [vmem:[#allocation25_spill] sm:$0xff]  ;;  %v9928_v2 = vand.u32 4294901760, %v9904_v24 }
  0xc8   :  { %5874 = vmatprep.subr.bf16.mxu1 %v9897_v42  ;;  %v9929_v4 = vld [vmem:[#allocation57_spill] sm:$0xff] }
  0xc9   :  { %6036 = vmatpush3.bf16.msra.mxu0 %v6033_v37  ;;  %v9918_v37 = vld [vmem:[#allocation35_spill] sm:$0xff] }
  0xca   :  { %6038 = vmatprep.subr.bf16.mxu0 %v6037_v57 }
  0xcb   :  { %5876 = vmatpush3.bf16.msra.mxu1 %v5875_v13  ;;  %v6045_v13 = vpack.c.bf16 %v7653_v34, %v7648_v29  ;;  %v9908_v29 = vld [vmem:[#allocation73_spill] sm:$0xff]  ;;  %v9909_v34 = vld [vmem:[#allocation78_spill] sm:$0xff] }
  0xcc   :  { %5878 = vmatprep.subr.bf16.mxu1 %v9898_v3  ;;  %5256 = vmatmul.mubr.f32.vlgmr.msra.gmra.mrb[8].mxu0 %v9901_v43  ;;  %v9931_v42 = vand.u32 4294901760, %v9909_v34 }
  0xcd   :  { %6040 = vmatpush3.bf16.msra.mxu0 %v6037_v57  ;;  %5258 = vmatprep.mubr.f32.mxu0 %v7789_v18  ;;  %v9932_v57 = vand.u32 4294901760, %v9908_v29 }
  0xce   :  { %843 = vmatmul.mubr.f32.vlgmr.msra.gmra.mrb[16].mxu1 %v9899_v51  ;;  %6042 = vmatprep.subr.bf16.mxu0 %v6041_v20  ;;  %v9935_v51 = vand.u32 4294901760, %v9913_v39 }
  0xcf   :  { %5880 = vmatpush3.bf16.msra.mxu1 %v9900_v54  ;;  %849 = vmatprep.mubr.f32.mxu1 %v9903_v41  ;;  %v9939_v41 = vld [vmem:[#allocation69_spill] sm:$0xff] }
  0xd0   :  { %5882 = vmatprep.subr.bf16.mxu1 %v9902_v17  ;;  %5259 = vmatmul.mubr.f32.gmra.mrb[10].mxu0 %v7838_v60 }
  0xd1   :  { %6044 = vmatpush3.bf16.msra.mxu0 %v6041_v20  ;;  %5293 = vmatprep.mubr.f32.mxu0 %v9909_v34  ;;  %v9934_v20 = vand.u32 4294901760, %v9911_v45 }
  0xd2   :  { %852 = vmatmul.mubr.f32.gmra.mrb[18].mxu1 %v9904_v24  ;;  %6046 = vmatprep.subr.bf16.mxu0 %v6045_v13  ;;  %v9940_v24 = vld [vmem:[#allocation72_spill] sm:$0xff] }
  0xd3   :  { %5884 = vmatpush3.bf16.msra.mxu1 %v9905_v35  ;;  %858 = vmatprep.mubr.f32.mxu1 %v9906_v47  ;;  %v9942_v47 = vld [vmem:[#allocation54_spill] sm:$0xff] }
  0xd4   :  { %5886 = vmatprep.subr.bf16.mxu1 %v9907_v26 }
  0xd5   :  { %6048 = vmatpush3.bf16.msra.mxu0 %v6045_v13  ;;  %v9938_v13 = vld [vmem:[#allocation64_spill] sm:$0xff] }
  0xd6   :  { %861 = vmatmul.mubr.f32.gmra.mrb[20].mxu1 %v9908_v29  ;;  %6050 = vmatprep.subr.bf16.mxu0 %v6049_v32  ;;  %v9945_v29 = vld [vmem:[#allocation66_spill] sm:$0xff] }
  0xd7   :  { %5888 = vmatpush3.bf16.msra.mxu1 %v9910_v11  ;;  %867 = vmatprep.mubr.f32.mxu1 %v9911_v45 }
  0xd8   :  { %5890 = vmatprep.subr.bf16.mxu1 %v9912_v9 }
  0xd9   :  { %6052 = vmatpush3.bf16.msra.mxu0 %v6049_v32  ;;  %v9944_v32 = vand.u32 4294901760, %v9927_v22 }
  0xda   :  { %870 = vmatmul.mubr.f32.gmra.mrb[22].mxu1 %v9913_v39  ;;  %6054 = vmatprep.subr.bf16.mxu0 %v6053_v63 }
  0xdb   :  { %5892 = vmatpush3.bf16.msra.mxu1 %v9914_v21  ;;  %974 = vmatprep.mubr.f32.mxu1 %v9915_v30 }
  0xdc   :  { %5894 = vmatprep.subr.bf16.mxu1 %v9916_v5 }
  0xdd   :  { %6056 = vmatpush3.bf16.msra.mxu0 %v6053_v63 }
  0xde   :  { %6058 = vmatprep.subr.bf16.mxu0 %v6057_v6 }
  0xdf   :  { %5896 = vmatpush3.bf16.msra.mxu1 %v9917_v61 }
  0xe0   :  { %5898 = vmatprep.subr.bf16.mxu1 %v9918_v37 }
  0xe1   :  { %6060 = vmatpush3.bf16.msra.mxu0 %v6057_v6 }
  0xe2   :  { %6062 = vmatprep.subr.bf16.mxu0 %v6061_v44 }
  0xe3   :  { %5900 = vmatpush3.bf16.msra.mxu1 %v9919_v25 }
  0xe4   :  { %5902 = vmatprep.subr.bf16.mxu1 %v9920_v7 }
  0xe5   :  { %6064 = vmatpush3.bf16.msra.mxu0 %v6061_v44 }
  0xe6   :  { %6066 = vmatprep.subr.bf16.mxu0 %v6065_v46 }
  0xe7   :  { %5904 = vmatpush3.bf16.msra.mxu1 %v9921_v33 }
  0xe8   :  { %5906 = vmatprep.subr.bf16.mxu1 %v9922_v8 }
  0xe9   :  { %6068 = vmatpush3.bf16.msra.mxu0 %v6065_v46 }
  0xea   :  { %6070 = vmatprep.subr.bf16.mxu0 %v9924_v50 }
  0xeb   :  { %5908 = vmatpush3.bf16.msra.mxu1 %v9923_v28 }
  0xec   :  { %5942 = vmatprep.subr.bf16.mxu1 %v9898_v3  ;;  %5294 = vmatmul.mubr.f32.vlgmr.msra.gmra.mrb[8].mxu0 %v9927_v22  ;;  %v9933_v3 = vld [vmem:[#allocation58_spill] sm:$0xff] }
  0xed   :  { %6072 = vmatpush3.bf16.msra.mxu0 %v9924_v50  ;;  %5296 = vmatprep.mubr.f32.mxu0 %v7807_v38 }
  0xee   :  { %978 = vmatmul.mubr.f32.vlgmr.msra.gmra.mrb[24].mxu1 %v9925_v23  ;;  %6074 = vmatprep.subr.bf16.mxu0 %v9929_v4 }
  0xef   :  { %5944 = vmatpush3.bf16.msra.mxu1 %v9900_v54  ;;  %985 = vmatprep.mubr.f32.mxu1 %v9926_v55  ;;  %v9936_v54 = vld [vmem:[#allocation61_spill] sm:$0xff] }
  0xf0   :  { %5946 = vmatprep.subr.bf16.mxu1 %v9902_v17  ;;  %5297 = vmatmul.mubr.f32.gmra.mrb[10].mxu0 %v7849_v15  ;;  %v9937_v17 = vld [vmem:[#allocation49_spill] sm:$0xff] }
  0xf1   :  { %6076 = vmatpush3.bf16.msra.mxu0 %v9929_v4  ;;  %5331 = vmatprep.mubr.f32.mxu0 %v9931_v42 }
  0xf2   :  { %989 = vmatmul.mubr.f32.gmra.mrb[26].mxu1 %v9928_v2  ;;  %6078 = vmatprep.subr.bf16.mxu0 %v9933_v3 }
  0xf3   :  { %5948 = vmatpush3.bf16.msra.mxu1 %v9905_v35  ;;  %996 = vmatprep.mubr.f32.mxu1 %v9930_v48  ;;  %v9941_v35 = vld [vmem:[#allocation75_spill] sm:$0xff] }
  0xf4   :  { %5950 = vmatprep.subr.bf16.mxu1 %v9907_v26  ;;  %v9943_v26 = vld [vmem:[#allocation62_spill] sm:$0xff] }
  0xf5   :  { %6080 = vmatpush3.bf16.msra.mxu0 %v9933_v3 }
  0xf6   :  { %1000 = vmatmul.mubr.f32.gmra.mrb[28].mxu1 %v9932_v57  ;;  %6082 = vmatprep.subr.bf16.mxu0 %v9936_v54 }
  0xf7   :  { %5952 = vmatpush3.bf16.msra.mxu1 %v9910_v11  ;;  %1007 = vmatprep.mubr.f32.mxu1 %v9934_v20  ;;  %v189_v20 = vld [vmem:[#allocation8 + $0x20] sm:$0xff] }
  0xf8   :  { %5954 = vmatprep.subr.bf16.mxu1 %v9912_v9 }
  0xf9   :  { %6084 = vmatpush3.bf16.msra.mxu0 %v9936_v54 }
  0xfa   :  { %1011 = vmatmul.mubr.f32.gmra.mrb[30].mxu1 %v9935_v51  ;;  %6086 = vmatprep.subr.bf16.mxu0 %v9938_v13  ;;  %v190_v51 = vld [vmem:[#allocation8 + $0x28] sm:$0xff] }
  0xfb   :  { %5956 = vmatpush3.bf16.msra.mxu1 %v9914_v21  ;;  %1302 = vmatprep.mubr.f32.mxu1 %v9937_v17  ;;  %v8076_v17 = vpack.c.bf16 %v190_v51, %v189_v20 }
  0xfc   :  { %5958 = vmatprep.subr.bf16.mxu1 %v9916_v5 }
  0xfd   :  { %6088 = vmatpush3.bf16.msra.mxu0 %v9938_v13  ;;  %9948 = vst [vmem:[#allocation30_spill] sm:$0xff] %v8076_v17 }
  0xfe   :  { %6090 = vmatprep.subr.bf16.mxu0 %v9939_v41 }
  0xff   :  { %5960 = vmatpush3.bf16.msra.mxu1 %v9917_v61 }
 0x100   :  { %5962 = vmatprep.subr.bf16.mxu1 %v9918_v37 }
 0x101   :  { %6092 = vmatpush3.bf16.msra.mxu0 %v9939_v41 }
 0x102   :  { %6094 = vmatprep.subr.bf16.mxu0 %v9940_v24 }
 0x103   :  { %5964 = vmatpush3.bf16.msra.mxu1 %v9919_v25 }
 0x104   :  { %5966 = vmatprep.subr.bf16.mxu1 %v9920_v7 }
 0x105   :  { %6096 = vmatpush3.bf16.msra.mxu0 %v9940_v24 }
 0x106   :  { %6098 = vmatprep.subr.bf16.mxu0 %v9941_v35 }
 0x107   :  { %5968 = vmatpush3.bf16.msra.mxu1 %v9921_v33 }
 0x108   :  { %5970 = vmatprep.subr.bf16.mxu1 %v9922_v8 }
 0x109   :  { %6100 = vmatpush3.bf16.msra.mxu0 %v9941_v35 }
 0x10a   :  { %6102 = vmatprep.subr.bf16.mxu0 %v7846_v12 }
 0x10b   :  { %5972 = vmatpush3.bf16.msra.mxu1 %v9923_v28 }
 0x10c   :  { %5332 = vmatmul.mubr.f32.vlgmr.msra.gmra.mrb[8].mxu0 %v9944_v32 }
 0x10d   :  { %6104 = vmatpush3.bf16.msra.mxu0 %v7846_v12  ;;  %5334 = vmatprep.mubr.f32.mxu0 %v1433_v36 }
 0x10e   :  { %1304 = vmatmul.mubr.f32.vlgmr.msra.gmra.mrb[32].mxu1 %v9942_v47  ;;  %6106 = vmatprep.subr.bf16.mxu0 %v7855_v16  ;;  %v192_v47 = vld [vmem:[#allocation8 + $0x38] sm:$0xff] }
 0x10f   :  { %1309 = vmatprep.mubr.f32.mxu1 %v9943_v26 }
 0x110   :  { %5335 = vmatmul.mubr.f32.gmra.mrb[10].mxu0 %v1443_v62 }
 0x111   :  { %6108 = vmatpush3.bf16.msra.mxu0 %v7855_v16  ;;  %5369 = vmatprep.mubr.f32.mxu0 %v9894_v40 }
 0x112   :  { %1311 = vmatmul.mubr.f32.gmra.mrb[34].mxu1 %v9945_v29  ;;  %6110 = vmatprep.subr.bf16.mxu0 %v7861_v56 }
 0x113   :  { %1316 = vmatprep.mubr.f32.mxu1 %v9861_v19 }
 0x115   :  { %6112 = vmatpush3.bf16.msra.mxu0 %v7861_v56 }
 0x116   :  { %1318 = vmatmul.mubr.f32.gmra.mrb[36].mxu1 %v7516_v27  ;;  %6114 = vmatprep.subr.bf16.mxu0 %v7870_v59 }
 0x117   :  { %1323 = vmatprep.mubr.f32.mxu1 %v7482_v53 }
 0x119   :  { %6116 = vmatpush3.bf16.msra.mxu0 %v7870_v59  ;;  %v185_v59 = vld [vmem:[#allocation8] sm:$0xff] }
 0x11a   :  { %1325 = vmatmul.mubr.f32.gmra.mrb[38].mxu1 %v7519_v14  ;;  %6118 = vmatprep.subr.bf16.mxu0 %v7876_v49 }
 0x11b   :  { %5445 = vmatprep.mubr.msk.f32.mxu1 %vm6837_vm6, %v9791_v0 }
 0x11d   :  { %6120 = vmatpush3.bf16.msra.mxu0 %v7876_v49  ;;  %v186_v49 = vld [vmem:[#allocation8 + $0x8] sm:$0xff] }
 0x11e   :  { %6122 = vmatprep.subr.bf16.mxu0 %v7880_v52 }
 0x121   :  { %6124 = vmatpush3.bf16.msra.mxu0 %v7880_v52  ;;  %v187_v52 = vld [vmem:[#allocation8 + $0x10] sm:$0xff] }
 0x122   :  { %6126 = vmatprep.subr.bf16.mxu0 %v7886_v58 }
 0x125   :  { %6128 = vmatpush3.bf16.msra.mxu0 %v7886_v58  ;;  %v9537_v58 = vmov 0.0|0.0  }
 0x126   :  { %6130 = vmatprep.subr.bf16.mxu0 %v7888_v31  ;;  %6165 = vmatprep.subr.bf16.mxu1 %v9537_v58 }
 0x129   :  { %6132 = vmatpush3.bf16.msra.mxu0 %v7888_v31 }
 0x12a   :  { %6134 = vmatprep.subr.bf16.mxu0 %v9924_v50 }
 0x12c   :  { %5370 = vmatmul.mubr.f32.vlgmr.msra.gmra.mrb[8].mxu0 %v9901_v43 }
 0x12d   :  { %6136 = vmatpush3.bf16.msra.mxu0 %v9924_v50  ;;  %5372 = vmatprep.mubr.f32.mxu0 %v7789_v18 }
 0x12e   :  { %6138 = vmatprep.subr.bf16.mxu0 %v9929_v4 }
 0x130   :  { %5373 = vmatmul.mubr.f32.gmra.mrb[10].mxu0 %v7838_v60 }
 0x131   :  { %6140 = vmatpush3.bf16.msra.mxu0 %v9929_v4  ;;  %5407 = vmatprep.mubr.f32.mxu0 %v9894_v40 }
 0x132   :  { %6142 = vmatprep.subr.bf16.mxu0 %v9933_v3 }
 0x135   :  { %6144 = vmatpush3.bf16.msra.mxu0 %v9933_v3 }
 0x136   :  { %6146 = vmatprep.subr.bf16.mxu0 %v9936_v54 }
 0x139   :  { %6148 = vmatpush3.bf16.msra.mxu0 %v9936_v54 }
 0x13a   :  { %6150 = vmatprep.subr.bf16.mxu0 %v9938_v13 }
 0x13d   :  { %6152 = vmatpush3.bf16.msra.mxu0 %v9938_v13 }
 0x13e   :  { %6154 = vmatprep.subr.bf16.mxu0 %v9939_v41 }
 0x141   :  { %6156 = vmatpush3.bf16.msra.mxu0 %v9939_v41 }
 0x142   :  { %6158 = vmatprep.subr.bf16.mxu0 %v9940_v24 }
 0x145   :  { %6160 = vmatpush3.bf16.msra.mxu0 %v9940_v24 }
 0x146   :  { %6162 = vmatprep.subr.bf16.mxu0 %v9941_v35 }
 0x149   :  { %6164 = vmatpush3.bf16.msra.mxu0 %v9941_v35  ;;  %v191_v35 = vld [vmem:[#allocation8 + $0x30] sm:$0xff] }
 0x14a   :  { %v8080_v32 = vpack.c.bf16 %v192_v47, %v191_v35 }
 0x14c   :  { %5408 = vmatmul.mubr.f32.vlgmr.msra.gmra.mrb[8].mxu0 %v9901_v43  ;;  %v4557_v14 = vpop.f32.mrb[0].mxu0  ;;  %9949 = vst [vmem:[#allocation31_spill] sm:$0xff] %v8080_v32 }
 0x14d   :  { %5410 = vmatprep.mubr.f32.mxu0 %v7789_v18  ;;  %v4558_v53 = vpop.f32.mrb[1].mxu0  ;;  %v8064_v18 = vpack.c.bf16 %v186_v49, %v185_v59  ;;  %v195_v49 = vld [vmem:[#allocation8 + $0x50] sm:$0xff] }
 0x14e   :  { %v8059_v27 = vadd.f32 %v4558_v53, %v4557_v14 }
 0x14f   :  { %9946 = vst [vmem:[#allocation26_spill] sm:$0xff] %v8064_v18  ;;  %6167 = vmatpush3.bf16.msra.mxu1 %v8064_v18 }
 0x150   :  { %5411 = vmatmul.mubr.f32.gmra.mrb[10].mxu0 %v7838_v60  ;;  %v188_v60 = vld [vmem:[#allocation8 + $0x18] sm:$0xff]  ;;  %6168 = vmatprep.subr.bf16.mxu1 %v9537_v58 }
 0x151   :  { %v8067_v34 = vpack.c.bf16 %v188_v60, %v187_v52  ;;  %v196_v52 = vld [vmem:[#allocation8 + $0x58] sm:$0xff] }
 0x152   :  { %v8088_v60 = vpack.c.bf16 %v196_v52, %v195_v49 }
 0x153   :  { %9947 = vst [vmem:[#allocation28_spill] sm:$0xff] %v8067_v34  ;;  %6170 = vmatpush3.bf16.msra.mxu1 %v8067_v34 }
 0x154   :  { %6171 = vmatprep.subr.bf16.mxu1 %v9537_v58  ;;  %9951 = vst [vmem:[#allocation34_spill] sm:$0xff] %v8088_v60 }
 0x156   :  { %v4381_v19 = vpop.f32.mrb[0].mxu1 }
 0x157   :  { %v4382_v38 = vpop.f32.mrb[1].mxu1  ;;  %6173 = vmatpush3.bf16.msra.mxu1 %v8076_v17 }
 0x158   :  { %v4383_v36 = vadd.f32 %v4382_v38, %v4381_v19  ;;  %6174 = vmatprep.subr.bf16.mxu1 %v9537_v58  ;;  %v193_v19 = vld [vmem:[#allocation8 + $0x40] sm:$0xff]  ;;  %v194_v38 = vld [vmem:[#allocation8 + $0x48] sm:$0xff] }
 0x15b   :  { %6176 = vmatpush3.bf16.msra.mxu1 %v8080_v32 }
 0x15c   :  { %6177 = vmatprep.subr.bf16.mxu1 %v9537_v58 }
 0x15e   :  { %v4560_v12 = vpop.f32.mrb[2].mxu0 }
 0x15f   :  { %v4561_v15 = vpop.f32.mrb[3].mxu0 }
 0x160   :  { %v8061_v16 = vadd.f32 %v4561_v15, %v4560_v12  ;;  %v8084_v12 = vpack.c.bf16 %v194_v38, %v193_v19 }
 0x162   :  { %9950 = vst [vmem:[#allocation32_spill] sm:$0xff] %v8084_v12  ;;  %6179 = vmatpush3.bf16.msra.mxu1 %v8084_v12 }
 0x163   :  { %6180 = vmatprep.subr.bf16.mxu1 %v9537_v58 }
 0x166   :  { %6182 = vmatpush3.bf16.msra.mxu1 %v8088_v60 }
 0x167   :  { %6183 = vmatprep.subr.bf16.mxu1 %v9537_v58 }
 0x168   :  { %v4384_v56 = vpop.f32.mrb[2].mxu1  ;;  %v4563_v31 = vpop.f32.mrb[4].mxu0 }
 0x169   :  { %v4385_v62 = vpop.f32.mrb[3].mxu1  ;;  %v4564_v43 = vpop.f32.mrb[5].mxu0 }
 0x16a   :  { %v4386_v40 = vadd.f32 %v4385_v62, %v4384_v56  ;;  %v8069_v11 = vadd.f32 %v4564_v43, %v4563_v31  ;;  %v198_v43 = vld [vmem:[#allocation8 + $0x68] sm:$0xff] }
 0x16d   :  { %v4566_v45 = vpop.f32.mrb[6].mxu0 }
 0x16e   :  { %v4567_v9 = vpop.f32.mrb[7].mxu0 }
 0x16f   :  { %v8073_v63 = vadd.f32 %v4567_v9, %v4566_v45  ;;  %v199_v9 = vld [vmem:[#allocation8 + $0x70] sm:$0xff] }
 0x171   :  { %v4387_v39 = vpop.f32.mrb[4].mxu1 }
 0x172   :  { %v4388_v21 = vpop.f32.mrb[5].mxu1 }
 0x173   :  { %v4389_v30 = vadd.f32 %v4388_v21, %v4387_v39  ;;  %v200_v39 = vld [vmem:[#allocation8 + $0x78] sm:$0xff] }
 0x174   :  { %v8096_v21 = vpack.c.bf16 %v200_v39, %v199_v9 }
 0x175   :  { %v4390_v5 = vpop.f32.mrb[6].mxu1 }
 0x176   :  { %v4391_v6 = vpop.f32.mrb[7].mxu1  ;;  %9953 = vst [vmem:[#allocation59_spill] sm:$0xff] %v8096_v21 }
 0x177   :  { %v4392_v61 = vadd.f32 %v4391_v6, %v4390_v5 }
 0x17a   :  { %v4425_v37 = vpop.f32.mrb[8].mxu1 }
 0x17b   :  { %v4426_v44 = vpop.f32.mrb[9].mxu1 }
 0x17c   :  { %v4427_v25 = vadd.f32 %v4426_v44, %v4425_v37 }
 0x17e   :  { %v686_v7 = vadd.f32 %v4427_v25, %v4383_v36 }
 0x181   :  { %v4428_v46 = vpop.f32.mrb[10].mxu1 }
 0x182   :  { %v4429_v33 = vpop.f32.mrb[11].mxu1 }
 0x183   :  { %v4430_v8 = vadd.f32 %v4429_v33, %v4428_v46 }
 0x185   :  { %v693_v28 = vadd.f32 %v4430_v8, %v4386_v40  ;;  %v4431_v50 = vpop.f32.mrb[12].mxu1  ;;  %v197_v40 = vld [vmem:[#allocation8 + $0x60] sm:$0xff] }
 0x186   :  { %v4432_v23 = vpop.f32.mrb[13].mxu1  ;;  %v8092_v45 = vpack.c.bf16 %v198_v43, %v197_v40 }
 0x187   :  { %v4433_v55 = vadd.f32 %v4432_v23, %v4431_v50 }
 0x188   :  { %9952 = vst [vmem:[#allocation36_spill] sm:$0xff] %v8092_v45  ;;  %6185 = vmatpush3.bf16.msra.mxu1 %v8092_v45 }
 0x189   :  { %v700_v22 = vadd.f32 %v4433_v55, %v4389_v30  ;;  %v4434_v2 = vpop.f32.mrb[14].mxu1  ;;  %6186 = vmatprep.subr.bf16.mxu1 %v9537_v58 }
 0x18a   :  { %v4435_v4 = vpop.f32.mrb[15].mxu1 }
 0x18b   :  { %v4436_v48 = vadd.f32 %v4435_v4, %v4434_v2 }
 0x18c   :  { %6188 = vmatpush3.bf16.msra.mxu1 %v8096_v21 }
 0x18d   :  { %v707_v42 = vadd.f32 %v4436_v48, %v4392_v61  ;;  %6189 = vmatprep.subr.bf16.mxu1 %v9537_v58 }
 0x1a1   :  { %v4469_v57 = vpop.f32.mrb[16].mxu1 }
 0x1a2   :  { %v4470_v3 = vpop.f32.mrb[17].mxu1 }
 0x1a3   :  { %v4471_v54 = vadd.f32 %v4470_v3, %v4469_v57 }
 0x1a5   :  { %v845_v13 = vadd.f32 %v4471_v54, %v686_v7  ;;  %v4472_v41 = vpop.f32.mrb[18].mxu1 }
 0x1a6   :  { %v4473_v24 = vpop.f32.mrb[19].mxu1 }
 0x1a7   :  { %v4474_v26 = vadd.f32 %v4473_v24, %v4472_v41 }
 0x1a9   :  { %v854_v29 = vadd.f32 %v4474_v26, %v693_v28  ;;  %v4475_v14 = vpop.f32.mrb[20].mxu1 }
 0x1aa   :  { %v4476_v53 = vpop.f32.mrb[21].mxu1 }
 0x1ab   :  { %v4477_v36 = vadd.f32 %v4476_v53, %v4475_v14 }
 0x1ad   :  { %v863_v15 = vadd.f32 %v4477_v36, %v700_v22  ;;  %v4478_v56 = vpop.f32.mrb[22].mxu1 }
 0x1ae   :  { %v4479_v59 = vpop.f32.mrb[23].mxu1 }
 0x1af   :  { %v4480_v62 = vadd.f32 %v4479_v59, %v4478_v56 }
 0x1b1   :  { %v872_v31 = vadd.f32 %v4480_v62, %v707_v42 }
 0x1c1   :  { %v4513_v30 = vpop.f32.mrb[24].mxu1 }
 0x1c2   :  { %v4514_v5 = vpop.f32.mrb[25].mxu1 }
 0x1c3   :  { %v4515_v6 = vadd.f32 %v4514_v5, %v4513_v30 }
 0x1c5   :  { %v980_v61 = vadd.f32 %v4515_v6, %v845_v13  ;;  %v4516_v37 = vpop.f32.mrb[26].mxu1 }
 0x1c6   :  { %v4517_v44 = vpop.f32.mrb[27].mxu1 }
 0x1c7   :  { %v4518_v25 = vadd.f32 %v4517_v44, %v4516_v37  ;;  %v1181_v7 = vadd.f32 %v8059_v27, %v980_v61 }
 0x1c9   :  { %v991_v46 = vadd.f32 %v4518_v25, %v854_v29  ;;  %v4519_v33 = vpop.f32.mrb[28].mxu1 }
 0x1ca   :  { %v4520_v8 = vpop.f32.mrb[29].mxu1 }
 0x1cb   :  { %v4521_v28 = vadd.f32 %v4520_v8, %v4519_v33  ;;  %v1188_v50 = vadd.f32 %v8061_v16, %v991_v46 }
 0x1cd   :  { %v1002_v23 = vadd.f32 %v4521_v28, %v863_v15  ;;  %v4522_v55 = vpop.f32.mrb[30].mxu1 }
 0x1ce   :  { %v4523_v22 = vpop.f32.mrb[31].mxu1 }
 0x1cf   :  { %v4524_v2 = vadd.f32 %v4523_v22, %v4522_v55  ;;  %v1195_v4 = vadd.f32 %v8069_v11, %v1002_v23  ;;  %v8143_v55 = vld [vmem:[#allocation7 + $0x80] sm:$0xff]  ;;  %v8145_v22 = vld [vmem:[#allocation7 + $0x88] sm:$0xff] }
 0x1d1   :  { %v1013_v48 = vadd.f32 %v4524_v2, %v872_v31  ;;  %v2371_v2 = vand.u32 4294901760, %v8143_v55 }
 0x1d3   :  { %v1202_v42 = vadd.f32 %v8073_v63, %v1013_v48  ;;  %v8149_v48 = vld [vmem:[#allocation7] sm:$0xff] }
 0x1e1   :  { %v4601_v57 = vpop.f32.mrb[32].mxu1 }
 0x1e2   :  { %v4602_v3 = vpop.f32.mrb[33].mxu1 }
 0x1e3   :  { %v4603_v20 = vadd.f32 %v4602_v3, %v4601_v57  ;;  %v2323_v57 = vand.u32 4294901760, %v8149_v48 }
 0x1e5   :  { %v4604_v51 = vpop.f32.mrb[34].mxu1  ;;  %v1306_v27 = vadd.f32 %v4603_v20, %v1181_v7  ;;  %v8156_v20 = vsub.f32 %v8143_v55, %v2371_v2  ;;  %v8255_v55 = vld [vmem:[#allocation7 + $0xb0] sm:$0xff] }
 0x1e6   :  { %v4605_v54 = vpop.f32.mrb[35].mxu1 }
 0x1e7   :  { %v4606_v13 = vadd.f32 %v4605_v54, %v4604_v51 }
 0x1e9   :  { %v4607_v41 = vpop.f32.mrb[36].mxu1  ;;  %v1313_v24 = vadd.f32 %v4606_v13, %v1188_v50  ;;  %v8167_v13 = vld [vmem:[#allocation7 + $0x90] sm:$0xff] }
 0x1ea   :  { %v4608_v35 = vpop.f32.mrb[37].mxu1 }
 0x1eb   :  { %v4609_v16 = vadd.f32 %v4608_v35, %v4607_v41  ;;  %v8169_v41 = vld [vmem:[#allocation7 + $0x98] sm:$0xff] }
 0x1ed   :  { %v4610_v47 = vpop.f32.mrb[38].mxu1  ;;  %v1320_v26 = vadd.f32 %v4609_v16, %v1195_v4  ;;  %v2374_v4 = vand.u32 4294901760, %v8145_v22  ;;  %v2377_v16 = vand.u32 4294901760, %v8167_v13 }
 0x1ee   :  { %v4611_v29 = vpop.f32.mrb[39].mxu1 }
 0x1ef   :  { %v4612_v14 = vadd.f32 %v4611_v29, %v4610_v47  ;;  %v8159_v51 = vsub.f32 %v8145_v22, %v2374_v4  ;;  %v2380_v47 = vand.u32 4294901760, %v8169_v41  ;;  %v8177_v29 = vld [vmem:[#allocation7 + $0x18] sm:$0xff] }
 0x1f0   :  { %v8257_v22 = vld [vmem:[#allocation7 + $0xb8] sm:$0xff] }
 0x1f1   :  { %v1327_v53 = vadd.f32 %v4612_v14, %v1202_v42  ;;  %v8151_v42 = vld [vmem:[#allocation7 + $0x8] sm:$0xff]  ;;  %v9545_v35 = vand.u32 4294901760, %v8159_v51 }
 0x1f2   :  { %v2326_v3 = vand.u32 4294901760, %v8151_v42 }
 0x1f4   :  { %v8165_v54 = vsub.f32 %v8151_v42, %v2326_v3 }
 0x21f   :  { %v5409_v11 = vpop.f32.mrb[8].mxu0 }
 0x220   :  { %v8106_v19 = vadd.f32 %v5409_v11, %v1313_v24  ;;  %v2078_v63 = vpop.f32.mrb[9].mxu0  ;;  %v9546_v24 = vand.u32 4294901760, %v8156_v20 }
 0x221   :  { %v8108_v38 = vadd.f32 %v2078_v63, %v1306_v27  ;;  %v8162_v27 = vsub.f32 %v8149_v48, %v2323_v57  ;;  %v2332_v63 = vand.u32 4294901760, %v8177_v29 }
 0x222   :  { %v2110_v39 = vmul.f32 %v8106_v19, %v8106_v19 }
 0x223   :  { %v5412_v36 = vpop.f32.mrb[10].mxu0  ;;  %v2100_v59 = vadd.f32 %v8108_v38, %v8106_v19  ;;  %v2109_v30 = vmul.f32 %v8108_v38, %v8108_v38  ;;  %v9544_v14 = vand.u32 4294901760, %v8162_v27 }
 0x224   :  { %v8110_v15 = vadd.f32 %v5412_v36, %v1327_v53  ;;  %v2090_v56 = vpop.f32.mrb[11].mxu0  ;;  %v9543_v53 = vand.u32 4294901760, %v8165_v54  ;;  %v6341_v36 = vpack.c.bf16 %v9545_v35, %v9546_v24  ;;  %v8287_v24 = vpack.c.bf16 %v2326_v3, %v2323_v57 }
 0x225   :  { %v8114_v49 = vadd.f32 %v2090_v56, %v1320_v26  ;;  %v2113_v37 = vadd.f32 %v2110_v39, %v2109_v30  ;;  %v8175_v26 = vld [vmem:[#allocation7 + $0x10] sm:$0xff]  ;;  %v8190_v56 = vsub.f32 %v8167_v13, %v2377_v16 }
 0x226   :  { %v2112_v25 = vmul.f32 %v8110_v15, %v8110_v15  ;;  %v2329_v11 = vand.u32 4294901760, %v8175_v26  ;;  %6342 = vmatprep.subr.bf16.mxu0 %v6341_v36  ;;  %v9553_v36 = vand.u32 4294901760, %v8255_v55  ;;  %9963 = vst [vmem:[#allocation53_spill] sm:$0xff] %v8287_v24 }
 0x227   :  { %v2101_v52 = vadd.f32 %v8114_v49, %v2100_v59  ;;  %v2111_v6 = vmul.f32 %v8114_v49, %v8114_v49  ;;  %v8195_v59 = vsub.f32 %v8169_v41, %v2380_v47 }
 0x228   :  { %v8280_v35 = vsub.f32 %v8255_v55, %v9553_v36  ;;  %v8314_v36 = vld [vmem:[#allocation7 + $0x48] sm:$0xff]  ;;  %v8345_v13 = vpack.c.bf16 %v2332_v63, %v2329_v11 }
 0x229   :  { %v2102_v62 = vadd.f32 %v8110_v15, %v2101_v52  ;;  %v2114_v44 = vadd.f32 %v2113_v37, %v2111_v6  ;;  %v6343_v52 = vpack.c.bf16 %v9543_v53, %v9544_v14  ;;  %v9541_v39 = vand.u32 4294901760, %v8195_v59  ;;  %v8219_v6 = vld [vmem:[#allocation7 + $0x20] sm:$0xff] }
 0x22a   :  { %v8271_v53 = vpack.c.bf16 %v2374_v4, %v2371_v2  ;;  %9961 = vst [vmem:[#allocation65_spill] sm:$0xff] %v8280_v35  ;;  %v9560_v57 = vand.u32 4294901760, %v8280_v35  ;;  %9969 = vst [vmem:[#allocation17_spill] sm:$0xff] %v8345_v13 }
 0x22b   :  { %v2103_v31 = vrot.slane %v2102_v62, 4  ;;  %v2115_v7 = vadd.f32 %v2114_v44, %v2112_v25  ;;  %6344 = vmatpush3.bf16.msra.mxu0 %v6343_v52  ;;  %v9556_v25 = vand.u32 4294901760, %v8219_v6  ;;  %v9549_v52 = vand.u32 4294901760, %v8257_v22 }
 0x22c   :  { %9960 = vst [vmem:[#allocation52_spill] sm:$0xff] %v8271_v53 }
 0x22d   :  { %v2104_v40 = vadd.f32 %v2103_v31, %v2102_v62  ;;  %v2116_v46 = vrot.slane %v2115_v7, 4  ;;  %v8204_v62 = vsub.f32 %v8175_v26, %v2329_v11  ;;  %v8209_v31 = vsub.f32 %v8177_v29, %v2332_v63 }
 0x22f   :  { %v2105_v43 = vrot.slane %v2104_v40, 2  ;;  %v2117_v33 = vadd.f32 %v2116_v46, %v2115_v7  ;;  %9954 = vst [vmem:[#allocation60_spill] sm:$0xff] %v8204_v62  ;;  %9955 = vst [vmem:[#allocation37_spill] sm:$0xff] %v8209_v31  ;;  %v9540_v37 = vand.u32 4294901760, %v8204_v62  ;;  %v9539_v44 = vand.u32 4294901760, %v8209_v31 }
 0x231   :  { %v2106_v9 = vadd.f32 %v2105_v43, %v2104_v40  ;;  %v2118_v8 = vrot.slane %v2117_v33, 2  ;;  %v8211_v40 = vld [vmem:[#allocation7 + $0xa0] sm:$0xff]  ;;  %v8213_v43 = vld [vmem:[#allocation7 + $0xa8] sm:$0xff] }
 0x232   :  { %v9558_v30 = vand.u32 4294901760, %v8211_v40  ;;  %v9973_v26 = vand.u32 4294901760, %v8211_v40  ;;  %v9974_v29 = vand.u32 4294901760, %v8213_v43 }
 0x233   :  { %v2107_v5 = vrot.slane %v2106_v9, 1  ;;  %v2119_v28 = vadd.f32 %v2118_v8, %v2117_v33 }
 0x234   :  { %v8234_v33 = vsub.f32 %v8211_v40, %v9558_v30 }
 0x235   :  { %v2108_v61 = vadd.f32 %v2107_v5, %v2106_v9  ;;  %v2120_v50 = vrot.slane %v2119_v28, 1  ;;  %v9542_v9 = vand.u32 4294901760, %v8190_v56  ;;  %v9557_v5 = vand.u32 4294901760, %v8213_v43 }
 0x236   :  { %9956 = vst [vmem:[#allocation39_spill] sm:$0xff] %v8234_v33  ;;  %v9548_v48 = vand.u32 4294901760, %v8234_v33 }
 0x237   :  { %5446 = vmatmul.mubr.f32.vlgmr.msra.gmra.mrb[40].mxu1 %v2108_v61  ;;  %v2121_v23 = vadd.f32 %v2120_v50, %v2119_v28  ;;  %v8221_v61 = vld [vmem:[#allocation7 + $0x28] sm:$0xff]  ;;  %v6345_v46 = vpack.c.bf16 %v9541_v39, %v9542_v9  ;;  %v8239_v8 = vsub.f32 %v8213_v43, %v9557_v5  ;;  %v6347_v28 = vpack.c.bf16 %v9539_v44, %v9540_v37  ;;  %v8265_v44 = vld [vmem:[#allocation7 + $0x38] sm:$0xff] }
 0x238   :  { %6191 = vmatpush3.bf16.msra.mxu1 %v8064_v18  ;;  %5480 = vmatprep.mubr.msk.f32.mxu1 %vm6837_vm6, %v9791_v0  ;;  %v9555_v7 = vand.u32 4294901760, %v8221_v61  ;;  %v8248_v50 = vsub.f32 %v8219_v6, %v9556_v25  ;;  %v2350_v25 = vand.u32 4294901760, %v8314_v36  ;;  %v8325_v5 = vpack.c.bf16 %v2380_v47, %v2377_v16 }
 0x239   :  { %6192 = vmatprep.subr.bf16.mxu1 %v9537_v58  ;;  %9957 = vst [vmem:[#allocation41_spill] sm:$0xff] %v8239_v8  ;;  %6346 = vmatprep.subr.bf16.mxu0 %v6345_v46  ;;  %v9547_v42 = vand.u32 4294901760, %v8239_v8  ;;  %v9554_v46 = vand.u32 4294901760, %v8265_v44 }
 0x23a   :  { %9958 = vst [vmem:[#allocation42_spill] sm:$0xff] %v8248_v50  ;;  %6348 = vmatpush3.bf16.msra.mxu0 %v6347_v28  ;;  %v9551_v37 = vand.u32 4294901760, %v8248_v50  ;;  %v8285_v28 = vsub.f32 %v8257_v22, %v9549_v52  ;;  %v8305_v52 = vld [vmem:[#allocation7 + $0xc8] sm:$0xff]  ;;  %9966 = vst [vmem:[#allocation76_spill] sm:$0xff] %v8325_v5 }
 0x23b   :  { %v6349_v14 = vpack.c.bf16 %v9547_v42, %v9548_v48  ;;  %v8301_v42 = vsub.f32 %v8265_v44, %v9554_v46  ;;  %v8303_v48 = vld [vmem:[#allocation7 + $0xc0] sm:$0xff] }
 0x23c   :  { %6194 = vmatpush3.bf16.msra.mxu1 %v8067_v34  ;;  %9962 = vst [vmem:[#allocation16_spill] sm:$0xff] %v8285_v28  ;;  %v9559_v3 = vand.u32 4294901760, %v8285_v28  ;;  %v9989_v34 = vand.u32 4294901760, %v8255_v55 }
 0x23d   :  { %6195 = vmatprep.subr.bf16.mxu1 %v9537_v58  ;;  %9965 = vst [vmem:[#allocation43_spill] sm:$0xff] %v8301_v42  ;;  %6350 = vmatprep.subr.bf16.mxu0 %v6349_v14  ;;  %v9970_v41 = vand.u32 4294901760, %v8301_v42 }
 0x23e   :  { %v6353_v30 = vpack.c.bf16 %v9559_v3, %v9560_v57  ;;  %v8355_v3 = vsub.f32 %v8314_v36, %v2350_v25  ;;  %v163_v57 = vld [vmem:[#allocation7 + $0xd0] sm:$0xff]  ;;  %v9980_v36 = vand.u32 4294901760, %v8219_v6  ;;  %v165_v6 = vld [vmem:[#allocation7 + $0xe0] sm:$0xff] }
 0x23f   :  { %v2401_v11 = vand.u32 4294901760, %v163_v57 }
 0x240   :  { %6197 = vmatpush3.bf16.msra.mxu1 %v8076_v17  ;;  %9972 = vst [vmem:[#allocation18_spill] sm:$0xff] %v8355_v3  ;;  %v9984_v43 = vand.u32 4294901760, %v8355_v3 }
 0x241   :  { %6198 = vmatprep.subr.bf16.mxu1 %v9537_v58 }
 0x244   :  { %6200 = vmatpush3.bf16.msra.mxu1 %v8080_v32 }
 0x245   :  { %6201 = vmatprep.subr.bf16.mxu1 %v9537_v58 }
 0x248   :  { %6203 = vmatpush3.bf16.msra.mxu1 %v8084_v12 }
 0x249   :  { %6204 = vmatprep.subr.bf16.mxu1 %v9537_v58 }
 0x24c   :  { %6206 = vmatpush3.bf16.msra.mxu1 %v8088_v60 }
 0x24d   :  { %6207 = vmatprep.subr.bf16.mxu1 %v9537_v58 }
 0x250   :  { %6209 = vmatpush3.bf16.msra.mxu1 %v8092_v45 }
 0x251   :  { %6210 = vmatprep.subr.bf16.mxu1 %v9537_v58  ;;  %v8263_v58 = vld [vmem:[#allocation7 + $0x30] sm:$0xff] }
 0x252   :  { %v9552_v9 = vand.u32 4294901760, %v8263_v58 }
 0x254   :  { %6212 = vmatpush3.bf16.msra.mxu1 %v8096_v21  ;;  %v8296_v4 = vsub.f32 %v8263_v58, %v9552_v9  ;;  %v8312_v9 = vld [vmem:[#allocation7 + $0x40] sm:$0xff]  ;;  %v8373_v21 = vpack.c.bf16 %v9974_v29, %v9973_v26 }
 0x255   :  { %6214 = vmatprep.subr.bf16.mxu1 %v8271_v53  ;;  %v2347_v14 = vand.u32 4294901760, %v8312_v9 }
 0x256   :  { %9964 = vst [vmem:[#allocation45_spill] sm:$0xff] %v8296_v4  ;;  %v9563_v46 = vand.u32 4294901760, %v8296_v4  ;;  %9975 = vst [vmem:[#allocation23_spill] sm:$0xff] %v8373_v21 }
 0x257   :  { %5481 = vmatmul.mubr.f32.vlgmr.msra.gmra.mrb[42].mxu1 %v2121_v23  ;;  %v8253_v23 = vsub.f32 %v8221_v61, %v9555_v7  ;;  %v8352_v47 = vsub.f32 %v8312_v9, %v2347_v14 }
 0x258   :  { %6216 = vmatpush3.bf16.msra.mxu1 %v8287_v24  ;;  %v6355_v16 = vpack.c.bf16 %v9970_v41, %v9563_v46  ;;  %v8362_v41 = vld [vmem:[#allocation7 + $0x58] sm:$0xff]  ;;  %v9981_v46 = vand.u32 4294901760, %v8221_v61 }
 0x259   :  { %9959 = vst [vmem:[#allocation50_spill] sm:$0xff] %v8253_v23  ;;  %v9550_v39 = vand.u32 4294901760, %v8253_v23  ;;  %9971 = vst [vmem:[#allocation56_spill] sm:$0xff] %v8352_v47  ;;  %6218 = vmatprep.subr.bf16.mxu1 %v8325_v5  ;;  %v9983_v40 = vand.u32 4294901760, %v8352_v47  ;;  %v10002_v5 = vand.u32 4294901760, %v8305_v52 }
 0x25b   :  { %v6351_v2 = vpack.c.bf16 %v9550_v39, %v9551_v37  ;;  %v9562_v39 = vand.u32 4294901760, %v8303_v48  ;;  %v9561_v37 = vand.u32 4294901760, %v8305_v52  ;;  %v6359_v26 = vpack.c.bf16 %v9984_v43, %v9983_v40  ;;  %v149_v40 = vld [vmem:[#allocation7 + $0x60] sm:$0xff]  ;;  %v150_v43 = vld [vmem:[#allocation7 + $0x68] sm:$0xff] }
 0x25c   :  { %6220 = vmatpush3.bf16.msra.mxu1 %v8345_v13  ;;  %v2359_v32 = vand.u32 4294901760, %v149_v40  ;;  %v2362_v17 = vand.u32 4294901760, %v150_v43 }
 0x25d   :  { %6352 = vmatpush3.bf16.msra.mxu0 %v6351_v2  ;;  %v8334_v2 = vsub.f32 %v8303_v48, %v9562_v39  ;;  %v8339_v7 = vsub.f32 %v8305_v52, %v9561_v37  ;;  %v164_v37 = vld [vmem:[#allocation7 + $0xd8] sm:$0xff]  ;;  %v8360_v39 = vld [vmem:[#allocation7 + $0x50] sm:$0xff]  ;;  %6222 = vmatprep.subr.bf16.mxu1 %v8373_v21 }
 0x25e   :  { %6354 = vmatprep.subr.bf16.mxu0 %v6353_v30  ;;  %v2404_v63 = vand.u32 4294901760, %v164_v37  ;;  %v8387_v30 = vpack.c.bf16 %v9981_v46, %v9980_v36  ;;  %v9985_v29 = vand.u32 4294901760, %v8360_v39 }
 0x25f   :  { %9967 = vst [vmem:[#allocation48_spill] sm:$0xff] %v8334_v2  ;;  %9968 = vst [vmem:[#allocation47_spill] sm:$0xff] %v8339_v7  ;;  %v9976_v45 = vand.u32 4294901760, %v8334_v2  ;;  %v9977_v60 = vand.u32 4294901760, %v8339_v7 }
 0x260   :  { %v8381_v9 = vsub.f32 %v164_v37, %v2404_v63  ;;  %9982 = vst [vmem:[#allocation68_spill] sm:$0xff] %v8387_v30  ;;  %v8396_v0 = vsub.f32 %v8360_v39, %v9985_v29  ;;  %v166_v37 = vld [vmem:[#allocation7 + $0xe8] sm:$0xff]  ;;  %6224 = vmatpush3.bf16.msra.mxu1 %v8387_v30  ;;  %v9996_v29 = vand.u32 4294901760, %v8263_v58 }
 0x261   :  { %6356 = vmatpush3.bf16.msra.mxu0 %v6355_v16  ;;  %v6357_v12 = vpack.c.bf16 %v9977_v60, %v9976_v45  ;;  %v8379_v16 = vsub.f32 %v163_v57, %v2401_v11  ;;  %v9987_v60 = vand.u32 4294901760, %v8362_v41  ;;  %v2407_v57 = vand.u32 4294901760, %v165_v6 }
 0x262   :  { %9979 = vst [vmem:[#allocation63_spill] sm:$0xff] %v8381_v9  ;;  %9986 = vst [vmem:[#allocation20_spill] sm:$0xff] %v8396_v0  ;;  %v2410_v36 = vand.u32 4294901760, %v166_v37  ;;  %v9993_v18 = vand.u32 4294901760, %v8381_v9  ;;  %v9999_v55 = vand.u32 4294901760, %v8396_v0 }
 0x263   :  { %9978 = vst [vmem:[#allocation19_spill] sm:$0xff] %v8379_v16  ;;  %v8401_v45 = vsub.f32 %v8362_v41, %v9987_v60  ;;  %6358 = vmatprep.subr.bf16.mxu0 %v6357_v12  ;;  %v9990_v12 = vand.u32 4294901760, %v8257_v22  ;;  %v9992_v46 = vand.u32 4294901760, %v8379_v16  ;;  %v8419_v13 = vsub.f32 %v165_v6, %v2407_v57 }
 0x264   :  { %v9997_v60 = vand.u32 4294901760, %v8265_v44  ;;  %v8439_v6 = vpack.c.bf16 %v2350_v25, %v2347_v14 }
 0x265   :  { %9988 = vst [vmem:[#allocation67_spill] sm:$0xff] %v8401_v45  ;;  %6360 = vmatpush3.bf16.msra.mxu0 %v6359_v26  ;;  %v8413_v61 = vpack.c.bf16 %v9990_v12, %v9989_v34  ;;  %v6361_v21 = vpack.c.bf16 %v9993_v18, %v9992_v46  ;;  %9994 = vst [vmem:[#allocation73_spill] sm:$0xff] %v8419_v13  ;;  %v8421_v26 = vsub.f32 %v166_v37, %v2410_v36  ;;  %v167_v37 = vld [vmem:[#allocation7 + $0xf0] sm:$0xff]  ;;  %v168_v46 = vld [vmem:[#allocation7 + $0xf8] sm:$0xff] }
 0x266   :  { %v8427_v30 = vpack.c.bf16 %v9997_v60, %v9996_v29  ;;  %v10000_v34 = vand.u32 4294901760, %v8401_v45  ;;  %v10001_v12 = vand.u32 4294901760, %v8303_v48  ;;  %10004 = vst [vmem:[#allocation24_spill] sm:$0xff] %v8439_v6  ;;  %v9592_v58 = vand.u32 4294901760, %v8419_v13  ;;  %v151_v48 = vld [vmem:[#allocation7 + $0x70] sm:$0xff] }
 0x267   :  { %9991 = vst [vmem:[#allocation21_spill] sm:$0xff] %v8413_v61  ;;  %9995 = vst [vmem:[#allocation78_spill] sm:$0xff] %v8421_v26  ;;  %6226 = vmatprep.subr.bf16.mxu1 %v8413_v61  ;;  %6362 = vmatprep.subr.bf16.mxu0 %v6361_v21  ;;  %v9591_v44 = vand.u32 4294901760, %v8421_v26  ;;  %v8444_v29 = vsub.f32 %v149_v40, %v2359_v32  ;;  %v8446_v60 = vsub.f32 %v150_v43, %v2362_v17 }
 0x268   :  { %9998 = vst [vmem:[#allocation22_spill] sm:$0xff] %v8427_v30  ;;  %v6363_v22 = vpack.c.bf16 %v10000_v34, %v9999_v55  ;;  %v8437_v18 = vpack.c.bf16 %v10002_v5, %v10001_v12  ;;  %v152_v55 = vld [vmem:[#allocation7 + $0x78] sm:$0xff]  ;;  %6228 = vmatpush3.bf16.msra.mxu1 %v8427_v30  ;;  %v8449_v5 = vpack.c.bf16 %v2404_v63, %v2401_v11  ;;  %v2413_v25 = vand.u32 4294901760, %v167_v37 }
 0x269   :  { %10005 = vst [vmem:[#allocation74_spill] sm:$0xff] %v8444_v29  ;;  %10006 = vst [vmem:[#allocation27_spill] sm:$0xff] %v8446_v60  ;;  %v2416_v52 = vand.u32 4294901760, %v168_v46  ;;  %v2365_v14 = vand.u32 4294901760, %v151_v48  ;;  %v6365_v21 = vpack.c.bf16 %v9591_v44, %v9592_v58  ;;  %v9594_v40 = vand.u32 4294901760, %v8444_v29 }
 0x26a   :  { %10003 = vst [vmem:[#allocation71_spill] sm:$0xff] %v8437_v18  ;;  %6364 = vmatpush3.bf16.msra.mxu0 %v6363_v22  ;;  %10007 = vst [vmem:[#allocation29_spill] sm:$0xff] %v8449_v5  ;;  %6230 = vmatprep.subr.bf16.mxu1 %v8437_v18  ;;  %v9593_v43 = vand.u32 4294901760, %v8446_v60  ;;  %v2368_v34 = vand.u32 4294901760, %v152_v55  ;;  %v8458_v12 = vsub.f32 %v167_v37, %v2413_v25 }
 0x26b   :  { %v8460_v22 = vsub.f32 %v168_v46, %v2416_v52  ;;  %v8462_v11 = vsub.f32 %v151_v48, %v2365_v14  ;;  %6366 = vmatprep.subr.bf16.mxu0 %v6365_v21  ;;  %v10013_v21 = vand.u32 4294901760, %v8362_v41 }
 0x26c   :  { %10008 = vst [vmem:[#allocation33_spill] sm:$0xff] %v8458_v12  ;;  %v6367_v63 = vpack.c.bf16 %v9593_v43, %v9594_v40  ;;  %v8468_v18 = vsub.f32 %v152_v55, %v2368_v34  ;;  %6232 = vmatpush3.bf16.msra.mxu1 %v8439_v6  ;;  %v9604_v44 = vand.u32 4294901760, %v8458_v12  ;;  %v10012_v55 = vand.u32 4294901760, %v8360_v39  ;;  %v8488_v6 = vld [vmem:[#allocation7 + $0x100] sm:$0xff] }
 0x26d   :  { %10009 = vst [vmem:[#allocation35_spill] sm:$0xff] %v8460_v22  ;;  %10010 = vst [vmem:[#allocation38_spill] sm:$0xff] %v8462_v11  ;;  %v9601_v58 = vand.u32 4294901760, %v8460_v22  ;;  %v9603_v37 = vand.u32 4294901760, %v8462_v11  ;;  %6234 = vmatprep.subr.bf16.mxu1 %v8449_v5  ;;  %v8486_v40 = vpack.c.bf16 %v2410_v36, %v2407_v57  ;;  %v9606_v30 = vand.u32 4294901760, %v8488_v6 }
 0x26e   :  { %10011 = vst [vmem:[#allocation40_spill] sm:$0xff] %v8468_v18  ;;  %6368 = vmatpush3.bf16.msra.mxu0 %v6367_v63  ;;  %v9602_v46 = vand.u32 4294901760, %v8468_v18  ;;  %v8484_v43 = vpack.c.bf16 %v10013_v21, %v10012_v55  ;;  %v8490_v63 = vld [vmem:[#allocation7 + $0x108] sm:$0xff]  ;;  %v8499_v39 = vpack.c.bf16 %v2362_v17, %v2359_v32  ;;  %v8510_v57 = vpack.c.bf16 %v2416_v52, %v2413_v25 }
 0x26f   :  { %v6369_v48 = vpack.c.bf16 %v9601_v58, %v9604_v44  ;;  %10015 = vst [vmem:[#allocation46_spill] sm:$0xff] %v8486_v40  ;;  %v9605_v58 = vand.u32 4294901760, %v8490_v63  ;;  %v10019_v36 = vand.u32 4294901760, %v8156_v20  ;;  %v10020_v32 = vand.u32 4294901760, %v8159_v51 }
 0x270   :  { %10014 = vst [vmem:[#allocation44_spill] sm:$0xff] %v8484_v43  ;;  %v6371_v5 = vpack.c.bf16 %v9602_v46, %v9603_v37  ;;  %6236 = vmatpush3.bf16.msra.mxu1 %v8484_v43  ;;  %10016 = vst [vmem:[#allocation51_spill] sm:$0xff] %v8499_v39  ;;  %v10022_v55 = vand.u32 4294901760, %v8162_v27  ;;  %v10023_v46 = vand.u32 4294901760, %v8165_v54 }
 0x271   :  { %6370 = vmatprep.subr.bf16.mxu0 %v6369_v48  ;;  %6238 = vmatprep.subr.bf16.mxu1 %v8486_v40  ;;  %v8506_v41 = vpack.c.bf16 %v9605_v58, %v9606_v30  ;;  %10018 = vst [vmem:[#allocation25_spill] sm:$0xff] %v8510_v57  ;;  %v2595_v17 = vsub.f32 %v8156_v20, %v10019_v36 }
 0x272   :  { %6372 = vmatpush3.bf16.msra.mxu0 %v6371_v5  ;;  %v2602_v5 = vsub.f32 %v8159_v51, %v10020_v32  ;;  %v8519_v48 = vpack.c.bf16 %v2368_v34, %v2365_v14  ;;  %v2483_v21 = vsub.f32 %v8162_v27, %v10022_v55  ;;  %v2490_v25 = vsub.f32 %v8165_v54, %v10023_v46 }
 0x273   :  { %10017 = vst [vmem:[#allocation55_spill] sm:$0xff] %v8506_v41  ;;  %6406 = vmatprep.subr.bf16.mxu0 %v8506_v41  ;;  %v2596_v52 = vand.u32 4294901760, %v2595_v17  ;;  %v10024_v32 = vand.u32 4294901760, %v8190_v56  ;;  %v10025_v34 = vand.u32 4294901760, %v8195_v59  ;;  %v10027_v17 = vand.u32 4294901760, %v8209_v31 }
 0x274   :  { %6240 = vmatpush3.bf16.msra.mxu1 %v8499_v39  ;;  %10021 = vst [vmem:[#allocation57_spill] sm:$0xff] %v8519_v48  ;;  %v2603_v37 = vand.u32 4294901760, %v2602_v5  ;;  %v2484_v36 = vand.u32 4294901760, %v2483_v21  ;;  %v2491_v44 = vand.u32 4294901760, %v2490_v25 }
 0x275   :  { %6242 = vmatprep.subr.bf16.mxu1 %v8510_v57  ;;  %v2609_v14 = vsub.f32 %v8190_v56, %v10024_v32  ;;  %v2616_v30 = vsub.f32 %v8195_v59, %v10025_v34  ;;  %v10026_v57 = vand.u32 4294901760, %v8204_v62  ;;  %v2504_v5 = vsub.f32 %v8209_v31, %v10027_v17 }
 0x276   :  { %v6245_v58 = vpack.c.bf16 %v2603_v37, %v2596_v52  ;;  %v8534_v55 = vpack.c.bf16 %v2491_v44, %v2484_v36  ;;  %v10028_v44 = vand.u32 4294901760, %v8234_v33  ;;  %v10029_v34 = vand.u32 4294901760, %v8239_v8 }
 0x277   :  { %v2497_v46 = vsub.f32 %v8204_v62, %v10026_v57  ;;  %v2610_v37 = vand.u32 4294901760, %v2609_v14  ;;  %v2617_v21 = vand.u32 4294901760, %v2616_v30  ;;  %v2505_v52 = vand.u32 4294901760, %v2504_v5 }
 0x278   :  { %6244 = vmatpush3.bf16.msra.mxu1 %v8519_v48  ;;  %v2623_v36 = vsub.f32 %v8234_v33, %v10028_v44  ;;  %v2630_v57 = vsub.f32 %v8239_v8, %v10029_v34  ;;  %v10031_v14 = vand.u32 4294901760, %v8253_v23  ;;  %v10032_v5 = vand.u32 4294901760, %v8280_v35  ;;  %v8838_v33 = vld [vmem:[#allocation7 + $0x150] sm:$0xff] }
 0x279   :  { %6246 = vmatprep.subr.bf16.mxu1 %v6245_v58  ;;  %v2498_v25 = vand.u32 4294901760, %v2497_v46  ;;  %v8542_v32 = vpack.c.bf16 %v2617_v21, %v2610_v37  ;;  %v10030_v58 = vand.u32 4294901760, %v8248_v50  ;;  %v10033_v21 = vand.u32 4294901760, %v8285_v28 }
 0x27a   :  { %v2624_v39 = vand.u32 4294901760, %v2623_v36  ;;  %v2631_v40 = vand.u32 4294901760, %v2630_v57  ;;  %v2518_v46 = vsub.f32 %v8253_v23, %v10031_v14  ;;  %v2637_v37 = vsub.f32 %v8280_v35, %v10032_v5 }
 0x27b   :  { %v8544_v48 = vpack.c.bf16 %v2505_v52, %v2498_v25  ;;  %v2511_v30 = vsub.f32 %v8248_v50, %v10030_v58  ;;  %v2644_v25 = vsub.f32 %v8285_v28, %v10033_v21  ;;  %v10034_v57 = vand.u32 4294901760, %v8296_v4 }
 0x27c   :  { %v8558_v17 = vpack.c.bf16 %v2631_v40, %v2624_v39  ;;  %v2519_v44 = vand.u32 4294901760, %v2518_v46  ;;  %v2638_v36 = vand.u32 4294901760, %v2637_v37  ;;  %v10035_v14 = vand.u32 4294901760, %v8301_v42 }
 0x27d   :  { %v2512_v52 = vand.u32 4294901760, %v2511_v30  ;;  %v2645_v34 = vand.u32 4294901760, %v2644_v25  ;;  %v2525_v58 = vsub.f32 %v8296_v4, %v10034_v57  ;;  %v10036_v21 = vand.u32 4294901760, %v8334_v2 }
 0x27e   :  { %v2532_v40 = vsub.f32 %v8301_v42, %v10035_v14  ;;  %v10037_v46 = vand.u32 4294901760, %v8339_v7  ;;  %v10038_v25 = vand.u32 4294901760, %v8352_v47  ;;  %v10040_v14 = vand.u32 4294901760, %v8379_v16 }
 0x27f   :  { %v8572_v39 = vpack.c.bf16 %v2519_v44, %v2512_v52  ;;  %v8574_v43 = vpack.c.bf16 %v2645_v34, %v2638_v36  ;;  %v2526_v5 = vand.u32 4294901760, %v2525_v58  ;;  %v2651_v30 = vsub.f32 %v8334_v2, %v10036_v21 }
 0x280   :  { %v2533_v61 = vand.u32 4294901760, %v2532_v40  ;;  %v2658_v37 = vsub.f32 %v8339_v7, %v10037_v46  ;;  %v2539_v57 = vsub.f32 %v8352_v47, %v10038_v25  ;;  %v10039_v44 = vand.u32 4294901760, %v8355_v3 }
 0x281   :  { %v2652_v52 = vand.u32 4294901760, %v2651_v30  ;;  %v2665_v40 = vsub.f32 %v8379_v16, %v10040_v14  ;;  %v10041_v46 = vand.u32 4294901760, %v8381_v9  ;;  %v10042_v25 = vand.u32 4294901760, %v8396_v0 }
 0x282   :  { %v8585_v24 = vpack.c.bf16 %v2533_v61, %v2526_v5  ;;  %v2546_v36 = vsub.f32 %v8355_v3, %v10039_v44  ;;  %v2659_v34 = vand.u32 4294901760, %v2658_v37  ;;  %v2540_v58 = vand.u32 4294901760, %v2539_v57 }
 0x283   :  { %v2672_v53 = vsub.f32 %v8381_v9, %v10041_v46  ;;  %v2553_v61 = vsub.f32 %v8396_v0, %v10042_v25  ;;  %v10043_v5 = vand.u32 4294901760, %v8401_v45  ;;  %v2666_v37 = vand.u32 4294901760, %v2665_v40 }
 0x284   :  { %v2547_v21 = vand.u32 4294901760, %v2546_v36  ;;  %v8602_v44 = vpack.c.bf16 %v2659_v34, %v2652_v52  ;;  %v10044_v16 = vand.u32 4294901760, %v8419_v13  ;;  %v10045_v9 = vand.u32 4294901760, %v8421_v26 }
 0x285   :  { %v2560_v30 = vsub.f32 %v8401_v45, %v10043_v5  ;;  %v2673_v3 = vand.u32 4294901760, %v2672_v53  ;;  %v2554_v14 = vand.u32 4294901760, %v2553_v61  ;;  %v10046_v0 = vand.u32 4294901760, %v8488_v6 }
 0x286   :  { %v8604_v57 = vpack.c.bf16 %v2547_v21, %v2540_v58  ;;  %v2679_v46 = vsub.f32 %v8419_v13, %v10044_v16  ;;  %v2686_v25 = vsub.f32 %v8421_v26, %v10045_v9  ;;  %v10048_v53 = vand.u32 4294901760, %v8490_v63 }
 0x287   :  { %v2561_v36 = vand.u32 4294901760, %v2560_v30  ;;  %v8615_v5 = vsub.f32 %v8488_v6, %v10046_v0  ;;  %v8617_v52 = vpack.c.bf16 %v2673_v3, %v2666_v37  ;;  %v10050_v61 = vand.u32 4294901760, %v8444_v29 }
 0x288   :  { %v8624_v58 = vsub.f32 %v8490_v63, %v10048_v53  ;;  %v2680_v40 = vand.u32 4294901760, %v2679_v46  ;;  %v2687_v16 = vand.u32 4294901760, %v2686_v25  ;;  %v10051_v3 = vand.u32 4294901760, %v8446_v60 }
 0x289   :  { %10047 = vst [vmem:[#allocation58_spill] sm:$0xff] %v8615_v5  ;;  %v8619_v34 = vpack.c.bf16 %v2561_v36, %v2554_v14  ;;  %v9628_v21 = vand.u32 4294901760, %v8615_v5  ;;  %v2567_v0 = vsub.f32 %v8444_v29, %v10050_v61  ;;  %v10052_v46 = vand.u32 4294901760, %v8458_v12 }
 0x28a   :  { %10049 = vst [vmem:[#allocation61_spill] sm:$0xff] %v8624_v58  ;;  %v9630_v9 = vand.u32 4294901760, %v8624_v58  ;;  %v2574_v6 = vsub.f32 %v8446_v60, %v10051_v3  ;;  %v8634_v30 = vpack.c.bf16 %v2687_v16, %v2680_v40  ;;  %v10053_v61 = vand.u32 4294901760, %v8460_v22 }
 0x28b   :  { %v3477_v63 = vsub.f32 %v8615_v5, %v9628_v21  ;;  %v2568_v14 = vand.u32 4294901760, %v2567_v0  ;;  %v2693_v25 = vsub.f32 %v8458_v12, %v10052_v46  ;;  %v10054_v29 = vand.u32 4294901760, %v8462_v11 }
 0x28c   :  { %v3484_v37 = vsub.f32 %v8624_v58, %v9630_v9  ;;  %v2575_v36 = vand.u32 4294901760, %v2574_v6  ;;  %v2700_v40 = vsub.f32 %v8460_v22, %v10053_v61  ;;  %v10055_v0 = vand.u32 4294901760, %v8468_v18 }
 0x28d   :  { %v3478_v53 = vand.u32 4294901760, %v3477_v63  ;;  %v2694_v60 = vand.u32 4294901760, %v2693_v25  ;;  %v2581_v9 = vsub.f32 %v8462_v11, %v10054_v29 }
 0x28e   :  { %v3485_v16 = vand.u32 4294901760, %v3484_v37  ;;  %v8648_v3 = vpack.c.bf16 %v2575_v36, %v2568_v14  ;;  %v2701_v21 = vand.u32 4294901760, %v2700_v40  ;;  %v2588_v6 = vsub.f32 %v8468_v18, %v10055_v0 }
 0x28f   :  { %v2582_v46 = vand.u32 4294901760, %v2581_v9  ;;  %v8664_v36 = vpack.c.bf16 %v8624_v58, %v8615_v5  ;;  %v8685_v58 = vld [vmem:[#allocation7 + $0x120] sm:$0xff] }
 0x290   :  { %v8656_v26 = vpack.c.bf16 %v3485_v16, %v3478_v53  ;;  %v8658_v63 = vpack.c.bf16 %v2701_v21, %v2694_v60  ;;  %v2589_v12 = vand.u32 4294901760, %v2588_v6  ;;  %v8667_v60 = vsub.s32 0, %v6958_v1  ;;  %v10063_v5 = vld [vmem:[#allocation15_spill] sm:$0xff]  ;;  %v10078_v1 = vld [vmem:[#allocation77_spill] sm:$0xff] }
 0x291   :  { %10056 = vst [vmem:[#allocation49_spill] sm:$0xff] %v8664_v36  ;;  %v10065_v2 = vand.u32 4294901760, %v8685_v58 }
 0x292   :  { %v8660_v61 = vpack.c.bf16 %v2589_v12, %v2582_v46  ;;  %10057 = vst [vmem:[#allocation64_spill] sm:$0xff] %v8667_v60  ;;  %v201_v12 = vld [vmem:[%s9373_s4] sm:$0x1] }
 0x30a   :  { %v2188_v37 = vpop.f32.mrb[40].mxu1 }
 0x30b   :  { %v5447_v14 = vpop.f32.mrb[41].mxu1  ;;  %v2262_v25 = vmul.f32 %v2188_v37, %v2188_v37  ;;  %v2268_v21 = vrot.slane %v2188_v37, %v8667_v60  ;;  %v4347_v37 = vld [vmem:[%s9374_s5] ss:$0 sm:$0xff] }
 0x30d   :  { %v2269_v16 = vsub.f32 %v8108_v38, %v2268_v21  ;;  %v2270_v6 = vsub.f32 %v8106_v19, %v2268_v21 }
 0x32a   :  { %v2258_v29 = vpop.f32.mrb[42].mxu1 }
 0x32b   :  { %v2263_v40 = vsub.f32 %v2258_v29, %v2262_v25  ;;  %v5482_v11 = vpop.f32.mrb[43].mxu1 }
 0x32c   :  { %v2271_v11 = vsub.f32 %v8114_v49, %v2268_v21 }
 0x32d   :  { %v2264_v22 = vmax.f32 %v2263_v40, 0.0  ;;  %v8681_v40 = vld [vmem:[#allocation7 + $0x110] sm:$0xff] }
 0x32f   :  { %v2273_v0 = vadd.f32 1e-05, %v2264_v22  ;;  %v2272_v22 = vsub.f32 %v8110_v15, %v2268_v21  ;;  %v8687_v15 = vld [vmem:[#allocation7 + $0x128] sm:$0xff]  ;;  %v9639_v21 = vand.u32 4294901760, %v8681_v40 }
 0x330   :  { %v10066_v42 = vand.u32 4294901760, %v8687_v15 }
 0x331   :  { %6703 = vrsqrt.f32 %v2273_v0  ;;  %v8683_v0 = vld [vmem:[#allocation7 + $0x118] sm:$0xff] }
 0x33b   :  { %v6704_v9 = vpop.eup %6703 }
 0x33c   :  { %v2275_v53 = vmul.f32 %v6704_v9, %v201_v12 }
 0x33e   :  { %v2279_v46 = vrot.slane %v2275_v53, %v8667_v60  ;;  %v9638_v53 = vand.u32 4294901760, %v8683_v0 }
 0x340   :  { %v2283_v14 = vmul.f32 %v2279_v46, %v2272_v22  ;;  %v2280_v25 = vmul.f32 %v2279_v46, %v2269_v16  ;;  %v2281_v29 = vmul.f32 %v2279_v46, %v2270_v6  ;;  %v2282_v38 = vmul.f32 %v2279_v46, %v2271_v11 }
 0x342   :  { %v2290_v12 = vadd.f32 %v4347_v37, %v2280_v25  ;;  %v2293_v19 = vadd.f32 %v4347_v37, %v2283_v14  ;;  %v2291_v9 = vadd.f32 %v4347_v37, %v2281_v29  ;;  %v2292_v49 = vadd.f32 %v4347_v37, %v2282_v38 }
 0x343   :  { %v8710_v38 = vpack.c.bf16 %v9638_v53, %v9639_v21  ;;  %v8726_v53 = vld [vmem:[#allocation7 + $0x130] sm:$0xff]  ;;  %v8743_v21 = vpack.c.bf16 %v10066_v42, %v10065_v2 }
 0x344   :  { %v8691_v22 = vmax.f32 %v2290_v12, 0.0  ;;  %v8693_v16 = vmax.f32 %v2293_v19, 0.0  ;;  %v2295_v6 = vmax.f32 %v2291_v9, 0.0  ;;  %v8695_v60 = vmax.f32 %v2292_v49, 0.0 }
 0x345   :  { %10059 = vst [vmem:[#allocation72_spill] sm:$0xff] %v8710_v38  ;;  %10067 = vst [vmem:[#allocation15_spill] sm:$0xff] %v8743_v21 }
 0x346   :  { %v8700_v37 = vand.u32 4294901760, %v8691_v22  ;;  %v2298_v14 = vrot.slane %v8691_v22, 7  ;;  %v2301_v25 = vrot.slane %v8693_v16, 7  ;;  %v8704_v29 = vand.u32 4294901760, %v2295_v6 }
 0x347   :  { %v2299_v12 = vrot.slane %v2295_v6, 7  ;;  %v8713_v19 = vand.u32 4294901760, %v8695_v60  ;;  %v2300_v9 = vrot.slane %v8695_v60, 7 }
 0x348   :  { %10058 = vst [vmem:[#allocation69_spill] sm:$0xff] %v8700_v37  ;;  %3199 = vmatprep.mubr.f32.mxu0 %v8700_v37  ;;  %v2305_v49 = vsel %vm278_vm1, %v2301_v25, %v2298_v14  ;;  %v8721_v46 = vsub.f32 %v8691_v22, %v8700_v37  ;;  %v8724_v11 = vsub.f32 %v2295_v6, %v8704_v29 }
 0x349   :  { %10060 = vst [vmem:[#allocation75_spill] sm:$0xff] %v8713_v19  ;;  %v2306_v18 = vmul.f32 %v2305_v49, %v10063_v5  ;;  %v2304_v36 = vsel %vm278_vm1, %v2298_v14, %v2299_v12  ;;  %v2303_v13 = vsel %vm278_vm1, %v2299_v12, %v2300_v9  ;;  %v2302_v45 = vsel %vm278_vm1, %v2300_v9, %v2301_v25  ;;  %v10068_v5 = vld [vmem:[#allocation70_spill] sm:$0xff] }
 0x34a   :  { %10061 = vst [vmem:[#allocation54_spill] sm:$0xff] %v8721_v46  ;;  %10062 = vst [vmem:[#allocation62_spill] sm:$0xff] %v8724_v11  ;;  %v9652_v47 = vand.u32 4294901760, %v8721_v46  ;;  %v8737_v7 = vand.u32 4294901760, %v2304_v36  ;;  %v2308_v49 = vmul.f32 %v2303_v13, %v10068_v5  ;;  %v8749_v12 = vld [vmem:[#allocation7 + $0x138] sm:$0xff]  ;;  %v2311_v9 = vrot.slane %v2295_v6, 1 }
 0x34b   :  { %v8746_v4 = vand.u32 4294901760, %v2306_v18  ;;  %v8762_v2 = vsub.f32 %v8695_v60, %v8713_v19  ;;  %v8769_v6 = vand.u32 4294901760, %v8693_v16  ;;  %v2312_v5 = vrot.slane %v8695_v60, 1 }
 0x34c   :  { %10064 = vst [vmem:[#allocation66_spill] sm:$0xff] %v8737_v7  ;;  %v2421_v28 = vsub.f32 %v8721_v46, %v9652_v47  ;;  %v8755_v35 = vand.u32 4294901760, %v2308_v49  ;;  %v8758_v42 = vsub.f32 %v2304_v36, %v8737_v7  ;;  %v10070_v47 = vrot.slane %v8691_v22, 1 }
 0x34d   :  { %3201 = vmatmul.mubr.f32.vlgmr.msra.gmra.mrb[12].mxu0 %v8746_v4  ;;  %v8766_v13 = vsub.f32 %v2306_v18, %v8746_v4  ;;  %v8784_v23 = vand.u32 4294901760, %v2302_v45 }
 0x34e   :  { %v2316_v36 = vsel %vm291_vm3, %v10070_v47, %v2311_v9  ;;  %6408 = vmatpush3.bf16.msra.mxu0 %v8506_v41  ;;  %3206 = vmatprep.mubr.f32.mxu0 %v8704_v29  ;;  %v2422_v25 = vand.u32 4294901760, %v2421_v28  ;;  %v2315_v47 = vsel %vm291_vm3, %v2311_v9, %v2312_v5  ;;  %v8789_v41 = vsub.f32 %v2308_v49, %v8755_v35  ;;  %v8802_v9 = vld [vmem:[#allocation7 + $0x140] sm:$0xff]  ;;  %v8804_v49 = vld [vmem:[#allocation7 + $0x148] sm:$0xff] }
 0x34f   :  { %10069 = vst [vmem:[#allocation70_spill] sm:$0xff] %v8766_v13  ;;  %v8780_v46 = vand.u32 4294901760, %v2316_v36  ;;  %6410 = vmatprep.subr.bf16.mxu0 %v8710_v38  ;;  %v9660_v60 = vand.u32 4294901760, %v8766_v13  ;;  %v10071_v28 = vand.u32 4294901760, %v8724_v11 }
 0x350   :  { %2423 = vmatprep.mubr.f32.mxu1 %v2422_v25  ;;  %v8808_v25 = vsub.f32 %v8693_v16, %v8769_v6 }
 0x351   :  { %v2436_v14 = vsub.f32 %v8724_v11, %v10071_v28  ;;  %v8796_v50 = vsub.f32 %v2316_v36, %v8780_v46  ;;  %3208 = vmatmul.mubr.f32.gmra.mrb[14].mxu0 %v8737_v7  ;;  %v2427_v8 = vsub.f32 %v8766_v13, %v9660_v60  ;;  %v10072_v36 = vand.u32 4294901760, %v8726_v53 }
 0x352   :  { %6412 = vmatpush3.bf16.msra.mxu0 %v8710_v38  ;;  %3213 = vmatprep.mubr.f32.mxu0 %v8713_v19  ;;  %v10073_v28 = vand.u32 4294901760, %v8749_v12  ;;  %v10074_v60 = vand.u32 4294901760, %v8758_v42  ;;  %v8825_v38 = vsub.f32 %v2302_v45, %v8784_v23  ;;  %v2313_v19 = vrot.slane %v8693_v16, 1  ;;  %v8840_v16 = vld [vmem:[#allocation7 + $0x158] sm:$0xff] }
 0x353   :  { %v9674_v13 = vand.u32 4294901760, %v8796_v50  ;;  %6414 = vmatprep.subr.bf16.mxu0 %v8743_v21  ;;  %v2428_v7 = vand.u32 4294901760, %v2427_v8  ;;  %v2437_v31 = vand.u32 4294901760, %v2436_v14  ;;  %v10077_v45 = vand.u32 4294901760, %v8789_v41 }
 0x354   :  { %v8816_v18 = vpack.c.bf16 %v10073_v28, %v10072_v36  ;;  %v2442_v11 = vsub.f32 %v8758_v42, %v10074_v60  ;;  %v10075_v36 = vand.u32 4294901760, %v8762_v2  ;;  %v2314_v14 = vsel %vm291_vm3, %v2312_v5, %v2313_v19  ;;  %v8855_v5 = vld [vmem:[#allocation7 + $0x160] sm:$0xff] }
 0x355   :  { %2429 = vmatmul.mubr.f32.vlgmr.msra.gmra.mrb[44].mxu1 %v2428_v7  ;;  %3215 = vmatmul.mubr.f32.gmra.mrb[16].mxu0 %v8755_v35  ;;  %v3436_v8 = vsub.f32 %v8796_v50, %v9674_v13  ;;  %v2457_v60 = vsub.f32 %v8789_v41, %v10077_v45 }
 0x356   :  { %v2451_v28 = vsub.f32 %v8762_v2, %v10075_v36  ;;  %v10076_v36 = vrot.slane %v8691_v22, 1  ;;  %6248 = vmatpush3.bf16.msra.mxu1 %v8534_v55  ;;  %6416 = vmatpush3.bf16.msra.mxu0 %v8743_v21  ;;  %v2443_v13 = vand.u32 4294901760, %v2442_v11  ;;  %v8857_v22 = vld [vmem:[#allocation7 + $0x168] sm:$0xff]  ;;  %v10080_v55 = vand.u32 4294901760, %v8804_v49 }
 0x357   :  { %2438 = vmatprep.mubr.f32.mxu1 %v2437_v31  ;;  %3220 = vmatprep.mubr.f32.mxu0 %v8769_v6  ;;  %v10079_v31 = vand.u32 4294901760, %v8802_v9  ;;  %v3437_v21 = vand.u32 4294901760, %v3436_v8  ;;  %v10083_v8 = vand.u32 4294901760, %v8825_v38 }
 0x358   :  { %v2317_v7 = vsel %vm291_vm3, %v2313_v19, %v10076_v36  ;;  %v2319_v19 = vmul.f32 %v2315_v47, %v10078_v1  ;;  %6250 = vmatprep.subr.bf16.mxu1 %v8542_v32  ;;  %6418 = vmatprep.subr.bf16.mxu0 %v8816_v18  ;;  %v2452_v62 = vand.u32 4294901760, %v2451_v28  ;;  %v10081_v47 = vand.u32 4294901760, %v8808_v25  ;;  %v8886_v36 = vld [vmem:[#allocation7 + $0x170] sm:$0xff] }
 0x359   :  { %v8866_v11 = vpack.c.bf16 %v10080_v55, %v10079_v31  ;;  %2444 = vmatmul.mubr.f32.gmra.mrb[46].mxu1 %v2443_v13  ;;  %3222 = vmatmul.mubr.f32.gmra.mrb[18].mxu0 %v8784_v23  ;;  %v10082_v55 = vand.u32 4294901760, %v8681_v40  ;;  %v2458_v28 = vand.u32 4294901760, %v2457_v60  ;;  %v2321_v31 = vmul.f32 %v2317_v7, %v7824_v10 }
 0x35a   :  { %v2466_v32 = vsub.f32 %v8808_v25, %v10081_v47  ;;  %6252 = vmatpush3.bf16.msra.mxu1 %v8544_v48  ;;  %6420 = vmatpush3.bf16.msra.mxu0 %v8816_v18  ;;  %v2472_v47 = vsub.f32 %v8825_v38, %v10083_v8  ;;  %v8888_v48 = vld [vmem:[#allocation7 + $0x178] sm:$0xff]  ;;  %v8890_v45 = vand.u32 4294901760, %v2319_v19  ;;  %v8901_v60 = vand.u32 4294901760, %v2314_v14 }
 0x35b   :  { %v8881_v13 = vsub.f32 %v8681_v40, %v10082_v55  ;;  %2453 = vmatprep.mubr.f32.mxu1 %v2452_v62  ;;  %5515 = vmatprep.mubr.f32.mxu0 %v3437_v21  ;;  %v10084_v62 = vand.u32 4294901760, %v8838_v33  ;;  %v10085_v40 = vand.u32 4294901760, %v8840_v16  ;;  %v10087_v55 = vand.u32 4294901760, %v8683_v0 }
 0x35c   :  { %6254 = vmatprep.subr.bf16.mxu1 %v8558_v17  ;;  %6422 = vmatprep.subr.bf16.mxu0 %v8866_v11  ;;  %v2467_v1 = vand.u32 4294901760, %v2466_v32  ;;  %v10088_v10 = vand.u32 4294901760, %v8855_v5  ;;  %v10089_v17 = vand.u32 4294901760, %v8857_v22  ;;  %v8920_v32 = vsub.f32 %v2319_v19, %v8890_v45 }
 0x35d   :  { %v8899_v21 = vpack.c.bf16 %v10085_v40, %v10084_v62  ;;  %v8906_v8 = vsub.f32 %v8683_v0, %v10087_v55  ;;  %2459 = vmatmul.mubr.f32.gmra.mrb[48].mxu1 %v2458_v28  ;;  %v9679_v62 = vand.u32 4294901760, %v8886_v36  ;;  %v9678_v40 = vand.u32 4294901760, %v8888_v48 }
 0x35e   :  { %6256 = vmatpush3.bf16.msra.mxu1 %v8572_v39  ;;  %6424 = vmatpush3.bf16.msra.mxu0 %v8866_v11  ;;  %v8914_v7 = vpack.c.bf16 %v10089_v17, %v10088_v10  ;;  %v2473_v0 = vand.u32 4294901760, %v2472_v47  ;;  %v8922_v39 = vand.u32 4294901760, %v2321_v31  ;;  %v9677_v28 = vand.u32 4294901760, %v8881_v13 }
 0x35f   :  { %10086 = vst [vmem:[#allocation77_spill] sm:$0xff] %v8899_v21  ;;  %2468 = vmatprep.mubr.f32.mxu1 %v2467_v1  ;;  %6258 = vmatprep.subr.bf16.mxu1 %v8574_v43  ;;  %v8927_v55 = vsub.f32 %v2314_v14, %v8901_v60  ;;  %v10091_v17 = vand.u32 4294901760, %v8685_v58  ;;  %v10092_v43 = vand.u32 4294901760, %v8687_v15  ;;  %v10093_v14 = vand.u32 4294901760, %v8726_v53 }
 0x360   :  { %10090 = vst [vmem:[#allocation79_spill] sm:$0xff] %v8914_v7  ;;  %6426 = vmatprep.subr.bf16.mxu0 %v8899_v21  ;;  %v10094_v10 = vand.u32 4294901760, %v8749_v12 }
 0x361   :  { %v8933_v1 = vsub.f32 %v8685_v58, %v10091_v17  ;;  %v8938_v19 = vsub.f32 %v8687_v15, %v10092_v43  ;;  %2474 = vmatmul.mubr.f32.gmra.mrb[50].mxu1 %v2473_v0  ;;  %v8945_v47 = vsub.f32 %v8726_v53, %v10093_v14  ;;  %v9680_v15 = vand.u32 4294901760, %v8920_v32 }
 0x362   :  { %6260 = vmatpush3.bf16.msra.mxu1 %v8585_v24  ;;  %6428 = vmatpush3.bf16.msra.mxu0 %v8899_v21  ;;  %v8950_v58 = vsub.f32 %v8749_v12, %v10094_v10  ;;  %v8958_v24 = vpack.c.bf16 %v9678_v40, %v9679_v62  ;;  %v8962_v53 = vsub.f32 %v2321_v31, %v8922_v39  ;;  %v9681_v0 = vand.u32 4294901760, %v8927_v55 }
 0x363   :  { %2704 = vmatprep.mubr.f32.mxu1 %v8700_v37  ;;  %6262 = vmatprep.subr.bf16.mxu1 %v8602_v44  ;;  %v3491_v12 = vsub.f32 %v8881_v13, %v9677_v28  ;;  %v10096_v44 = vand.u32 4294901760, %v8906_v8  ;;  %v9682_v17 = vand.u32 4294901760, %v8933_v1  ;;  %v9683_v43 = vand.u32 4294901760, %v8938_v19 }
 0x364   :  { %10095 = vst [vmem:[#allocation80_spill] sm:$0xff] %v8958_v24  ;;  %6430 = vmatprep.subr.bf16.mxu0 %v8914_v7  ;;  %v10097_v28 = vand.u32 4294901760, %v8802_v9  ;;  %v10098_v62 = vand.u32 4294901760, %v8804_v49 }
 0x365   :  { %v3498_v10 = vsub.f32 %v8906_v8, %v10096_v44  ;;  %v3492_v31 = vand.u32 4294901760, %v3491_v12 }
 0x366   :  { %6264 = vmatpush3.bf16.msra.mxu1 %v8604_v57  ;;  %6432 = vmatpush3.bf16.msra.mxu0 %v8914_v7  ;;  %v8981_v40 = vsub.f32 %v8802_v9, %v10097_v28  ;;  %v8986_v44 = vsub.f32 %v8804_v49, %v10098_v62  ;;  %v3446_v57 = vsub.f32 %v8920_v32, %v9680_v15  ;;  %v10099_v62 = vand.u32 4294901760, %v8945_v47 }
 0x367   :  { %6266 = vmatprep.subr.bf16.mxu1 %v8617_v52  ;;  %6434 = vmatprep.subr.bf16.mxu0 %v8958_v24  ;;  %v3456_v9 = vsub.f32 %v8927_v55, %v9681_v0  ;;  %v3499_v28 = vand.u32 4294901760, %v3498_v10  ;;  %v3505_v49 = vsub.f32 %v8933_v1, %v9682_v17  ;;  %v3512_v52 = vsub.f32 %v8938_v19, %v9683_v43 }
 0x368   :  { %v3519_v12 = vsub.f32 %v8945_v47, %v10099_v62  ;;  %v10100_v15 = vand.u32 4294901760, %v8950_v58  ;;  %v3447_v14 = vand.u32 4294901760, %v3446_v57 }
 0x369   :  { %v3457_v17 = vand.u32 4294901760, %v3456_v9  ;;  %v6441_v7 = vpack.c.bf16 %v3499_v28, %v3492_v31  ;;  %v3513_v57 = vand.u32 4294901760, %v3512_v52  ;;  %v10105_v31 = vand.u32 4294901760, %v8986_v44 }
 0x36a   :  { %6268 = vmatpush3.bf16.msra.mxu1 %v8619_v34  ;;  %6436 = vmatpush3.bf16.msra.mxu0 %v8958_v24  ;;  %v3526_v10 = vsub.f32 %v8950_v58, %v10100_v15  ;;  %v10101_v34 = vand.u32 4294901760, %v8962_v53  ;;  %v10102_v24 = vand.u32 4294901760, %v8838_v33  ;;  %v10103_v15 = vand.u32 4294901760, %v8840_v16 }
 0x36b   :  { %6270 = vmatprep.subr.bf16.mxu1 %v8634_v30  ;;  %6438 = vmatprep.subr.bf16.mxu0 %v8656_v26  ;;  %v3506_v30 = vand.u32 4294901760, %v3505_v49  ;;  %v3520_v37 = vand.u32 4294901760, %v3519_v12  ;;  %v6281_v28 = vpack.c.bf16 %v8195_v59, %v8190_v56  ;;  %v10109_v59 = vand.u32 4294901760, %v8888_v48 }
 0x36c   :  { %v3466_v43 = vsub.f32 %v8962_v53, %v10101_v34  ;;  %v9021_v62 = vsub.f32 %v8838_v33, %v10102_v24  ;;  %v9026_v0 = vsub.f32 %v8840_v16, %v10103_v15  ;;  %v6277_v34 = vpack.c.bf16 %v8159_v51, %v8156_v20  ;;  %v10112_v15 = vld [vmem:[#allocation39_spill] sm:$0xff] }
 0x36d   :  { %5516 = vmatmul.mubr.f32.vlgmr.msra.gmra.mrb[20].mxu0 %v3447_v14  ;;  %v3527_v21 = vand.u32 4294901760, %v3526_v10  ;;  %v10104_v33 = vand.u32 4294901760, %v8981_v40  ;;  %v3540_v14 = vsub.f32 %v8986_v44, %v10105_v31  ;;  %v6445_v20 = vpack.c.bf16 %v3513_v57, %v3506_v30  ;;  %v10113_v30 = vld [vmem:[#allocation41_spill] sm:$0xff] }
 0x36e   :  { %6272 = vmatpush3.bf16.msra.mxu1 %v8648_v3  ;;  %5518 = vmatprep.mubr.f32.mxu0 %v3457_v17  ;;  %v3467_v16 = vand.u32 4294901760, %v3466_v43  ;;  %v3546_v3 = vand.u32 4294901760, %v9021_v62  ;;  %v3553_v17 = vand.u32 4294901760, %v9026_v0  ;;  %v10106_v51 = vand.u32 4294901760, %v8855_v5 }
 0x36f   :  { %v3533_v24 = vsub.f32 %v8981_v40, %v10104_v33  ;;  %6440 = vmatpush3.bf16.msra.mxu0 %v8656_v26  ;;  %6274 = vmatprep.subr.bf16.mxu1 %v8658_v63  ;;  %v10107_v26 = vand.u32 4294901760, %v8857_v22  ;;  %v6279_v43 = vpack.c.bf16 %v8165_v54, %v8162_v27  ;;  %v6449_v49 = vpack.c.bf16 %v3527_v21, %v3520_v37  ;;  %v10110_v21 = vld [vmem:[#allocation60_spill] sm:$0xff] }
 0x370   :  { %6442 = vmatprep.subr.bf16.mxu0 %v6441_v7  ;;  %v9044_v9 = vsub.f32 %v8855_v5, %v10106_v51  ;;  %v3541_v52 = vand.u32 4294901760, %v3540_v14  ;;  %v10108_v54 = vand.u32 4294901760, %v8886_v36  ;;  %v9073_v37 = vsub.f32 %v8888_v48, %v10109_v59  ;;  %v10114_v14 = vld [vmem:[#allocation66_spill] sm:$0xff] }
 0x371   :  { %v9049_v63 = vsub.f32 %v8857_v22, %v10107_v26  ;;  %5519 = vmatmul.mubr.f32.gmra.mrb[22].mxu0 %v3467_v16  ;;  %v3534_v5 = vand.u32 4294901760, %v3533_v24  ;;  %v3547_v22 = vsub.f32 %v9021_v62, %v3546_v3  ;;  %v6285_v57 = vpack.c.bf16 %v10113_v30, %v10112_v15  ;;  %v10116_v51 = vld [vmem:[#allocation42_spill] sm:$0xff]  ;;  %v10122_v15 = vld [vmem:[#allocation48_spill] sm:$0xff]  ;;  %v10123_v30 = vld [vmem:[#allocation47_spill] sm:$0xff] }
 0x372   :  { %6276 = vmatpush3.bf16.msra.mxu1 %v8660_v61  ;;  %5553 = vmatprep.mubr.f32.mxu0 %v8780_v46  ;;  %v3554_v61 = vsub.f32 %v9026_v0, %v3553_v17  ;;  %v3560_v12 = vand.u32 4294901760, %v9044_v9  ;;  %v9068_v56 = vsub.f32 %v8886_v36, %v10108_v54  ;;  %v9691_v31 = vand.u32 4294901760, %v9073_v37  ;;  %v10117_v26 = vld [vmem:[#allocation50_spill] sm:$0xff] }
 0x373   :  { %6444 = vmatpush3.bf16.msra.mxu0 %v6441_v7  ;;  %6278 = vmatprep.subr.bf16.mxu1 %v6277_v34  ;;  %v3567_v27 = vand.u32 4294901760, %v9049_v63  ;;  %v10111_v7 = vld [vmem:[#allocation37_spill] sm:$0xff]  ;;  %v6453_v36 = vpack.c.bf16 %v3541_v52, %v3534_v5  ;;  %v3548_v34 = vand.u32 4294901760, %v3547_v22  ;;  %v10119_v5 = vld [vmem:[#allocation16_spill] sm:$0xff] }
 0x374   :  { %6446 = vmatprep.subr.bf16.mxu0 %v6445_v20  ;;  %v6283_v10 = vpack.c.bf16 %v10111_v7, %v10110_v21  ;;  %v3555_v33 = vand.u32 4294901760, %v3554_v61  ;;  %v3561_v48 = vsub.f32 %v9044_v9, %v3560_v12  ;;  %v9692_v16 = vand.u32 4294901760, %v9068_v56  ;;  %v10121_v7 = vld [vmem:[#allocation43_spill] sm:$0xff] }
 0x375   :  { %2706 = vmatmul.mubr.f32.vlgmr.msra.gmra.mrb[52].mxu1 %v8746_v4  ;;  %v3568_v24 = vsub.f32 %v9049_v63, %v3567_v27  ;;  %v3582_v21 = vsub.f32 %v9073_v37, %v9691_v31 }
 0x376   :  { %2711 = vmatprep.mubr.f32.mxu1 %v8704_v29  ;;  %6280 = vmatpush3.bf16.msra.mxu1 %v6279_v43  ;;  %v6287_v43 = vpack.c.bf16 %v10117_v26, %v10116_v51  ;;  %v6457_v22 = vpack.c.bf16 %v3555_v33, %v3548_v34  ;;  %v3562_v61 = vand.u32 4294901760, %v3561_v48  ;;  %v3575_v59 = vsub.f32 %v9068_v56, %v9692_v16  ;;  %v10125_v51 = vld [vmem:[#allocation56_spill] sm:$0xff]  ;;  %v10126_v26 = vld [vmem:[#allocation18_spill] sm:$0xff] }
 0x377   :  { %6448 = vmatpush3.bf16.msra.mxu0 %v6445_v20  ;;  %6282 = vmatprep.subr.bf16.mxu1 %v6281_v28  ;;  %v10115_v20 = vld [vmem:[#allocation75_spill] sm:$0xff]  ;;  %v10118_v28 = vld [vmem:[#allocation65_spill] sm:$0xff]  ;;  %v3569_v54 = vand.u32 4294901760, %v3568_v24  ;;  %v3583_v48 = vand.u32 4294901760, %v3582_v21  ;;  %v10124_v24 = vld [vmem:[#allocation54_spill] sm:$0xff] }
 0x378   :  { %6450 = vmatprep.subr.bf16.mxu0 %v6449_v49  ;;  %v6289_v52 = vpack.c.bf16 %v10119_v5, %v10118_v28  ;;  %v3576_v33 = vand.u32 4294901760, %v3575_v59  ;;  %v10127_v28 = vld [vmem:[#allocation19_spill] sm:$0xff]  ;;  %v10131_v59 = vld [vmem:[#allocation73_spill] sm:$0xff]  ;;  %v10132_v21 = vld [vmem:[#allocation78_spill] sm:$0xff] }
 0x379   :  { %2713 = vmatmul.mubr.f32.gmra.mrb[54].mxu1 %v10114_v14  ;;  %v6461_v34 = vpack.c.bf16 %v3569_v54, %v3562_v61  ;;  %v10130_v61 = vld [vmem:[#allocation67_spill] sm:$0xff] }
 0x37a   :  { %2718 = vmatprep.mubr.f32.mxu1 %v10115_v20  ;;  %6284 = vmatpush3.bf16.msra.mxu1 %v6283_v10 }
 0x37b   :  { %6452 = vmatpush3.bf16.msra.mxu0 %v6449_v49  ;;  %6286 = vmatprep.subr.bf16.mxu1 %v6285_v57  ;;  %v10120_v49 = vld [vmem:[#allocation45_spill] sm:$0xff]  ;;  %v6293_v57 = vpack.c.bf16 %v10123_v30, %v10122_v15  ;;  %v10134_v15 = vld [vmem:[#allocation27_spill] sm:$0xff] }
 0x37c   :  { %6454 = vmatprep.subr.bf16.mxu0 %v6453_v36  ;;  %v6291_v10 = vpack.c.bf16 %v10121_v7, %v10120_v49  ;;  %v10129_v49 = vld [vmem:[#allocation20_spill] sm:$0xff]  ;;  %v6301_v7 = vpack.c.bf16 %v10132_v21, %v10131_v59  ;;  %v10135_v30 = vld [vmem:[#allocation49_spill] sm:$0xff]  ;;  %v6485_v59 = vpack.c.bf16 %v8986_v44, %v8981_v40 }
 0x37d   :  { %2720 = vmatmul.mubr.f32.gmra.mrb[56].mxu1 %v8755_v35  ;;  %v6299_v54 = vpack.c.bf16 %v10130_v61, %v10129_v49  ;;  %v10142_v49 = vld [vmem:[#allocation62_spill] sm:$0xff]  ;;  %v10143_v61 = vld [vmem:[#allocation53_spill] sm:$0xff] }
 0x37e   :  { %2725 = vmatprep.mubr.f32.mxu1 %v8769_v6  ;;  %6288 = vmatpush3.bf16.msra.mxu1 %v6287_v43  ;;  %v6295_v43 = vpack.c.bf16 %v10126_v26, %v10125_v51  ;;  %v6473_v51 = vpack.c.bf16 %v8906_v8, %v8881_v13  ;;  %v10139_v26 = vld [vmem:[#allocation40_spill] sm:$0xff]  ;;  %v10145_v21 = vld [vmem:[#allocation17_spill] sm:$0xff]  ;;  %v10164_v16 = vand.u32 4294901760, %v10142_v49 }
 0x37f   :  { %6456 = vmatpush3.bf16.msra.mxu0 %v6453_v36  ;;  %6290 = vmatprep.subr.bf16.mxu1 %v6289_v52  ;;  %v10128_v36 = vld [vmem:[#allocation63_spill] sm:$0xff]  ;;  %v6465_v52 = vpack.c.bf16 %v3583_v48, %v3576_v33 }
 0x380   :  { %6458 = vmatprep.subr.bf16.mxu0 %v6457_v22  ;;  %v6297_v5 = vpack.c.bf16 %v10128_v36, %v10127_v28  ;;  %v10137_v33 = vld [vmem:[#allocation35_spill] sm:$0xff]  ;;  %v6477_v28 = vpack.c.bf16 %v8938_v19, %v8933_v1  ;;  %v10140_v36 = vld [vmem:[#allocation52_spill] sm:$0xff] }
 0x381   :  { %2727 = vmatmul.mubr.f32.gmra.mrb[58].mxu1 %v8784_v23 }
 0x382   :  { %6292 = vmatpush3.bf16.msra.mxu1 %v6291_v10  ;;  %2862 = vmatprep.mubr.f32.mxu1 %v10124_v24  ;;  %v10133_v10 = vld [vmem:[#allocation74_spill] sm:$0xff] }
 0x383   :  { %6460 = vmatpush3.bf16.msra.mxu0 %v6457_v22  ;;  %6294 = vmatprep.subr.bf16.mxu1 %v6293_v57  ;;  %v6303_v22 = vpack.c.bf16 %v10134_v15, %v10133_v10  ;;  %v10136_v57 = vld [vmem:[#allocation33_spill] sm:$0xff]  ;;  %v6489_v10 = vpack.c.bf16 %v9026_v0, %v9021_v62  ;;  %v10147_v15 = vld [vmem:[#allocation68_spill] sm:$0xff]  ;;  %v10194_v0 = vmov 0.0  }
 0x384   :  { %6462 = vmatprep.subr.bf16.mxu0 %v6461_v34  ;;  %v6305_v48 = vpack.c.bf16 %v10137_v33, %v10136_v57  ;;  %v10149_v57 = vld [vmem:[#allocation22_spill] sm:$0xff]  ;;  %v10150_v33 = vand.u32 4294901760, %v10124_v24  ;;  %v10156_v24 = vld [vmem:[#allocation55_spill] sm:$0xff] }
 0x386   :  { %6296 = vmatpush3.bf16.msra.mxu1 %v6295_v43 }
 0x387   :  { %6464 = vmatpush3.bf16.msra.mxu0 %v6461_v34  ;;  %6298 = vmatprep.subr.bf16.mxu1 %v6297_v5  ;;  %v10138_v34 = vld [vmem:[#allocation38_spill] sm:$0xff]  ;;  %v6481_v5 = vpack.c.bf16 %v8950_v58, %v8945_v47 }
 0x388   :  { %6466 = vmatprep.subr.bf16.mxu0 %v6465_v52  ;;  %v6307_v43 = vpack.c.bf16 %v10139_v26, %v10138_v34  ;;  %v10152_v34 = vld [vmem:[#allocation24_spill] sm:$0xff]  ;;  %v10153_v26 = vld [vmem:[#allocation29_spill] sm:$0xff] }
 0x38a   :  { %6300 = vmatpush3.bf16.msra.mxu1 %v6299_v54  ;;  %v10144_v54 = vld [vmem:[#allocation76_spill] sm:$0xff] }
 0x38b   :  { %6468 = vmatpush3.bf16.msra.mxu0 %v6465_v52  ;;  %6302 = vmatprep.subr.bf16.mxu1 %v6301_v7  ;;  %v10141_v52 = vld [vmem:[#allocation70_spill] sm:$0xff]  ;;  %v10146_v7 = vld [vmem:[#allocation23_spill] sm:$0xff] }
 0x38c   :  { %6470 = vmatprep.subr.bf16.mxu0 %v10135_v30  ;;  %v10163_v31 = vand.u32 4294901760, %v10141_v52 }
 0x38e   :  { %5554 = vmatmul.mubr.f32.vlgmr.msra.gmra.mrb[20].mxu0 %v8890_v45  ;;  %6304 = vmatpush3.bf16.msra.mxu1 %v6303_v22  ;;  %v10148_v22 = vld [vmem:[#allocation21_spill] sm:$0xff] }
 0x38f   :  { %5556 = vmatprep.mubr.f32.mxu0 %v8901_v60  ;;  %6472 = vmatpush3.bf16.msra.mxu0 %v10135_v30  ;;  %v6493_v30 = vpack.c.bf16 %v9049_v63, %v9044_v9  ;;  %v10200_v9 = vld [vmem:[#allocation59_spill] sm:$0xff] }
 0x390   :  { %6306 = vmatprep.subr.bf16.mxu1 %v6305_v48  ;;  %6474 = vmatprep.subr.bf16.mxu0 %v6473_v51  ;;  %v10151_v48 = vld [vmem:[#allocation71_spill] sm:$0xff] }
 0x392   :  { %5557 = vmatmul.mubr.f32.gmra.mrb[22].mxu0 %v8922_v39  ;;  %6308 = vmatpush3.bf16.msra.mxu1 %v6307_v43  ;;  %v10154_v43 = vld [vmem:[#allocation44_spill] sm:$0xff] }
 0x393   :  { %6476 = vmatpush3.bf16.msra.mxu0 %v6473_v51  ;;  %5591 = vmatprep.mubr.f32.mxu0 %v8796_v50  ;;  %v6497_v51 = vpack.c.bf16 %v9073_v37, %v9068_v56 }
 0x394   :  { %6310 = vmatprep.subr.bf16.mxu1 %v10140_v36  ;;  %6478 = vmatprep.subr.bf16.mxu0 %v6477_v28 }
 0x395   :  { %2865 = vmatmul.mubr.f32.vlgmr.msra.gmra.mrb[60].mxu1 %v10141_v52  ;;  %v10171_v52 = vld [vmem:[#allocation69_spill] sm:$0xff] }
 0x396   :  { %2871 = vmatprep.mubr.f32.mxu1 %v10142_v49  ;;  %6312 = vmatpush3.bf16.msra.mxu1 %v10143_v61 }
 0x397   :  { %6480 = vmatpush3.bf16.msra.mxu0 %v6477_v28  ;;  %6314 = vmatprep.subr.bf16.mxu1 %v10144_v54  ;;  %v10155_v28 = vld [vmem:[#allocation46_spill] sm:$0xff] }
 0x398   :  { %6482 = vmatprep.subr.bf16.mxu0 %v6481_v5 }
 0x399   :  { %2874 = vmatmul.mubr.f32.gmra.mrb[62].mxu1 %v8758_v42 }
 0x39a   :  { %2880 = vmatprep.mubr.f32.mxu1 %v8762_v2  ;;  %6316 = vmatpush3.bf16.msra.mxu1 %v10145_v21 }
 0x39b   :  { %6484 = vmatpush3.bf16.msra.mxu0 %v6481_v5  ;;  %6318 = vmatprep.subr.bf16.mxu1 %v10146_v7  ;;  %v10157_v5 = vld [vmem:[#allocation51_spill] sm:$0xff] }
 0x39c   :  { %6486 = vmatprep.subr.bf16.mxu0 %v6485_v59 }
 0x39d   :  { %2883 = vmatmul.mubr.f32.gmra.mrb[64].mxu1 %v8789_v41 }
 0x39e   :  { %2889 = vmatprep.mubr.f32.mxu1 %v8808_v25  ;;  %6320 = vmatpush3.bf16.msra.mxu1 %v10147_v15 }
 0x39f   :  { %6488 = vmatpush3.bf16.msra.mxu0 %v6485_v59  ;;  %6322 = vmatprep.subr.bf16.mxu1 %v10148_v22  ;;  %v10158_v59 = vld [vmem:[#allocation25_spill] sm:$0xff] }
 0x3a0   :  { %6490 = vmatprep.subr.bf16.mxu0 %v6489_v10 }
 0x3a1   :  { %2892 = vmatmul.mubr.f32.gmra.mrb[66].mxu1 %v8825_v38 }
 0x3a2   :  { %6324 = vmatpush3.bf16.msra.mxu1 %v10149_v57  ;;  %2996 = vmatprep.mubr.f32.mxu1 %v10150_v33  ;;  %v10161_v33 = vand.u32 4294901760, %v8796_v50  ;;  %v10165_v50 = vand.u32 4294901760, %v8758_v42  ;;  %v10169_v42 = vld [vmem:[#allocation77_spill] sm:$0xff] }
 0x3a3   :  { %6492 = vmatpush3.bf16.msra.mxu0 %v6489_v10  ;;  %6326 = vmatprep.subr.bf16.mxu1 %v10151_v48  ;;  %v10159_v10 = vld [vmem:[#allocation72_spill] sm:$0xff] }
 0x3a4   :  { %6494 = vmatprep.subr.bf16.mxu0 %v6493_v30 }
 0x3a6   :  { %6328 = vmatpush3.bf16.msra.mxu1 %v10152_v34 }
 0x3a7   :  { %6496 = vmatpush3.bf16.msra.mxu0 %v6493_v30  ;;  %6330 = vmatprep.subr.bf16.mxu1 %v10153_v26  ;;  %v10160_v30 = vld [vmem:[#allocation57_spill] sm:$0xff] }
 0x3a8   :  { %6498 = vmatprep.subr.bf16.mxu0 %v6497_v51 }
 0x3aa   :  { %6332 = vmatpush3.bf16.msra.mxu1 %v10154_v43 }
 0x3ab   :  { %6500 = vmatpush3.bf16.msra.mxu0 %v6497_v51  ;;  %6334 = vmatprep.subr.bf16.mxu1 %v10155_v28  ;;  %v10162_v51 = vld [vmem:[#allocation15_spill] sm:$0xff] }
 0x3ac   :  { %6502 = vmatprep.subr.bf16.mxu0 %v10156_v24 }
 0x3ae   :  { %5592 = vmatmul.mubr.f32.vlgmr.msra.gmra.mrb[20].mxu0 %v8920_v32  ;;  %6336 = vmatpush3.bf16.msra.mxu1 %v10157_v5 }
 0x3af   :  { %5594 = vmatprep.mubr.f32.mxu0 %v8927_v55  ;;  %6504 = vmatpush3.bf16.msra.mxu0 %v10156_v24 }
 0x3b0   :  { %6338 = vmatprep.subr.bf16.mxu1 %v10158_v59  ;;  %6506 = vmatprep.subr.bf16.mxu0 %v10159_v10 }
 0x3b2   :  { %5595 = vmatmul.mubr.f32.gmra.mrb[22].mxu0 %v8962_v53  ;;  %6340 = vmatpush3.bf16.msra.mxu1 %v10160_v30 }
 0x3b3   :  { %6508 = vmatpush3.bf16.msra.mxu0 %v10159_v10  ;;  %5629 = vmatprep.mubr.f32.mxu0 %v10161_v33 }
 0x3b4   :  { %6374 = vmatprep.subr.bf16.mxu1 %v10140_v36  ;;  %6510 = vmatprep.subr.bf16.mxu0 %v10162_v51  ;;  %v10166_v36 = vand.u32 4294901760, %v8762_v2  ;;  %v10170_v2 = vand.u32 4294901760, %v8825_v38  ;;  %v10174_v38 = vld [vmem:[#allocation58_spill] sm:$0xff] }
 0x3b5   :  { %3000 = vmatmul.mubr.f32.vlgmr.msra.gmra.mrb[68].mxu1 %v10163_v31  ;;  %v10168_v31 = vand.u32 4294901760, %v8808_v25  ;;  %v10173_v25 = vld [vmem:[#allocation80_spill] sm:$0xff]  ;;  %v10175_v49 = vand.u32 4294901760, %v10174_v38 }
 0x3b6   :  { %3007 = vmatprep.mubr.f32.mxu1 %v10164_v16  ;;  %6376 = vmatpush3.bf16.msra.mxu1 %v10143_v61  ;;  %v10167_v16 = vand.u32 4294901760, %v8789_v41  ;;  %v10172_v41 = vld [vmem:[#allocation79_spill] sm:$0xff]  ;;  %v10176_v61 = vld [vmem:[#allocation61_spill] sm:$0xff] }
 0x3b7   :  { %6512 = vmatpush3.bf16.msra.mxu0 %v10162_v51  ;;  %6378 = vmatprep.subr.bf16.mxu1 %v10144_v54  ;;  %v10177_v54 = vand.u32 4294901760, %v10176_v61 }
 0x3b8   :  { %6514 = vmatprep.subr.bf16.mxu0 %v8816_v18 }
 0x3b9   :  { %3011 = vmatmul.mubr.f32.gmra.mrb[70].mxu1 %v10165_v50 }
 0x3ba   :  { %3018 = vmatprep.mubr.f32.mxu1 %v10166_v36  ;;  %6380 = vmatpush3.bf16.msra.mxu1 %v10145_v21  ;;  %v6533_v21 = vpack.c.bf16 %v10177_v54, %v10175_v49 }
 0x3bb   :  { %6516 = vmatpush3.bf16.msra.mxu0 %v8816_v18  ;;  %6382 = vmatprep.subr.bf16.mxu1 %v10146_v7  ;;  %v10178_v7 = vand.u32 4294901760, %v8881_v13 }
 0x3bc   :  { %6518 = vmatprep.subr.bf16.mxu0 %v8866_v11 }
 0x3bd   :  { %3022 = vmatmul.mubr.f32.gmra.mrb[72].mxu1 %v10167_v16 }
 0x3be   :  { %3029 = vmatprep.mubr.f32.mxu1 %v10168_v31  ;;  %6384 = vmatpush3.bf16.msra.mxu1 %v10147_v15  ;;  %v10179_v15 = vand.u32 4294901760, %v8906_v8  ;;  %v10184_v8 = vand.u32 4294901760, %v8962_v53  ;;  %v10190_v53 = vand.u32 4294901760, %v8986_v44  ;;  %v10193_v44 = vld [vmem:[#allocation31_spill] sm:$0xff] }
 0x3bf   :  { %6520 = vmatpush3.bf16.msra.mxu0 %v8866_v11  ;;  %6386 = vmatprep.subr.bf16.mxu1 %v10148_v22 }
 0x3c0   :  { %6522 = vmatprep.subr.bf16.mxu0 %v10169_v42  ;;  %v6537_v22 = vpack.c.bf16 %v10179_v15, %v10178_v7 }
 0x3c1   :  { %3033 = vmatmul.mubr.f32.gmra.mrb[74].mxu1 %v10170_v2 }
 0x3c2   :  { %6388 = vmatpush3.bf16.msra.mxu1 %v10149_v57  ;;  %3324 = vmatprep.mubr.f32.mxu1 %v10171_v52  ;;  %v10180_v57 = vand.u32 4294901760, %v8920_v32  ;;  %v10185_v32 = vand.u32 4294901760, %v8945_v47 }
 0x3c3   :  { %6524 = vmatpush3.bf16.msra.mxu0 %v10169_v42  ;;  %6390 = vmatprep.subr.bf16.mxu1 %v10151_v48  ;;  %v10181_v48 = vand.u32 4294901760, %v8927_v55  ;;  %v10186_v55 = vand.u32 4294901760, %v8950_v58  ;;  %v10191_v58 = vld [vmem:[#allocation28_spill] sm:$0xff] }
 0x3c4   :  { %6526 = vmatprep.subr.bf16.mxu0 %v10172_v41 }
 0x3c6   :  { %6392 = vmatpush3.bf16.msra.mxu1 %v10152_v34  ;;  %v10182_v34 = vand.u32 4294901760, %v8933_v1  ;;  %v10188_v1 = vld [vmem:[#allocation26_spill] sm:$0xff] }
 0x3c7   :  { %6528 = vmatpush3.bf16.msra.mxu0 %v10172_v41  ;;  %6394 = vmatprep.subr.bf16.mxu1 %v10153_v26  ;;  %v10183_v26 = vand.u32 4294901760, %v8938_v19  ;;  %v10189_v19 = vand.u32 4294901760, %v8981_v40  ;;  %v6557_v40 = vpack.c.bf16 %v3567_v27, %v3560_v12 }
 0x3c8   :  { %6530 = vmatprep.subr.bf16.mxu0 %v10173_v25 }
 0x3c9   :  { %v6541_v13 = vpack.c.bf16 %v10183_v26, %v10182_v34  ;;  %v6549_v47 = vpack.c.bf16 %v10190_v53, %v10189_v19 }
 0x3ca   :  { %6396 = vmatpush3.bf16.msra.mxu1 %v10154_v43  ;;  %v6545_v43 = vpack.c.bf16 %v10186_v55, %v10185_v32 }
 0x3cb   :  { %6532 = vmatpush3.bf16.msra.mxu0 %v10173_v25  ;;  %6398 = vmatprep.subr.bf16.mxu1 %v10155_v28  ;;  %v10187_v28 = vmov 0.0|0.0  }
 0x3cc   :  { %6534 = vmatprep.subr.bf16.mxu0 %v6533_v21 }
 0x3ce   :  { %5630 = vmatmul.mubr.f32.vlgmr.msra.gmra.mrb[20].mxu0 %v10180_v57  ;;  %6400 = vmatpush3.bf16.msra.mxu1 %v10157_v5 }
 0x3cf   :  { %5632 = vmatprep.mubr.f32.mxu0 %v10181_v48  ;;  %6536 = vmatpush3.bf16.msra.mxu0 %v6533_v21 }
 0x3d0   :  { %6402 = vmatprep.subr.bf16.mxu1 %v10158_v59  ;;  %6538 = vmatprep.subr.bf16.mxu0 %v6537_v22 }
 0x3d2   :  { %5633 = vmatmul.mubr.f32.gmra.mrb[22].mxu0 %v10184_v8  ;;  %6404 = vmatpush3.bf16.msra.mxu1 %v10160_v30 }
 0x3d3   :  { %6540 = vmatpush3.bf16.msra.mxu0 %v6537_v22  ;;  %5667 = vmatprep.mubr.f32.mxu0 %v8780_v46 }
 0x3d4   :  { %6542 = vmatprep.subr.bf16.mxu0 %v6541_v13  ;;  %6597 = vmatprep.subr.bf16.mxu1 %v10187_v28 }
 0x3d5   :  { %3326 = vmatmul.mubr.f32.vlgmr.msra.gmra.mrb[76].mxu1 %v8746_v4  ;;  %v6553_v4 = vpack.c.bf16 %v3553_v17, %v3546_v3  ;;  %v10197_v3 = vld [vmem:[#allocation32_spill] sm:$0xff] }
 0x3d6   :  { %3331 = vmatprep.mubr.f32.mxu1 %v8704_v29  ;;  %6599 = vmatpush3.bf16.msra.mxu1 %v10188_v1  ;;  %v10192_v29 = vld [vmem:[#allocation30_spill] sm:$0xff]  ;;  %v10199_v17 = vld [vmem:[#allocation36_spill] sm:$0xff] }
 0x3d7   :  { %6544 = vmatpush3.bf16.msra.mxu0 %v6541_v13  ;;  %6600 = vmatprep.subr.bf16.mxu1 %v10187_v28 }
 0x3d8   :  { %6546 = vmatprep.subr.bf16.mxu0 %v6545_v43 }
 0x3d9   :  { %3333 = vmatmul.mubr.f32.gmra.mrb[78].mxu1 %v10114_v14 }
 0x3da   :  { %3338 = vmatprep.mubr.f32.mxu1 %v10115_v20  ;;  %6602 = vmatpush3.bf16.msra.mxu1 %v10191_v58 }
 0x3db   :  { %6548 = vmatpush3.bf16.msra.mxu0 %v6545_v43  ;;  %6603 = vmatprep.subr.bf16.mxu1 %v10187_v28 }
 0x3dc   :  { %6550 = vmatprep.subr.bf16.mxu0 %v6549_v47 }
 0x3dd   :  { %3340 = vmatmul.mubr.f32.gmra.mrb[80].mxu1 %v8755_v35  ;;  %v10195_v35 = vand.u32 4294901760, %v9068_v56 }
 0x3de   :  { %3345 = vmatprep.mubr.f32.mxu1 %v8769_v6  ;;  %6605 = vmatpush3.bf16.msra.mxu1 %v10192_v29  ;;  %v10196_v6 = vand.u32 4294901760, %v9073_v37 }
 0x3df   :  { %6552 = vmatpush3.bf16.msra.mxu0 %v6549_v47  ;;  %6606 = vmatprep.subr.bf16.mxu1 %v10187_v28 }
 0x3e0   :  { %6554 = vmatprep.subr.bf16.mxu0 %v6553_v4  ;;  %v6561_v62 = vpack.c.bf16 %v10196_v6, %v10195_v35 }
 0x3e1   :  { %3347 = vmatmul.mubr.f32.gmra.mrb[82].mxu1 %v8784_v23  ;;  %v10198_v23 = vld [vmem:[#allocation34_spill] sm:$0xff] }
 0x3e2   :  { %6608 = vmatpush3.bf16.msra.mxu1 %v10193_v44  ;;  %5743 = vmatprep.mubr.msk.f32.mxu1 %vm6837_vm6, %v10194_v0 }
 0x3e3   :  { %6556 = vmatpush3.bf16.msra.mxu0 %v6553_v4  ;;  %6609 = vmatprep.subr.bf16.mxu1 %v10187_v28 }
 0x3e4   :  { %6558 = vmatprep.subr.bf16.mxu0 %v6557_v40 }
 0x3e6   :  { %6611 = vmatpush3.bf16.msra.mxu1 %v10197_v3 }
 0x3e7   :  { %6560 = vmatpush3.bf16.msra.mxu0 %v6557_v40  ;;  %6612 = vmatprep.subr.bf16.mxu1 %v10187_v28 }
 0x3e8   :  { %6562 = vmatprep.subr.bf16.mxu0 %v6561_v62 }
 0x3ea   :  { %6614 = vmatpush3.bf16.msra.mxu1 %v10198_v23 }
 0x3eb   :  { %6564 = vmatpush3.bf16.msra.mxu0 %v6561_v62  ;;  %6615 = vmatprep.subr.bf16.mxu1 %v10187_v28 }
 0x3ec   :  { %6566 = vmatprep.subr.bf16.mxu0 %v10156_v24 }
 0x3ee   :  { %5668 = vmatmul.mubr.f32.vlgmr.msra.gmra.mrb[20].mxu0 %v8890_v45  ;;  %6617 = vmatpush3.bf16.msra.mxu1 %v10199_v17 }
 0x3ef   :  { %5670 = vmatprep.mubr.f32.mxu0 %v8901_v60  ;;  %6568 = vmatpush3.bf16.msra.mxu0 %v10156_v24 }
 0x3f0   :  { %6570 = vmatprep.subr.bf16.mxu0 %v10159_v10  ;;  %6618 = vmatprep.subr.bf16.mxu1 %v10187_v28 }
 0x3f2   :  { %5671 = vmatmul.mubr.f32.gmra.mrb[22].mxu0 %v8922_v39  ;;  %6620 = vmatpush3.bf16.msra.mxu1 %v10200_v9 }
 0x3f3   :  { %6572 = vmatpush3.bf16.msra.mxu0 %v10159_v10  ;;  %5705 = vmatprep.mubr.f32.mxu0 %v8780_v46 }
 0x3f4   :  { %6574 = vmatprep.subr.bf16.mxu0 %v10162_v51  ;;  %6621 = vmatprep.subr.bf16.mxu1 %v10187_v28 }
 0x3f7   :  { %6576 = vmatpush3.bf16.msra.mxu0 %v10162_v51 }
 0x3f8   :  { %6578 = vmatprep.subr.bf16.mxu0 %v8816_v18 }
 0x3fb   :  { %6580 = vmatpush3.bf16.msra.mxu0 %v8816_v18 }
 0x3fc   :  { %6582 = vmatprep.subr.bf16.mxu0 %v8866_v11 }
 0x3ff   :  { %6584 = vmatpush3.bf16.msra.mxu0 %v8866_v11 }
 0x400   :  { %6586 = vmatprep.subr.bf16.mxu0 %v10169_v42 }
 0x403   :  { %6588 = vmatpush3.bf16.msra.mxu0 %v10169_v42 }
 0x404   :  { %6590 = vmatprep.subr.bf16.mxu0 %v10172_v41 }
 0x407   :  { %6592 = vmatpush3.bf16.msra.mxu0 %v10172_v41 }
 0x408   :  { %6594 = vmatprep.subr.bf16.mxu0 %v10173_v25 }
 0x40b   :  { %6596 = vmatpush3.bf16.msra.mxu0 %v10173_v25 }
 0x40e   :  { %5706 = vmatmul.mubr.f32.vlgmr.msra.gmra.mrb[20].mxu0 %v8890_v45 }
 0x40f   :  { %5708 = vmatprep.mubr.f32.mxu0 %v8901_v60 }
 0x412   :  { %5709 = vmatmul.mubr.f32.gmra.mrb[22].mxu0 %v8922_v39 }
 0x420   :  { %v4975_v46 = vpop.f32.mrb[12].mxu0 }
 0x421   :  { %v4976_v18 = vpop.f32.mrb[13].mxu0 }
 0x422   :  { %v4977_v11 = vadd.f32 %v4976_v18, %v4975_v46 }
 0x424   :  { %v4978_v63 = vpop.f32.mrb[14].mxu0 }
 0x425   :  { %v4979_v12 = vpop.f32.mrb[15].mxu0 }
 0x426   :  { %v9308_v27 = vadd.f32 %v4979_v12, %v4978_v63 }
 0x428   :  { %v4799_v56 = vpop.f32.mrb[44].mxu1  ;;  %v4981_v37 = vpop.f32.mrb[16].mxu0 }
 0x429   :  { %v4800_v14 = vpop.f32.mrb[45].mxu1  ;;  %v4982_v20 = vpop.f32.mrb[17].mxu0 }
 0x42a   :  { %v4801_v24 = vadd.f32 %v4800_v14, %v4799_v56  ;;  %v4983_v5 = vadd.f32 %v4982_v20, %v4981_v37 }
 0x42c   :  { %v4802_v59 = vpop.f32.mrb[46].mxu1  ;;  %v4984_v10 = vpop.f32.mrb[18].mxu0 }
 0x42d   :  { %v4803_v45 = vpop.f32.mrb[47].mxu1  ;;  %v4985_v30 = vpop.f32.mrb[19].mxu0 }
 0x42e   :  { %v4804_v60 = vadd.f32 %v4803_v45, %v4802_v59  ;;  %v4986_v33 = vadd.f32 %v4985_v30, %v4984_v10 }
 0x430   :  { %v4805_v39 = vpop.f32.mrb[48].mxu1 }
 0x431   :  { %v4806_v51 = vpop.f32.mrb[49].mxu1 }
 0x432   :  { %v4807_v50 = vadd.f32 %v4806_v51, %v4805_v39 }
 0x434   :  { %v4808_v36 = vpop.f32.mrb[50].mxu1 }
 0x435   :  { %v4809_v16 = vpop.f32.mrb[51].mxu1 }
 0x436   :  { %v4810_v31 = vadd.f32 %v4809_v16, %v4808_v36 }
 0x448   :  { %v4843_v42 = vpop.f32.mrb[52].mxu1 }
 0x449   :  { %v4844_v2 = vpop.f32.mrb[53].mxu1 }
 0x44a   :  { %v4845_v52 = vadd.f32 %v4844_v2, %v4843_v42 }
 0x44c   :  { %v2708_v41 = vadd.f32 %v4845_v52, %v4801_v24  ;;  %v4846_v25 = vpop.f32.mrb[54].mxu1 }
 0x44d   :  { %v4847_v38 = vpop.f32.mrb[55].mxu1 }
 0x44e   :  { %v4848_v49 = vadd.f32 %v4847_v38, %v4846_v25 }
 0x450   :  { %v2715_v61 = vadd.f32 %v4848_v49, %v4804_v60  ;;  %v4849_v54 = vpop.f32.mrb[56].mxu1 }
 0x451   :  { %v4850_v21 = vpop.f32.mrb[57].mxu1 }
 0x452   :  { %v4851_v7 = vadd.f32 %v4850_v21, %v4849_v54 }
 0x454   :  { %v2722_v15 = vadd.f32 %v4851_v7, %v4807_v50  ;;  %v4852_v22 = vpop.f32.mrb[58].mxu1 }
 0x455   :  { %v4853_v57 = vpop.f32.mrb[59].mxu1 }
 0x456   :  { %v4854_v48 = vadd.f32 %v4853_v57, %v4852_v22 }
 0x458   :  { %v2729_v34 = vadd.f32 %v4854_v48, %v4810_v31 }
 0x468   :  { %v4887_v26 = vpop.f32.mrb[60].mxu1 }
 0x469   :  { %v4888_v13 = vpop.f32.mrb[61].mxu1 }
 0x46a   :  { %v4889_v8 = vadd.f32 %v4888_v13, %v4887_v26 }
 0x46c   :  { %v2867_v32 = vadd.f32 %v4889_v8, %v2708_v41  ;;  %v4890_v55 = vpop.f32.mrb[62].mxu1 }
 0x46d   :  { %v4891_v43 = vpop.f32.mrb[63].mxu1 }
 0x46e   :  { %v4892_v19 = vadd.f32 %v4891_v43, %v4890_v55 }
 0x470   :  { %v2876_v53 = vadd.f32 %v4892_v19, %v2715_v61  ;;  %v4893_v47 = vpop.f32.mrb[64].mxu1 }
 0x471   :  { %v4894_v4 = vpop.f32.mrb[65].mxu1 }
 0x472   :  { %v4895_v40 = vadd.f32 %v4894_v4, %v4893_v47 }
 0x474   :  { %v2885_v35 = vadd.f32 %v4895_v40, %v2722_v15  ;;  %v4896_v6 = vpop.f32.mrb[66].mxu1 }
 0x475   :  { %v4897_v62 = vpop.f32.mrb[67].mxu1 }
 0x476   :  { %v4898_v46 = vadd.f32 %v4897_v62, %v4896_v6 }
 0x478   :  { %v2894_v18 = vadd.f32 %v4898_v46, %v2729_v34 }
 0x488   :  { %v4931_v63 = vpop.f32.mrb[68].mxu1 }
 0x489   :  { %v4932_v12 = vpop.f32.mrb[69].mxu1 }
 0x48a   :  { %v4933_v56 = vadd.f32 %v4932_v12, %v4931_v63 }
 0x48c   :  { %v3002_v37 = vadd.f32 %v4933_v56, %v2867_v32  ;;  %v4934_v14 = vpop.f32.mrb[70].mxu1 }
 0x48d   :  { %v4935_v20 = vpop.f32.mrb[71].mxu1 }
 0x48e   :  { %v4936_v24 = vadd.f32 %v4935_v20, %v4934_v14  ;;  %v3203_v59 = vadd.f32 %v4977_v11, %v3002_v37 }
 0x490   :  { %v3013_v10 = vadd.f32 %v4936_v24, %v2876_v53  ;;  %v4937_v45 = vpop.f32.mrb[72].mxu1 }
 0x491   :  { %v4938_v30 = vpop.f32.mrb[73].mxu1 }
 0x492   :  { %v4939_v60 = vadd.f32 %v4938_v30, %v4937_v45  ;;  %v3210_v39 = vadd.f32 %v9308_v27, %v3013_v10 }
 0x494   :  { %v3024_v51 = vadd.f32 %v4939_v60, %v2885_v35  ;;  %v4940_v50 = vpop.f32.mrb[74].mxu1 }
 0x495   :  { %v4941_v36 = vpop.f32.mrb[75].mxu1 }
 0x496   :  { %v4942_v16 = vadd.f32 %v4941_v36, %v4940_v50  ;;  %v3217_v31 = vadd.f32 %v4983_v5, %v3024_v51  ;;  %v10201_v51 = vld [vmem:[#allocation64_spill] sm:$0xff] }
 0x498   :  { %v3035_v42 = vadd.f32 %v4942_v16, %v2894_v18 }
 0x49a   :  { %v3224_v2 = vadd.f32 %v4986_v33, %v3035_v42 }
 0x4a8   :  { %v5019_v52 = vpop.f32.mrb[76].mxu1 }
 0x4a9   :  { %v5020_v41 = vpop.f32.mrb[77].mxu1 }
 0x4aa   :  { %v5021_v25 = vadd.f32 %v5020_v41, %v5019_v52  ;;  %v4348_v52 = vld [vmem:[%s9376_s7] ss:$0 sm:$0xff] }
 0x4ac   :  { %v5022_v38 = vpop.f32.mrb[78].mxu1  ;;  %v3328_v49 = vadd.f32 %v5021_v25, %v3203_v59 }
 0x4ad   :  { %v5023_v61 = vpop.f32.mrb[79].mxu1 }
 0x4ae   :  { %v5024_v11 = vadd.f32 %v5023_v61, %v5022_v38 }
 0x4b0   :  { %v5025_v54 = vpop.f32.mrb[80].mxu1  ;;  %v3335_v21 = vadd.f32 %v5024_v11, %v3210_v39 }
 0x4b1   :  { %v5026_v7 = vpop.f32.mrb[81].mxu1 }
 0x4b2   :  { %v5027_v15 = vadd.f32 %v5026_v7, %v5025_v54  ;;  %v6707_v7 = vld [vmem:[#allocation2] sm:$0xff] }
 0x4b4   :  { %v5028_v22 = vpop.f32.mrb[82].mxu1  ;;  %v3342_v27 = vadd.f32 %v5027_v15, %v3217_v31 }
 0x4b5   :  { %v5029_v57 = vpop.f32.mrb[83].mxu1 }
 0x4b6   :  { %v5030_v48 = vadd.f32 %v5029_v57, %v5028_v22  ;;  %v6708_v22 = vld [vmem:[#allocation2 + $0x8] sm:$0xff]  ;;  %v6709_v57 = vld [vmem:[#allocation2 + $0x10] sm:$0xff] }
 0x4b8   :  { %v3349_v34 = vadd.f32 %v5030_v48, %v3224_v2 }
 0x4e1   :  { %v5707_v26 = vpop.f32.mrb[20].mxu0 }
 0x4e2   :  { %v9311_v5 = vadd.f32 %v5707_v26, %v3335_v21  ;;  %v4100_v33 = vpop.f32.mrb[21].mxu0 }
 0x4e3   :  { %v9313_v13 = vadd.f32 %v4100_v33, %v3328_v49 }
 0x4e4   :  { %v4132_v62 = vmul.f32 %v9311_v5, %v9311_v5 }
 0x4e5   :  { %v5710_v8 = vpop.f32.mrb[22].mxu0  ;;  %v4122_v43 = vadd.f32 %v9313_v13, %v9311_v5  ;;  %v4131_v46 = vmul.f32 %v9313_v13, %v9313_v13 }
 0x4e6   :  { %v9315_v32 = vadd.f32 %v5710_v8, %v3349_v34  ;;  %v4112_v55 = vpop.f32.mrb[23].mxu0  ;;  %v6710_v34 = vld [vmem:[#allocation2 + $0x18] sm:$0xff] }
 0x4e7   :  { %v6652_v19 = vadd.f32 %v4112_v55, %v3342_v27  ;;  %v4135_v56 = vadd.f32 %v4132_v62, %v4131_v46 }
 0x4e8   :  { %v4134_v14 = vmul.f32 %v9315_v32, %v9315_v32 }
 0x4e9   :  { %v4123_v53 = vadd.f32 %v6652_v19, %v4122_v43  ;;  %v4133_v63 = vmul.f32 %v6652_v19, %v6652_v19 }
 0x4eb   :  { %v4124_v47 = vadd.f32 %v9315_v32, %v4123_v53  ;;  %v4136_v37 = vadd.f32 %v4135_v56, %v4133_v63 }
 0x4ed   :  { %v4125_v4 = vrot.slane %v4124_v47, 4  ;;  %v4137_v20 = vadd.f32 %v4136_v37, %v4134_v14 }
 0x4ef   :  { %v4126_v40 = vadd.f32 %v4125_v4, %v4124_v47  ;;  %v4138_v24 = vrot.slane %v4137_v20, 4 }
 0x4f1   :  { %v4127_v35 = vrot.slane %v4126_v40, 2 }
 0x4f3   :  { %v4128_v6 = vadd.f32 %v4127_v35, %v4126_v40 }
 0x4f5   :  { %v4129_v18 = vrot.slane %v4128_v6, 1 }
 0x4f7   :  { %v4130_v12 = vadd.f32 %v4129_v18, %v4128_v6 }
 0x4f9   :  { %5744 = vmatmul.mubr.f32.vlgmr.msra.gmra.mrb[84].mxu1 %v4130_v12 }
 0x4fa   :  { %6623 = vmatpush3.bf16.msra.mxu1 %v10188_v1  ;;  %5778 = vmatprep.mubr.msk.f32.mxu1 %vm6837_vm6, %v10194_v0  ;;  %v4139_v1 = vadd.f32 %v4138_v24, %v4137_v20 }
 0x4fb   :  { %6624 = vmatprep.subr.bf16.mxu1 %v10187_v28 }
 0x4fc   :  { %v4140_v0 = vrot.slane %v4139_v1, 2 }
 0x4fe   :  { %6626 = vmatpush3.bf16.msra.mxu1 %v10191_v58  ;;  %v4141_v58 = vadd.f32 %v4140_v0, %v4139_v1 }
 0x4ff   :  { %6627 = vmatprep.subr.bf16.mxu1 %v10187_v28 }
 0x502   :  { %6629 = vmatpush3.bf16.msra.mxu1 %v10192_v29  ;;  %v4142_v29 = vrot.slane %v4141_v58, 1 }
 0x503   :  { %6630 = vmatprep.subr.bf16.mxu1 %v10187_v28 }
 0x506   :  { %6632 = vmatpush3.bf16.msra.mxu1 %v10193_v44  ;;  %v4143_v44 = vadd.f32 %v4142_v29, %v4141_v58 }
 0x507   :  { %6633 = vmatprep.subr.bf16.mxu1 %v10187_v28 }
 0x50a   :  { %6635 = vmatpush3.bf16.msra.mxu1 %v10197_v3 }
 0x50b   :  { %6636 = vmatprep.subr.bf16.mxu1 %v10187_v28 }
 0x50e   :  { %6638 = vmatpush3.bf16.msra.mxu1 %v10198_v23 }
 0x50f   :  { %6639 = vmatprep.subr.bf16.mxu1 %v10187_v28 }
 0x512   :  { %6641 = vmatpush3.bf16.msra.mxu1 %v10199_v17 }
 0x513   :  { %6642 = vmatprep.subr.bf16.mxu1 %v10187_v28  ;;  %v203_v28 = vld [vmem:[%s9375_s6] sm:$0x1]  ;;  %s6838_s6 = smov [#allocation10]  }
 0x514   :  { %s4333_s15 = sshll.u32 %s6838_s6, 4  ;;  %s4334_s15 = int_to_ptr.vmem [resolvable:$true] %s4333_s15 }
 0x515   :  { %s6799_s7 = scalar_lea.vmem %s4334_s15, 512  ;;  %p6804_p5 = scmp.lt.s32.totalorder %s4334_s15, %s4334_s15 }
 0x516   :  { %6644 = vmatpush3.bf16.msra.mxu1 %v10200_v9  ;;  %p6800_p4 = scmp.ne.s32.totalorder %s4334_s15, %s6799_s7  ;;  %p6805_p6 = scmp.lt.s32.totalorder %s6799_s7, %s6799_s7 }
 0x518   :  { %p6806_p7 = por %p6805_p6, %p6804_p5 }
 0x519   :  { %5779 = vmatmul.mubr.f32.vlgmr.msra.gmra.mrb[86].mxu1 %v4143_v44 }
 0x51a   :  { %p6807_p8 = pnand %p6806_p7, %p6800_p4 }
 0x5cc   :  { %v4210_v59 = vpop.f32.mrb[84].mxu1 }
 0x5cd   :  { %v5745_v10 = vpop.f32.mrb[85].mxu1  ;;  %v4284_v3 = vmul.f32 %v4210_v59, %v4210_v59  ;;  %v4290_v50 = vrot.slane %v4210_v59, %v10201_v51 }
 0x5cf   :  { %v4291_v9 = vsub.f32 %v9313_v13, %v4290_v50  ;;  %v4292_v16 = vsub.f32 %v9311_v5, %v4290_v50  ;;  %v4293_v31 = vsub.f32 %v6652_v19, %v4290_v50  ;;  %v4294_v42 = vsub.f32 %v9315_v32, %v4290_v50 }
 0x5ec   :  { %v4280_v45 = vpop.f32.mrb[86].mxu1 }
 0x5ed   :  { %v4285_v30 = vsub.f32 %v4280_v45, %v4284_v3  ;;  %v5780_v60 = vpop.f32.mrb[87].mxu1 }
 0x5ef   :  { %v4286_v39 = vmax.f32 %v4285_v30, 0.0 }
 0x5f1   :  { %v4295_v23 = vadd.f32 1e-05, %v4286_v39 }
 0x5f3   :  { %6705 = vrsqrt.f32 %v4295_v23 }
 0x5fd   :  { %v6706_v17 = vpop.eup %6705 }
 0x5fe   :  { %v4297_v36 = vmul.f32 %v6706_v17, %v203_v28 }
 0x600   :  { %v4301_v2 = vrot.slane %v4297_v36, %v10201_v51 }
 0x602   :  { %v4302_v41 = vmul.f32 %v4301_v2, %v4291_v9  ;;  %v4303_v25 = vmul.f32 %v4301_v2, %v4292_v16  ;;  %v4304_v38 = vmul.f32 %v4301_v2, %v4293_v31  ;;  %v4305_v49 = vmul.f32 %v4301_v2, %v4294_v42 }
 0x604   :  { %v4312_v61 = vadd.f32 %v4348_v52, %v4302_v41  ;;  %v4313_v11 = vadd.f32 %v4348_v52, %v4303_v25  ;;  %v4314_v54 = vadd.f32 %v4348_v52, %v4304_v38  ;;  %v4315_v21 = vadd.f32 %v4348_v52, %v4305_v49 }
 0x606   :  { %v4316_v15 = vadd.f32 %v6707_v7, %v4312_v61  ;;  %v4317_v27 = vadd.f32 %v6708_v22, %v4313_v11  ;;  %v4318_v48 = vadd.f32 %v6709_v57, %v4314_v54  ;;  %v4319_v26 = vadd.f32 %v6710_v34, %v4315_v21 }
 0x608   :  { %v4320_v5 = vmax.f32 %v4316_v15, 0.0  ;;  %v4321_v33 = vmax.f32 %v4317_v27, 0.0  ;;  %v4322_v13 = vmax.f32 %v4318_v48, 0.0  ;;  %v4323_v8 = vmax.f32 %v4319_v26, 0.0 }
 0x60a   :  { %4324 = vst [vmem:[#allocation10] sm:$0xff] %v4320_v5  ;;  %4325 = vst [vmem:[#allocation10 + $0x8] sm:$0xff] %v4321_v33 }
 0x60b   :  { %4326 = vst [vmem:[#allocation10 + $0x10] sm:$0xff] %v4322_v13  ;;  %4327 = vst [vmem:[#allocation10 + $0x18] sm:$0xff] %v4323_v8 }
 0x60c   :  { %6810 = shalt.err (!%p6807_p8)
}
 0x60d   :  { %s6811_s20 = scalar_lea.hbm %s9377_s8, 512 }
 0x60e   :  { %p6812_p9 = scmp.ne.s32.totalorder %s9377_s8, %s6811_s20  ;;  %p6815_p10 = scmp.lt.u32.totalorder %s6811_s20, %s9377_s8 }
 0x610   :  { %p6817_p11 = pnand %p6815_p10, %p6812_p9 }
 0x612   :  { %6820 = shalt.err (!%p6817_p11)
}
 0x613   :  { %4339 = dma.vmem_to_hbm [thread:$0]  %s4334_s15, 512, %s9377_s8, [#allocation4], %s6831_s17, %s6831_s17, %s6832_s18  }
 0x614   :  { %6827 = dma.done.wait [#allocation4], 512  }
 0x615   :  { %6828 = vsyncadd [#allocation4], 4294966784 }
 0x616   :  { %4343 = vsyncpa [#allocation3], 1 }
 0x617   :  { %4344 = vsyncpa [#allocation6], 1 }
 0x618   :  { %4345 = vsyncpa [#allocation9], 1 }
 0x619   :  { %4346 = vsyncpa [#allocation4], 1 }

</bundles_post_ra>
